<compile_context>
chip_gen: v5e
topology: v5e:2x2
jax: 0.10.0
libtpu: 0.0.40
codegen_flags: <defaults>
</compile_context>

<pallas_src>
import functools

import jax
import jax.numpy as jnp
from jax.experimental import pallas as pl
from jax.experimental.pallas import tpu as pltpu


def _round_up(x, m):
    return (x + m - 1) // m * m


def _pad_and_tile(dim, align, max_tile):
    """Return (padded_dim, tile) with tile | padded_dim, align | tile."""
    d = _round_up(dim, align)
    if d <= max_tile:
        return d, d
    return _round_up(dim, max_tile), max_tile


def _pad2d(x, rows, cols):
    return jnp.pad(x, ((0, rows - x.shape[0]), (0, cols - x.shape[1])))


_VMEM_LIMIT = 32 * 1024 * 1024  # explicit scoped-VMEM budget (safe on all gens)


# ----------------------------------------------------------------------------
# Pallas kernel 1: tiled matmul + bias (+ optional fused ReLU)
#   grid = (M_tiles, N_tiles, K_tiles); K innermost; accumulate into o_ref.
# ----------------------------------------------------------------------------
def _matmul_bias_kernel(a_ref, b_ref, bias_ref, o_ref, *, apply_relu):
    k = pl.program_id(2)

    @pl.when(k == 0)
    def _():
        o_ref[...] = jnp.zeros_like(o_ref)

    o_ref[...] += jnp.dot(a_ref[...], b_ref[...],
                          preferred_element_type=jnp.float32)

    @pl.when(k == pl.num_programs(2) - 1)
    def _():
        r = o_ref[...] + bias_ref[...]
        if apply_relu:
            r = jnp.maximum(r, 0.0)
        o_ref[...] = r.astype(o_ref.dtype)


def matmul_bias(a, b, bias, apply_relu):
    """a: (M, K), b: (K, N), bias: (N,) -> f32 (M, N) = a @ b + bias [+ReLU].

    Operands are cast to bf16 (MXU native); accumulation is f32.
    """
    M, K = a.shape
    K2, N = b.shape
    assert K == K2

    M_pad, tm = _pad_and_tile(M, 16, 256)    # bf16 sublane packing -> mult of 16
    N_pad, tn = _pad_and_tile(N, 128, 256)
    K_pad, tk = _pad_and_tile(K, 128, 512)

    a_p = _pad2d(a.astype(jnp.bfloat16), M_pad, K_pad)
    b_p = _pad2d(b.astype(jnp.bfloat16), K_pad, N_pad)
    bias_p = jnp.pad(bias.astype(jnp.float32), (0, N_pad - N)).reshape(1, N_pad)

    grid = (M_pad // tm, N_pad // tn, K_pad // tk)
    out = pl.pallas_call(
        functools.partial(_matmul_bias_kernel, apply_relu=apply_relu),
        out_shape=jax.ShapeDtypeStruct((M_pad, N_pad), jnp.float32),
        grid=grid,
        in_specs=[
            pl.BlockSpec((tm, tk), lambda i, j, k: (i, k)),
            pl.BlockSpec((tk, tn), lambda i, j, k: (k, j)),
            pl.BlockSpec((1, tn), lambda i, j, k: (0, j)),
        ],
        out_specs=pl.BlockSpec((tm, tn), lambda i, j, k: (i, j)),
        compiler_params=pltpu.CompilerParams(
            dimension_semantics=("parallel", "parallel", "arbitrary"),
            vmem_limit_bytes=_VMEM_LIMIT),
    )(a_p, b_p, bias_p)
    return out[:M, :N]


# ----------------------------------------------------------------------------
# Pallas kernel 2: fused ReLU + BatchNorm (training mode batch stats,
# gamma=1, beta=0, biased variance, eps=1e-5), NHWC layout (M=N*H*W rows, C
# lanes).  Two-phase grid: phase 0 accumulates per-channel sum / sum-sq into
# VMEM scratch, phase 1 normalizes tile by tile.
# ----------------------------------------------------------------------------
def _relu_bn_kernel(x_ref, o_ref, sum_ref, sq_ref, *, inv_count, eps):
    phase = pl.program_id(0)
    m = pl.program_id(1)

    @pl.when(jnp.logical_and(phase == 0, m == 0))
    def _():
        sum_ref[...] = jnp.zeros_like(sum_ref)
        sq_ref[...] = jnp.zeros_like(sq_ref)

    x = jnp.maximum(x_ref[...], 0.0)  # ReLU (padded rows are zero -> no effect)

    @pl.when(phase == 0)
    def _():
        sum_ref[...] += jnp.sum(x, axis=0, keepdims=True)
        sq_ref[...] += jnp.sum(x * x, axis=0, keepdims=True)

    @pl.when(jnp.logical_and(phase == 1, m == 0))
    def _():
        mean = sum_ref[...] * inv_count
        var = sq_ref[...] * inv_count - mean * mean
        sum_ref[...] = mean                       # reuse scratch: mean
        sq_ref[...] = jax.lax.rsqrt(var + eps)    # reuse scratch: inv-std

    @pl.when(phase == 1)
    def _():
        o_ref[...] = (x - sum_ref[...]) * sq_ref[...]


def relu_batchnorm_nhwc(x, eps=1e-5):
    """x: (N, H, W, C) f32 -> ReLU then per-channel batch-stat normalization."""
    N, H, W, C = x.shape
    M = N * H * W
    C_pad = _round_up(C, 128)
    M_pad, tm = _pad_and_tile(M, 8, 256)

    xp = _pad2d(x.reshape(M, C), M_pad, C_pad)
    grid = (2, M_pad // tm)  # (phase, M tiles)

    out = pl.pallas_call(
        functools.partial(_relu_bn_kernel, inv_count=1.0 / M, eps=eps),
        out_shape=jax.ShapeDtypeStruct((M_pad, C_pad), jnp.float32),
        grid=grid,
        in_specs=[pl.BlockSpec((tm, C_pad), lambda p, m: (m, 0))],
        # During phase 0 all iterations alias output block 0 (never flushed
        # with garbage because phase 1 / m==0 fully rewrites it before the
        # block index first changes); phase 1 walks the real blocks.
        out_specs=pl.BlockSpec((tm, C_pad), lambda p, m: (m * p, 0)),
        scratch_shapes=[pltpu.VMEM((1, C_pad), jnp.float32),
                        pltpu.VMEM((1, C_pad), jnp.float32)],
        compiler_params=pltpu.CompilerParams(
            dimension_semantics=("arbitrary", "arbitrary"),
            vmem_limit_bytes=_VMEM_LIMIT),
    )(xp)
    return out[:M, :C].reshape(N, H, W, C)


# ----------------------------------------------------------------------------
# MaxPool (NHWC).  Plain-JAX chain of pairwise maxima over the 9 strided
# views (per perf review: memory-bound, XLA fuses it with no materialized
# 9x stack; a Pallas kernel here only adds HBM traffic).
# ----------------------------------------------------------------------------
def maxpool2d_nhwc(x, k=3, s=2):
    N, H, W, C = x.shape
    OH = (H - k) // s + 1
    OW = (W - k) // s + 1
    out = None
    for i in range(k):
        for j in range(k):
            v = x[:, i:i + (OH - 1) * s + 1:s, j:j + (OW - 1) * s + 1:s, :]
            out = v if out is None else jnp.maximum(out, v)
    return out


# ----------------------------------------------------------------------------
# Convolution = NHWC im2col (bf16, single pad, no extra transpose) + Pallas
# matmul kernel.
# ----------------------------------------------------------------------------
def conv2d_nhwc(x, w, b, stride, pad, relu):
    """x: (N, H, W, C), w: (OC, C, KH, KW), b: (OC,) -> (N, OH, OW, OC)."""
    N, H, W, C = x.shape
    OC, _, KH, KW = w.shape
    xb = x.astype(jnp.bfloat16)
    xp = jnp.pad(xb, ((0, 0), (pad, pad), (pad, pad), (0, 0)))
    Hp, Wp = H + 2 * pad, W + 2 * pad
    OH = (Hp - KH) // stride + 1
    OW = (Wp - KW) // stride + 1

    patches = []
    for i in range(KH):
        for j in range(KW):
            patches.append(xp[:, i:i + (OH - 1) * stride + 1:stride,
                               j:j + (OW - 1) * stride + 1:stride, :])
    # (N, OH, OW, KH*KW, C) -> (M, KH*KW*C); K ordered as (kh, kw, c)
    p = jnp.stack(patches, axis=3).reshape(N * OH * OW, KH * KW * C)
    # weight rows in matching (kh, kw, c) order
    wmat = w.transpose(2, 3, 1, 0).reshape(KH * KW * C, OC)

    out = matmul_bias(p, wmat, b, apply_relu=relu)  # (M, OC) f32
    return out.reshape(N, OH, OW, OC)


def linear(x, w, b, relu):
    """PyTorch Linear: x @ w.T + b, w: (out, in)."""
    return matmul_bias(x, w.T, b, apply_relu=relu)


# ----------------------------------------------------------------------------
# Parameters (deterministic synthetic init)
# ----------------------------------------------------------------------------
def init_params(key):
    def conv_p(key, oc, ic, k):
        k1, k2 = jax.random.split(key)
        w = jax.random.normal(k1, (oc, ic, k, k), jnp.float32) * 0.05
        b = jax.random.normal(k2, (oc,), jnp.float32) * 0.05
        return w, b

    def fc_p(key, o, i):
        k1, k2 = jax.random.split(key)
        w = jax.random.normal(k1, (o, i), jnp.float32) * 0.05
        b = jax.random.normal(k2, (o,), jnp.float32) * 0.05
        return w, b

    keys = jax.random.split(key, 8)
    return {
        "conv1": conv_p(keys[0], 96, 3, 11),
        "conv2": conv_p(keys[1], 256, 96, 5),
        "conv3": conv_p(keys[2], 384, 256, 3),
        "conv4": conv_p(keys[3], 384, 384, 3),
        "conv5": conv_p(keys[4], 256, 384, 3),
        "fc6": fc_p(keys[5], 256, 256),
        "fc7": fc_p(keys[6], 256, 256),
        "fc8": fc_p(keys[7], 10, 256),
    }


# ----------------------------------------------------------------------------
# Forward pass (mirrors AlexNet.forward).  Internally NHWC.
# ----------------------------------------------------------------------------
def alexnet_forward(params, x):
    x = x.transpose(0, 2, 3, 1)                       # NCHW -> NHWC once
    # conv1 -> pool1 -> relu1 -> bn1
    x = conv2d_nhwc(x, *params["conv1"], stride=4, pad=9, relu=False)
    x = maxpool2d_nhwc(x, k=3, s=2)
    x = relu_batchnorm_nhwc(x)                        # relu1 + bn1 fused
    # conv2 -> pool2 -> relu2 -> bn2
    x = conv2d_nhwc(x, *params["conv2"], stride=1, pad=1, relu=False)
    x = maxpool2d_nhwc(x, k=3, s=2)
    x = relu_batchnorm_nhwc(x)                        # relu2 + bn2 fused
    # conv3/4/5 each followed by ReLU (fused into matmul epilogue)
    x = conv2d_nhwc(x, *params["conv3"], stride=1, pad=1, relu=True)
    x = conv2d_nhwc(x, *params["conv4"], stride=1, pad=1, relu=True)
    x = conv2d_nhwc(x, *params["conv5"], stride=1, pad=1, relu=True)
    # match torch .view(-1, 256) on NCHW-contiguous memory
    x = x.transpose(0, 3, 1, 2).reshape(-1, 256)
    x = linear(x, *params["fc6"], relu=True)          # fc6 + relu6
    x = linear(x, *params["fc7"], relu=True)          # fc7 + relu7
    x = linear(x, *params["fc8"], relu=True)          # fc8 + relu8 (per spec)
    return x


if __name__ == "__main__":
    key = jax.random.PRNGKey(0)
    k_params, k_x = jax.random.split(key)
    params = init_params(k_params)
    # Smallest spatial size that survives both 3x3/stride-2 pools: 35x35.
    x = jax.random.normal(k_x, (2, 3, 35, 35), jnp.float32)

    out = jax.jit(alexnet_forward)(params, x)
    out = jax.block_until_ready(out)
    assert out.shape == (2, 10), out.shape
    print("KERNEL_OK")
</pallas_src>

<mosaic_0001>
module attributes {stable_mosaic.version = 11 : i64} {
  func.func @_matmul_bias_kernel(%arg0: i32, %arg1: i32, %arg2: i32, %arg3: memref<256x384xbf16, #tpu.memory_space<vmem>>, %arg4: memref<384x128xbf16, #tpu.memory_space<vmem>>, %arg5: memref<1x128xf32, #tpu.memory_space<vmem>>, %arg6: memref<256x128xf32, #tpu.memory_space<vmem>>) attributes {dimension_semantics = [#tpu.dimension_semantics<parallel>, #tpu.dimension_semantics<parallel>, #tpu.dimension_semantics<arbitrary>], iteration_bounds = array<i64: 1, 1, 1>, scalar_prefetch = 0 : i64, scratch_operands = 0 : i64, tpu.core_type = #tpu.core_type<tc>, window_params = [{transform_indices = @transform_0, window_bounds = array<i64: 256, 384>}, {transform_indices = @transform_1, window_bounds = array<i64: 384, 128>}, {transform_indices = @transform_2, window_bounds = array<i64: 1, 128>}, {transform_indices = @transform_3, window_bounds = array<i64: 256, 128>}]} {
    %c0_i32 = arith.constant 0 : i32
    %0 = arith.cmpi eq, %arg2, %c0_i32 : i32
    %1 = arith.extui %0 : i1 to i32
    %c0_i32_0 = arith.constant 0 : i32
    %2 = arith.cmpi ne, %1, %c0_i32_0 : i32
    scf.if %2 {
      %cst_10 = arith.constant 0.000000e+00 : f32
      %12 = vector.broadcast %cst_10 : f32 to vector<256x128xf32>
      %c0_11 = arith.constant 0 : index
      %c0_12 = arith.constant 0 : index
      %13 = vector.load %arg6[%c0_11, %c0_12] : memref<256x128xf32, #tpu.memory_space<vmem>>, vector<256x128xf32>
      tpu.vector_store %arg6[%c0_11, %c0_12], %12 {strides = array<i32>} : memref<256x128xf32, #tpu.memory_space<vmem>>, vector<256x128xf32>,
    } else {
    }
    %c0 = arith.constant 0 : index
    %c0_1 = arith.constant 0 : index
    %3 = vector.load %arg6[%c0, %c0_1] : memref<256x128xf32, #tpu.memory_space<vmem>>, vector<256x128xf32>
    %c0_2 = arith.constant 0 : index
    %c0_3 = arith.constant 0 : index
    %4 = vector.load %arg3[%c0_2, %c0_3] : memref<256x384xbf16, #tpu.memory_space<vmem>>, vector<256x384xbf16>
    %c0_4 = arith.constant 0 : index
    %c0_5 = arith.constant 0 : index
    %5 = vector.load %arg4[%c0_4, %c0_5] : memref<384x128xbf16, #tpu.memory_space<vmem>>, vector<384x128xbf16>
    %cst = arith.constant dense<0.000000e+00> : vector<256x128xf32>
    %6 = tpu.matmul %4, %5, %cst {dimension_numbers = #tpu.dot_dimension_numbers<[1], [0], [0], [1], [0, 0, 1, 1], [], []>} : vector<256x384xbf16>, vector<384x128xbf16>, vector<256x128xf32> -> vector<256x128xf32>
    %7 = arith.addf %3, %6 : vector<256x128xf32>
    %c0_6 = arith.constant 0 : index
    %c0_7 = arith.constant 0 : index
    %8 = vector.load %arg6[%c0_6, %c0_7] : memref<256x128xf32, #tpu.memory_space<vmem>>, vector<256x128xf32>
    tpu.vector_store %arg6[%c0_6, %c0_7], %7 {strides = array<i32>} : memref<256x128xf32, #tpu.memory_space<vmem>>, vector<256x128xf32>,
    %c0_i32_8 = arith.constant 0 : i32
    %9 = arith.cmpi eq, %arg2, %c0_i32_8 : i32
    %10 = arith.extui %9 : i1 to i32
    %c0_i32_9 = arith.constant 0 : i32
    %11 = arith.cmpi ne, %10, %c0_i32_9 : i32
    scf.if %11 {
      %c0_10 = arith.constant 0 : index
      %c0_11 = arith.constant 0 : index
      %12 = vector.load %arg6[%c0_10, %c0_11] : memref<256x128xf32, #tpu.memory_space<vmem>>, vector<256x128xf32>
      %c0_12 = arith.constant 0 : index
      %c0_13 = arith.constant 0 : index
      %13 = vector.load %arg5[%c0_12, %c0_13] : memref<1x128xf32, #tpu.memory_space<vmem>>, vector<1x128xf32>
      %14 = vector.broadcast %13 : vector<1x128xf32> to vector<256x128xf32>
      %15 = arith.addf %12, %14 : vector<256x128xf32>
      %c0_14 = arith.constant 0 : index
      %c0_15 = arith.constant 0 : index
      %16 = vector.load %arg6[%c0_14, %c0_15] : memref<256x128xf32, #tpu.memory_space<vmem>>, vector<256x128xf32>
      tpu.vector_store %arg6[%c0_14, %c0_15], %15 {strides = array<i32>} : memref<256x128xf32, #tpu.memory_space<vmem>>, vector<256x128xf32>,
    } else {
    }
    return
  }
  func.func @transform_0(%arg0: i32, %arg1: i32, %arg2: i32) -> (i32, i32) {
    %c0_i32 = arith.constant 0 : i32
    return %arg0, %arg2 : i32, i32
  }
  func.func @transform_1(%arg0: i32, %arg1: i32, %arg2: i32) -> (i32, i32) {
    %c0_i32 = arith.constant 0 : i32
    return %arg2, %arg1 : i32, i32
  }
  func.func @transform_2(%arg0: i32, %arg1: i32, %arg2: i32) -> (i32, i32) {
    %c0_i32 = arith.constant 0 : i32
    %c0_i32_0 = arith.constant 0 : i32
    return %c0_i32, %arg1 : i32, i32
  }
  func.func @transform_3(%arg0: i32, %arg1: i32, %arg2: i32) -> (i32, i32) {
    %c0_i32 = arith.constant 0 : i32
    return %arg0, %arg1 : i32, i32
  }
}

module attributes {stable_mosaic.version = 11 : i64} {
  func.func @_relu_bn_kernel(%arg0: i32, %arg1: i32, %arg2: memref<56x128xf32, #tpu.memory_space<vmem>>, %arg3: memref<56x128xf32, #tpu.memory_space<vmem>>, %arg4: memref<1x128xf32, #tpu.memory_space<vmem>>, %arg5: memref<1x128xf32, #tpu.memory_space<vmem>>) attributes {dimension_semantics = [#tpu.dimension_semantics<arbitrary>, #tpu.dimension_semantics<arbitrary>], iteration_bounds = array<i64: 2, 1>, scalar_prefetch = 0 : i64, scratch_operands = 2 : i64, tpu.core_type = #tpu.core_type<tc>, window_params = [{transform_indices = @transform_0, window_bounds = array<i64: 56, 128>}, {transform_indices = @transform_1, window_bounds = array<i64: 56, 128>}]} {
    %c0_i32 = arith.constant 0 : i32
    %0 = arith.cmpi eq, %arg0, %c0_i32 : i32
    %c0_i32_0 = arith.constant 0 : i32
    %1 = arith.cmpi eq, %arg1, %c0_i32_0 : i32
    %2 = arith.andi %0, %1 : i1
    %3 = arith.extui %2 : i1 to i32
    %c0_i32_1 = arith.constant 0 : i32
    %4 = arith.cmpi ne, %3, %c0_i32_1 : i32
    scf.if %4 {
      %cst_9 = arith.constant 0.000000e+00 : f32
      %19 = vector.broadcast %cst_9 : f32 to vector<1x128xf32>
      %c0_10 = arith.constant 0 : index
      %c0_11 = arith.constant 0 : index
      %20 = vector.load %arg4[%c0_10, %c0_11] : memref<1x128xf32, #tpu.memory_space<vmem>>, vector<1x128xf32>
      tpu.vector_store %arg4[%c0_10, %c0_11], %19 {strides = array<i32>} : memref<1x128xf32, #tpu.memory_space<vmem>>, vector<1x128xf32>,
      %cst_12 = arith.constant 0.000000e+00 : f32
      %21 = vector.broadcast %cst_12 : f32 to vector<1x128xf32>
      %c0_13 = arith.constant 0 : index
      %c0_14 = arith.constant 0 : index
      %22 = vector.load %arg5[%c0_13, %c0_14] : memref<1x128xf32, #tpu.memory_space<vmem>>, vector<1x128xf32>
      tpu.vector_store %arg5[%c0_13, %c0_14], %21 {strides = array<i32>} : memref<1x128xf32, #tpu.memory_space<vmem>>, vector<1x128xf32>,
    } else {
    }
    %c0 = arith.constant 0 : index
    %c0_2 = arith.constant 0 : index
    %5 = vector.load %arg2[%c0, %c0_2] : memref<56x128xf32, #tpu.memory_space<vmem>>, vector<56x128xf32>
    %cst = arith.constant 0.000000e+00 : f32
    %6 = vector.broadcast %cst : f32 to vector<56x128xf32>
    %7 = arith.maximumf %5, %6 : vector<56x128xf32>
    %c0_i32_3 = arith.constant 0 : i32
    %8 = arith.cmpi eq, %arg0, %c0_i32_3 : i32
    %9 = arith.extui %8 : i1 to i32
    %c0_i32_4 = arith.constant 0 : i32
    %10 = arith.cmpi ne, %9, %c0_i32_4 : i32
    scf.if %10 {
      %c0_9 = arith.constant 0 : index
      %c0_10 = arith.constant 0 : index
      %19 = vector.load %arg4[%c0_9, %c0_10] : memref<1x128xf32, #tpu.memory_space<vmem>>, vector<1x128xf32>
      %cst_11 = arith.constant dense<0.000000e+00> : vector<128xf32>
      %20 = vector.multi_reduction <add>, %7, %cst_11 [0] : vector<56x128xf32> to vector<128xf32>
      %21 = vector.shape_cast %20 : vector<128xf32> to vector<1x128xf32>
      %22 = arith.addf %19, %21 : vector<1x128xf32>
      %c0_12 = arith.constant 0 : index
      %c0_13 = arith.constant 0 : index
      %23 = vector.load %arg4[%c0_12, %c0_13] : memref<1x128xf32, #tpu.memory_space<vmem>>, vector<1x128xf32>
      tpu.vector_store %arg4[%c0_12, %c0_13], %22 {strides = array<i32>} : memref<1x128xf32, #tpu.memory_space<vmem>>, vector<1x128xf32>,
      %c0_14 = arith.constant 0 : index
      %c0_15 = arith.constant 0 : index
      %24 = vector.load %arg5[%c0_14, %c0_15] : memref<1x128xf32, #tpu.memory_space<vmem>>, vector<1x128xf32>
      %25 = arith.mulf %7, %7 : vector<56x128xf32>
      %cst_16 = arith.constant dense<0.000000e+00> : vector<128xf32>
      %26 = vector.multi_reduction <add>, %25, %cst_16 [0] : vector<56x128xf32> to vector<128xf32>
      %27 = vector.shape_cast %26 : vector<128xf32> to vector<1x128xf32>
      %28 = arith.addf %24, %27 : vector<1x128xf32>
      %c0_17 = arith.constant 0 : index
      %c0_18 = arith.constant 0 : index
      %29 = vector.load %arg5[%c0_17, %c0_18] : memref<1x128xf32, #tpu.memory_space<vmem>>, vector<1x128xf32>
      tpu.vector_store %arg5[%c0_17, %c0_18], %28 {strides = array<i32>} : memref<1x128xf32, #tpu.memory_space<vmem>>, vector<1x128xf32>,
    } else {
    }
    %c1_i32 = arith.constant 1 : i32
    %11 = arith.cmpi eq, %arg0, %c1_i32 : i32
    %c0_i32_5 = arith.constant 0 : i32
    %12 = arith.cmpi eq, %arg1, %c0_i32_5 : i32
    %13 = arith.andi %11, %12 : i1
    %14 = arith.extui %13 : i1 to i32
    %c0_i32_6 = arith.constant 0 : i32
    %15 = arith.cmpi ne, %14, %c0_i32_6 : i32
    scf.if %15 {
      %c0_9 = arith.constant 0 : index
      %c0_10 = arith.constant 0 : index
      %19 = vector.load %arg4[%c0_9, %c0_10] : memref<1x128xf32, #tpu.memory_space<vmem>>, vector<1x128xf32>
      %cst_11 = arith.constant 2.000000e-02 : f32
      %20 = vector.broadcast %cst_11 : f32 to vector<1x128xf32>
      %21 = arith.mulf %19, %20 : vector<1x128xf32>
      %c0_12 = arith.constant 0 : index
      %c0_13 = arith.constant 0 : index
      %22 = vector.load %arg5[%c0_12, %c0_13] : memref<1x128xf32, #tpu.memory_space<vmem>>, vector<1x128xf32>
      %cst_14 = arith.constant 2.000000e-02 : f32
      %23 = vector.broadcast %cst_14 : f32 to vector<1x128xf32>
      %24 = arith.mulf %22, %23 : vector<1x128xf32>
      %25 = arith.mulf %21, %21 : vector<1x128xf32>
      %26 = arith.subf %24, %25 : vector<1x128xf32>
      %c0_15 = arith.constant 0 : index
      %c0_16 = arith.constant 0 : index
      %27 = vector.load %arg4[%c0_15, %c0_16] : memref<1x128xf32, #tpu.memory_space<vmem>>, vector<1x128xf32>
      tpu.vector_store %arg4[%c0_15, %c0_16], %21 {strides = array<i32>} : memref<1x128xf32, #tpu.memory_space<vmem>>, vector<1x128xf32>,
      %cst_17 = arith.constant 9.99999974E-6 : f32
      %28 = vector.broadcast %cst_17 : f32 to vector<1x128xf32>
      %29 = arith.addf %26, %28 : vector<1x128xf32>
      %30 = math.rsqrt %29 : vector<1x128xf32>
      %c0_18 = arith.constant 0 : index
      %c0_19 = arith.constant 0 : index
      %31 = vector.load %arg5[%c0_18, %c0_19] : memref<1x128xf32, #tpu.memory_space<vmem>>, vector<1x128xf32>
      tpu.vector_store %arg5[%c0_18, %c0_19], %30 {strides = array<i32>} : memref<1x128xf32, #tpu.memory_space<vmem>>, vector<1x128xf32>,
    } else {
    }
    %c1_i32_7 = arith.constant 1 : i32
    %16 = arith.cmpi eq, %arg0, %c1_i32_7 : i32
    %17 = arith.extui %16 : i1 to i32
    %c0_i32_8 = arith.constant 0 : i32
    %18 = arith.cmpi ne, %17, %c0_i32_8 : i32
    scf.if %18 {
      %c0_9 = arith.constant 0 : index
      %c0_10 = arith.constant 0 : index
      %19 = vector.load %arg4[%c0_9, %c0_10] : memref<1x128xf32, #tpu.memory_space<vmem>>, vector<1x128xf32>
      %20 = vector.broadcast %19 : vector<1x128xf32> to vector<56x128xf32>
      %21 = arith.subf %7, %20 : vector<56x128xf32>
      %c0_11 = arith.constant 0 : index
      %c0_12 = arith.constant 0 : index
      %22 = vector.load %arg5[%c0_11, %c0_12] : memref<1x128xf32, #tpu.memory_space<vmem>>, vector<1x128xf32>
      %23 = vector.broadcast %22 : vector<1x128xf32> to vector<56x128xf32>
      %24 = arith.mulf %21, %23 : vector<56x128xf32>
      %c0_13 = arith.constant 0 : index
      %c0_14 = arith.constant 0 : index
      %25 = vector.load %arg3[%c0_13, %c0_14] : memref<56x128xf32, #tpu.memory_space<vmem>>, vector<56x128xf32>
      tpu.vector_store %arg3[%c0_13, %c0_14], %24 {strides = array<i32>} : memref<56x128xf32, #tpu.memory_space<vmem>>, vector<56x128xf32>,
    } else {
    }
    return
  }
  func.func @transform_0(%arg0: i32, %arg1: i32) -> (i32, i32) {
    %c0_i32 = arith.constant 0 : i32
    %c0_i32_0 = arith.constant 0 : i32
    return %arg1, %c0_i32 : i32, i32
  }
  func.func @transform_1(%arg0: i32, %arg1: i32) -> (i32, i32) {
    %0 = arith.muli %arg1, %arg0 : i32
    %c0_i32 = arith.constant 0 : i32
    %c0_i32_0 = arith.constant 0 : i32
    return %0, %c0_i32 : i32, i32
  }
}

module attributes {stable_mosaic.version = 11 : i64} {
  func.func @_matmul_bias_kernel(%arg0: i32, %arg1: i32, %arg2: i32, %arg3: memref<32x512xbf16, #tpu.memory_space<vmem>>, %arg4: memref<512x256xbf16, #tpu.memory_space<vmem>>, %arg5: memref<1x256xf32, #tpu.memory_space<vmem>>, %arg6: memref<32x256xf32, #tpu.memory_space<vmem>>) attributes {dimension_semantics = [#tpu.dimension_semantics<parallel>, #tpu.dimension_semantics<parallel>, #tpu.dimension_semantics<arbitrary>], iteration_bounds = array<i64: 1, 1, 5>, scalar_prefetch = 0 : i64, scratch_operands = 0 : i64, tpu.core_type = #tpu.core_type<tc>, window_params = [{transform_indices = @transform_0, window_bounds = array<i64: 32, 512>}, {transform_indices = @transform_1, window_bounds = array<i64: 512, 256>}, {transform_indices = @transform_2, window_bounds = array<i64: 1, 256>}, {transform_indices = @transform_3, window_bounds = array<i64: 32, 256>}]} {
    %c0_i32 = arith.constant 0 : i32
    %0 = arith.cmpi eq, %arg2, %c0_i32 : i32
    %1 = arith.extui %0 : i1 to i32
    %c0_i32_0 = arith.constant 0 : i32
    %2 = arith.cmpi ne, %1, %c0_i32_0 : i32
    scf.if %2 {
      %cst_9 = arith.constant 0.000000e+00 : f32
      %12 = vector.broadcast %cst_9 : f32 to vector<32x256xf32>
      %c0_10 = arith.constant 0 : index
      %c0_11 = arith.constant 0 : index
      %13 = vector.load %arg6[%c0_10, %c0_11] : memref<32x256xf32, #tpu.memory_space<vmem>>, vector<32x256xf32>
      tpu.vector_store %arg6[%c0_10, %c0_11], %12 {strides = array<i32>} : memref<32x256xf32, #tpu.memory_space<vmem>>, vector<32x256xf32>,
    } else {
    }
    %c0 = arith.constant 0 : index
    %c0_1 = arith.constant 0 : index
    %3 = vector.load %arg6[%c0, %c0_1] : memref<32x256xf32, #tpu.memory_space<vmem>>, vector<32x256xf32>
    %c0_2 = arith.constant 0 : index
    %c0_3 = arith.constant 0 : index
    %4 = vector.load %arg3[%c0_2, %c0_3] : memref<32x512xbf16, #tpu.memory_space<vmem>>, vector<32x512xbf16>
    %c0_4 = arith.constant 0 : index
    %c0_5 = arith.constant 0 : index
    %5 = vector.load %arg4[%c0_4, %c0_5] : memref<512x256xbf16, #tpu.memory_space<vmem>>, vector<512x256xbf16>
    %cst = arith.constant dense<0.000000e+00> : vector<32x256xf32>
    %6 = tpu.matmul %4, %5, %cst {dimension_numbers = #tpu.dot_dimension_numbers<[1], [0], [0], [1], [0, 0, 1, 1], [], []>} : vector<32x512xbf16>, vector<512x256xbf16>, vector<32x256xf32> -> vector<32x256xf32>
    %7 = arith.addf %3, %6 : vector<32x256xf32>
    %c0_6 = arith.constant 0 : index
    %c0_7 = arith.constant 0 : index
    %8 = vector.load %arg6[%c0_6, %c0_7] : memref<32x256xf32, #tpu.memory_space<vmem>>, vector<32x256xf32>
    tpu.vector_store %arg6[%c0_6, %c0_7], %7 {strides = array<i32>} : memref<32x256xf32, #tpu.memory_space<vmem>>, vector<32x256xf32>,
    %c4_i32 = arith.constant 4 : i32
    %9 = arith.cmpi eq, %arg2, %c4_i32 : i32
    %10 = arith.extui %9 : i1 to i32
    %c0_i32_8 = arith.constant 0 : i32
    %11 = arith.cmpi ne, %10, %c0_i32_8 : i32
    scf.if %11 {
      %c0_9 = arith.constant 0 : index
      %c0_10 = arith.constant 0 : index
      %12 = vector.load %arg6[%c0_9, %c0_10] : memref<32x256xf32, #tpu.memory_space<vmem>>, vector<32x256xf32>
      %c0_11 = arith.constant 0 : index
      %c0_12 = arith.constant 0 : index
      %13 = vector.load %arg5[%c0_11, %c0_12] : memref<1x256xf32, #tpu.memory_space<vmem>>, vector<1x256xf32>
      %14 = vector.broadcast %13 : vector<1x256xf32> to vector<32x256xf32>
      %15 = arith.addf %12, %14 : vector<32x256xf32>
      %c0_13 = arith.constant 0 : index
      %c0_14 = arith.constant 0 : index
      %16 = vector.load %arg6[%c0_13, %c0_14] : memref<32x256xf32, #tpu.memory_space<vmem>>, vector<32x256xf32>
      tpu.vector_store %arg6[%c0_13, %c0_14], %15 {strides = array<i32>} : memref<32x256xf32, #tpu.memory_space<vmem>>, vector<32x256xf32>,
    } else {
    }
    return
  }
  func.func @transform_0(%arg0: i32, %arg1: i32, %arg2: i32) -> (i32, i32) {
    %c0_i32 = arith.constant 0 : i32
    return %arg0, %arg2 : i32, i32
  }
  func.func @transform_1(%arg0: i32, %arg1: i32, %arg2: i32) -> (i32, i32) {
    %c0_i32 = arith.constant 0 : i32
    return %arg2, %arg1 : i32, i32
  }
  func.func @transform_2(%arg0: i32, %arg1: i32, %arg2: i32) -> (i32, i32) {
    %c0_i32 = arith.constant 0 : i32
    %c0_i32_0 = arith.constant 0 : i32
    return %c0_i32, %arg1 : i32, i32
  }
  func.func @transform_3(%arg0: i32, %arg1: i32, %arg2: i32) -> (i32, i32) {
    %c0_i32 = arith.constant 0 : i32
    return %arg0, %arg1 : i32, i32
  }
}

module attributes {stable_mosaic.version = 11 : i64} {
  func.func @_relu_bn_kernel(%arg0: i32, %arg1: i32, %arg2: memref<8x256xf32, #tpu.memory_space<vmem>>, %arg3: memref<8x256xf32, #tpu.memory_space<vmem>>, %arg4: memref<1x256xf32, #tpu.memory_space<vmem>>, %arg5: memref<1x256xf32, #tpu.memory_space<vmem>>) attributes {dimension_semantics = [#tpu.dimension_semantics<arbitrary>, #tpu.dimension_semantics<arbitrary>], iteration_bounds = array<i64: 2, 1>, scalar_prefetch = 0 : i64, scratch_operands = 2 : i64, tpu.core_type = #tpu.core_type<tc>, window_params = [{transform_indices = @transform_0, window_bounds = array<i64: 8, 256>}, {transform_indices = @transform_1, window_bounds = array<i64: 8, 256>}]} {
    %c0_i32 = arith.constant 0 : i32
    %0 = arith.cmpi eq, %arg0, %c0_i32 : i32
    %c0_i32_0 = arith.constant 0 : i32
    %1 = arith.cmpi eq, %arg1, %c0_i32_0 : i32
    %2 = arith.andi %0, %1 : i1
    %3 = arith.extui %2 : i1 to i32
    %c0_i32_1 = arith.constant 0 : i32
    %4 = arith.cmpi ne, %3, %c0_i32_1 : i32
    scf.if %4 {
      %cst_9 = arith.constant 0.000000e+00 : f32
      %19 = vector.broadcast %cst_9 : f32 to vector<1x256xf32>
      %c0_10 = arith.constant 0 : index
      %c0_11 = arith.constant 0 : index
      %20 = vector.load %arg4[%c0_10, %c0_11] : memref<1x256xf32, #tpu.memory_space<vmem>>, vector<1x256xf32>
      tpu.vector_store %arg4[%c0_10, %c0_11], %19 {strides = array<i32>} : memref<1x256xf32, #tpu.memory_space<vmem>>, vector<1x256xf32>,
      %cst_12 = arith.constant 0.000000e+00 : f32
      %21 = vector.broadcast %cst_12 : f32 to vector<1x256xf32>
      %c0_13 = arith.constant 0 : index
      %c0_14 = arith.constant 0 : index
      %22 = vector.load %arg5[%c0_13, %c0_14] : memref<1x256xf32, #tpu.memory_space<vmem>>, vector<1x256xf32>
      tpu.vector_store %arg5[%c0_13, %c0_14], %21 {strides = array<i32>} : memref<1x256xf32, #tpu.memory_space<vmem>>, vector<1x256xf32>,
    } else {
    }
    %c0 = arith.constant 0 : index
    %c0_2 = arith.constant 0 : index
    %5 = vector.load %arg2[%c0, %c0_2] : memref<8x256xf32, #tpu.memory_space<vmem>>, vector<8x256xf32>
    %cst = arith.constant 0.000000e+00 : f32
    %6 = vector.broadcast %cst : f32 to vector<8x256xf32>
    %7 = arith.maximumf %5, %6 : vector<8x256xf32>
    %c0_i32_3 = arith.constant 0 : i32
    %8 = arith.cmpi eq, %arg0, %c0_i32_3 : i32
    %9 = arith.extui %8 : i1 to i32
    %c0_i32_4 = arith.constant 0 : i32
    %10 = arith.cmpi ne, %9, %c0_i32_4 : i32
    scf.if %10 {
      %c0_9 = arith.constant 0 : index
      %c0_10 = arith.constant 0 : index
      %19 = vector.load %arg4[%c0_9, %c0_10] : memref<1x256xf32, #tpu.memory_space<vmem>>, vector<1x256xf32>
      %cst_11 = arith.constant dense<0.000000e+00> : vector<256xf32>
      %20 = vector.multi_reduction <add>, %7, %cst_11 [0] : vector<8x256xf32> to vector<256xf32>
      %21 = vector.shape_cast %20 : vector<256xf32> to vector<1x256xf32>
      %22 = arith.addf %19, %21 : vector<1x256xf32>
      %c0_12 = arith.constant 0 : index
      %c0_13 = arith.constant 0 : index
      %23 = vector.load %arg4[%c0_12, %c0_13] : memref<1x256xf32, #tpu.memory_space<vmem>>, vector<1x256xf32>
      tpu.vector_store %arg4[%c0_12, %c0_13], %22 {strides = array<i32>} : memref<1x256xf32, #tpu.memory_space<vmem>>, vector<1x256xf32>,
      %c0_14 = arith.constant 0 : index
      %c0_15 = arith.constant 0 : index
      %24 = vector.load %arg5[%c0_14, %c0_15] : memref<1x256xf32, #tpu.memory_space<vmem>>, vector<1x256xf32>
      %25 = arith.mulf %7, %7 : vector<8x256xf32>
      %cst_16 = arith.constant dense<0.000000e+00> : vector<256xf32>
      %26 = vector.multi_reduction <add>, %25, %cst_16 [0] : vector<8x256xf32> to vector<256xf32>
      %27 = vector.shape_cast %26 : vector<256xf32> to vector<1x256xf32>
      %28 = arith.addf %24, %27 : vector<1x256xf32>
      %c0_17 = arith.constant 0 : index
      %c0_18 = arith.constant 0 : index
      %29 = vector.load %arg5[%c0_17, %c0_18] : memref<1x256xf32, #tpu.memory_space<vmem>>, vector<1x256xf32>
      tpu.vector_store %arg5[%c0_17, %c0_18], %28 {strides = array<i32>} : memref<1x256xf32, #tpu.memory_space<vmem>>, vector<1x256xf32>,
    } else {
    }
    %c1_i32 = arith.constant 1 : i32
    %11 = arith.cmpi eq, %arg0, %c1_i32 : i32
    %c0_i32_5 = arith.constant 0 : i32
    %12 = arith.cmpi eq, %arg1, %c0_i32_5 : i32
    %13 = arith.andi %11, %12 : i1
    %14 = arith.extui %13 : i1 to i32
    %c0_i32_6 = arith.constant 0 : i32
    %15 = arith.cmpi ne, %14, %c0_i32_6 : i32
    scf.if %15 {
      %c0_9 = arith.constant 0 : index
      %c0_10 = arith.constant 0 : index
      %19 = vector.load %arg4[%c0_9, %c0_10] : memref<1x256xf32, #tpu.memory_space<vmem>>, vector<1x256xf32>
      %cst_11 = arith.constant 5.000000e-01 : f32
      %20 = vector.broadcast %cst_11 : f32 to vector<1x256xf32>
      %21 = arith.mulf %19, %20 : vector<1x256xf32>
      %c0_12 = arith.constant 0 : index
      %c0_13 = arith.constant 0 : index
      %22 = vector.load %arg5[%c0_12, %c0_13] : memref<1x256xf32, #tpu.memory_space<vmem>>, vector<1x256xf32>
      %cst_14 = arith.constant 5.000000e-01 : f32
      %23 = vector.broadcast %cst_14 : f32 to vector<1x256xf32>
      %24 = arith.mulf %22, %23 : vector<1x256xf32>
      %25 = arith.mulf %21, %21 : vector<1x256xf32>
      %26 = arith.subf %24, %25 : vector<1x256xf32>
      %c0_15 = arith.constant 0 : index
      %c0_16 = arith.constant 0 : index
      %27 = vector.load %arg4[%c0_15, %c0_16] : memref<1x256xf32, #tpu.memory_space<vmem>>, vector<1x256xf32>
      tpu.vector_store %arg4[%c0_15, %c0_16], %21 {strides = array<i32>} : memref<1x256xf32, #tpu.memory_space<vmem>>, vector<1x256xf32>,
      %cst_17 = arith.constant 9.99999974E-6 : f32
      %28 = vector.broadcast %cst_17 : f32 to vector<1x256xf32>
      %29 = arith.addf %26, %28 : vector<1x256xf32>
      %30 = math.rsqrt %29 : vector<1x256xf32>
      %c0_18 = arith.constant 0 : index
      %c0_19 = arith.constant 0 : index
      %31 = vector.load %arg5[%c0_18, %c0_19] : memref<1x256xf32, #tpu.memory_space<vmem>>, vector<1x256xf32>
      tpu.vector_store %arg5[%c0_18, %c0_19], %30 {strides = array<i32>} : memref<1x256xf32, #tpu.memory_space<vmem>>, vector<1x256xf32>,
    } else {
    }
    %c1_i32_7 = arith.constant 1 : i32
    %16 = arith.cmpi eq, %arg0, %c1_i32_7 : i32
    %17 = arith.extui %16 : i1 to i32
    %c0_i32_8 = arith.constant 0 : i32
    %18 = arith.cmpi ne, %17, %c0_i32_8 : i32
    scf.if %18 {
      %c0_9 = arith.constant 0 : index
      %c0_10 = arith.constant 0 : index
      %19 = vector.load %arg4[%c0_9, %c0_10] : memref<1x256xf32, #tpu.memory_space<vmem>>, vector<1x256xf32>
      %20 = vector.broadcast %19 : vector<1x256xf32> to vector<8x256xf32>
      %21 = arith.subf %7, %20 : vector<8x256xf32>
      %c0_11 = arith.constant 0 : index
      %c0_12 = arith.constant 0 : index
      %22 = vector.load %arg5[%c0_11, %c0_12] : memref<1x256xf32, #tpu.memory_space<vmem>>, vector<1x256xf32>
      %23 = vector.broadcast %22 : vector<1x256xf32> to vector<8x256xf32>
      %24 = arith.mulf %21, %23 : vector<8x256xf32>
      %c0_13 = arith.constant 0 : index
      %c0_14 = arith.constant 0 : index
      %25 = vector.load %arg3[%c0_13, %c0_14] : memref<8x256xf32, #tpu.memory_space<vmem>>, vector<8x256xf32>
      tpu.vector_store %arg3[%c0_13, %c0_14], %24 {strides = array<i32>} : memref<8x256xf32, #tpu.memory_space<vmem>>, vector<8x256xf32>,
    } else {
    }
    return
  }
  func.func @transform_0(%arg0: i32, %arg1: i32) -> (i32, i32) {
    %c0_i32 = arith.constant 0 : i32
    %c0_i32_0 = arith.constant 0 : i32
    return %arg1, %c0_i32 : i32, i32
  }
  func.func @transform_1(%arg0: i32, %arg1: i32) -> (i32, i32) {
    %0 = arith.muli %arg1, %arg0 : i32
    %c0_i32 = arith.constant 0 : i32
    %c0_i32_0 = arith.constant 0 : i32
    return %0, %c0_i32 : i32, i32
  }
}

module attributes {stable_mosaic.version = 11 : i64} {
  func.func @_matmul_bias_kernel(%arg0: i32, %arg1: i32, %arg2: i32, %arg3: memref<16x512xbf16, #tpu.memory_space<vmem>>, %arg4: memref<512x256xbf16, #tpu.memory_space<vmem>>, %arg5: memref<1x256xf32, #tpu.memory_space<vmem>>, %arg6: memref<16x256xf32, #tpu.memory_space<vmem>>) attributes {dimension_semantics = [#tpu.dimension_semantics<parallel>, #tpu.dimension_semantics<parallel>, #tpu.dimension_semantics<arbitrary>], iteration_bounds = array<i64: 1, 2, 5>, scalar_prefetch = 0 : i64, scratch_operands = 0 : i64, tpu.core_type = #tpu.core_type<tc>, window_params = [{transform_indices = @transform_0, window_bounds = array<i64: 16, 512>}, {transform_indices = @transform_1, window_bounds = array<i64: 512, 256>}, {transform_indices = @transform_2, window_bounds = array<i64: 1, 256>}, {transform_indices = @transform_3, window_bounds = array<i64: 16, 256>}]} {
    %c0_i32 = arith.constant 0 : i32
    %0 = arith.cmpi eq, %arg2, %c0_i32 : i32
    %1 = arith.extui %0 : i1 to i32
    %c0_i32_0 = arith.constant 0 : i32
    %2 = arith.cmpi ne, %1, %c0_i32_0 : i32
    scf.if %2 {
      %cst_9 = arith.constant 0.000000e+00 : f32
      %12 = vector.broadcast %cst_9 : f32 to vector<16x256xf32>
      %c0_10 = arith.constant 0 : index
      %c0_11 = arith.constant 0 : index
      %13 = vector.load %arg6[%c0_10, %c0_11] : memref<16x256xf32, #tpu.memory_space<vmem>>, vector<16x256xf32>
      tpu.vector_store %arg6[%c0_10, %c0_11], %12 {strides = array<i32>} : memref<16x256xf32, #tpu.memory_space<vmem>>, vector<16x256xf32>,
    } else {
    }
    %c0 = arith.constant 0 : index
    %c0_1 = arith.constant 0 : index
    %3 = vector.load %arg6[%c0, %c0_1] : memref<16x256xf32, #tpu.memory_space<vmem>>, vector<16x256xf32>
    %c0_2 = arith.constant 0 : index
    %c0_3 = arith.constant 0 : index
    %4 = vector.load %arg3[%c0_2, %c0_3] : memref<16x512xbf16, #tpu.memory_space<vmem>>, vector<16x512xbf16>
    %c0_4 = arith.constant 0 : index
    %c0_5 = arith.constant 0 : index
    %5 = vector.load %arg4[%c0_4, %c0_5] : memref<512x256xbf16, #tpu.memory_space<vmem>>, vector<512x256xbf16>
    %cst = arith.constant dense<0.000000e+00> : vector<16x256xf32>
    %6 = tpu.matmul %4, %5, %cst {dimension_numbers = #tpu.dot_dimension_numbers<[1], [0], [0], [1], [0, 0, 1, 1], [], []>} : vector<16x512xbf16>, vector<512x256xbf16>, vector<16x256xf32> -> vector<16x256xf32>
    %7 = arith.addf %3, %6 : vector<16x256xf32>
    %c0_6 = arith.constant 0 : index
    %c0_7 = arith.constant 0 : index
    %8 = vector.load %arg6[%c0_6, %c0_7] : memref<16x256xf32, #tpu.memory_space<vmem>>, vector<16x256xf32>
    tpu.vector_store %arg6[%c0_6, %c0_7], %7 {strides = array<i32>} : memref<16x256xf32, #tpu.memory_space<vmem>>, vector<16x256xf32>,
    %c4_i32 = arith.constant 4 : i32
    %9 = arith.cmpi eq, %arg2, %c4_i32 : i32
    %10 = arith.extui %9 : i1 to i32
    %c0_i32_8 = arith.constant 0 : i32
    %11 = arith.cmpi ne, %10, %c0_i32_8 : i32
    scf.if %11 {
      %c0_9 = arith.constant 0 : index
      %c0_10 = arith.constant 0 : index
      %12 = vector.load %arg6[%c0_9, %c0_10] : memref<16x256xf32, #tpu.memory_space<vmem>>, vector<16x256xf32>
      %c0_11 = arith.constant 0 : index
      %c0_12 = arith.constant 0 : index
      %13 = vector.load %arg5[%c0_11, %c0_12] : memref<1x256xf32, #tpu.memory_space<vmem>>, vector<1x256xf32>
      %14 = vector.broadcast %13 : vector<1x256xf32> to vector<16x256xf32>
      %15 = arith.addf %12, %14 : vector<16x256xf32>
      %cst_13 = arith.constant 0.000000e+00 : f32
      %16 = vector.broadcast %cst_13 : f32 to vector<16x256xf32>
      %17 = arith.maximumf %15, %16 : vector<16x256xf32>
      %c0_14 = arith.constant 0 : index
      %c0_15 = arith.constant 0 : index
      %18 = vector.load %arg6[%c0_14, %c0_15] : memref<16x256xf32, #tpu.memory_space<vmem>>, vector<16x256xf32>
      tpu.vector_store %arg6[%c0_14, %c0_15], %17 {strides = array<i32>} : memref<16x256xf32, #tpu.memory_space<vmem>>, vector<16x256xf32>,
    } else {
    }
    return
  }
  func.func @transform_0(%arg0: i32, %arg1: i32, %arg2: i32) -> (i32, i32) {
    %c0_i32 = arith.constant 0 : i32
    return %arg0, %arg2 : i32, i32
  }
  func.func @transform_1(%arg0: i32, %arg1: i32, %arg2: i32) -> (i32, i32) {
    %c0_i32 = arith.constant 0 : i32
    return %arg2, %arg1 : i32, i32
  }
  func.func @transform_2(%arg0: i32, %arg1: i32, %arg2: i32) -> (i32, i32) {
    %c0_i32 = arith.constant 0 : i32
    %c0_i32_0 = arith.constant 0 : i32
    return %c0_i32, %arg1 : i32, i32
  }
  func.func @transform_3(%arg0: i32, %arg1: i32, %arg2: i32) -> (i32, i32) {
    %c0_i32 = arith.constant 0 : i32
    return %arg0, %arg1 : i32, i32
  }
}

module attributes {stable_mosaic.version = 11 : i64} {
  func.func @_matmul_bias_kernel(%arg0: i32, %arg1: i32, %arg2: i32, %arg3: memref<16x512xbf16, #tpu.memory_space<vmem>>, %arg4: memref<512x256xbf16, #tpu.memory_space<vmem>>, %arg5: memref<1x256xf32, #tpu.memory_space<vmem>>, %arg6: memref<16x256xf32, #tpu.memory_space<vmem>>) attributes {dimension_semantics = [#tpu.dimension_semantics<parallel>, #tpu.dimension_semantics<parallel>, #tpu.dimension_semantics<arbitrary>], iteration_bounds = array<i64: 1, 2, 7>, scalar_prefetch = 0 : i64, scratch_operands = 0 : i64, tpu.core_type = #tpu.core_type<tc>, window_params = [{transform_indices = @transform_0, window_bounds = array<i64: 16, 512>}, {transform_indices = @transform_1, window_bounds = array<i64: 512, 256>}, {transform_indices = @transform_2, window_bounds = array<i64: 1, 256>}, {transform_indices = @transform_3, window_bounds = array<i64: 16, 256>}]} {
    %c0_i32 = arith.constant 0 : i32
    %0 = arith.cmpi eq, %arg2, %c0_i32 : i32
    %1 = arith.extui %0 : i1 to i32
    %c0_i32_0 = arith.constant 0 : i32
    %2 = arith.cmpi ne, %1, %c0_i32_0 : i32
    scf.if %2 {
      %cst_9 = arith.constant 0.000000e+00 : f32
      %12 = vector.broadcast %cst_9 : f32 to vector<16x256xf32>
      %c0_10 = arith.constant 0 : index
      %c0_11 = arith.constant 0 : index
      %13 = vector.load %arg6[%c0_10, %c0_11] : memref<16x256xf32, #tpu.memory_space<vmem>>, vector<16x256xf32>
      tpu.vector_store %arg6[%c0_10, %c0_11], %12 {strides = array<i32>} : memref<16x256xf32, #tpu.memory_space<vmem>>, vector<16x256xf32>,
    } else {
    }
    %c0 = arith.constant 0 : index
    %c0_1 = arith.constant 0 : index
    %3 = vector.load %arg6[%c0, %c0_1] : memref<16x256xf32, #tpu.memory_space<vmem>>, vector<16x256xf32>
    %c0_2 = arith.constant 0 : index
    %c0_3 = arith.constant 0 : index
    %4 = vector.load %arg3[%c0_2, %c0_3] : memref<16x512xbf16, #tpu.memory_space<vmem>>, vector<16x512xbf16>
    %c0_4 = arith.constant 0 : index
    %c0_5 = arith.constant 0 : index
    %5 = vector.load %arg4[%c0_4, %c0_5] : memref<512x256xbf16, #tpu.memory_space<vmem>>, vector<512x256xbf16>
    %cst = arith.constant dense<0.000000e+00> : vector<16x256xf32>
    %6 = tpu.matmul %4, %5, %cst {dimension_numbers = #tpu.dot_dimension_numbers<[1], [0], [0], [1], [0, 0, 1, 1], [], []>} : vector<16x512xbf16>, vector<512x256xbf16>, vector<16x256xf32> -> vector<16x256xf32>
    %7 = arith.addf %3, %6 : vector<16x256xf32>
    %c0_6 = arith.constant 0 : index
    %c0_7 = arith.constant 0 : index
    %8 = vector.load %arg6[%c0_6, %c0_7] : memref<16x256xf32, #tpu.memory_space<vmem>>, vector<16x256xf32>
    tpu.vector_store %arg6[%c0_6, %c0_7], %7 {strides = array<i32>} : memref<16x256xf32, #tpu.memory_space<vmem>>, vector<16x256xf32>,
    %c6_i32 = arith.constant 6 : i32
    %9 = arith.cmpi eq, %arg2, %c6_i32 : i32
    %10 = arith.extui %9 : i1 to i32
    %c0_i32_8 = arith.constant 0 : i32
    %11 = arith.cmpi ne, %10, %c0_i32_8 : i32
    scf.if %11 {
      %c0_9 = arith.constant 0 : index
      %c0_10 = arith.constant 0 : index
      %12 = vector.load %arg6[%c0_9, %c0_10] : memref<16x256xf32, #tpu.memory_space<vmem>>, vector<16x256xf32>
      %c0_11 = arith.constant 0 : index
      %c0_12 = arith.constant 0 : index
      %13 = vector.load %arg5[%c0_11, %c0_12] : memref<1x256xf32, #tpu.memory_space<vmem>>, vector<1x256xf32>
      %14 = vector.broadcast %13 : vector<1x256xf32> to vector<16x256xf32>
      %15 = arith.addf %12, %14 : vector<16x256xf32>
      %cst_13 = arith.constant 0.000000e+00 : f32
      %16 = vector.broadcast %cst_13 : f32 to vector<16x256xf32>
      %17 = arith.maximumf %15, %16 : vector<16x256xf32>
      %c0_14 = arith.constant 0 : index
      %c0_15 = arith.constant 0 : index
      %18 = vector.load %arg6[%c0_14, %c0_15] : memref<16x256xf32, #tpu.memory_space<vmem>>, vector<16x256xf32>
      tpu.vector_store %arg6[%c0_14, %c0_15], %17 {strides = array<i32>} : memref<16x256xf32, #tpu.memory_space<vmem>>, vector<16x256xf32>,
    } else {
    }
    return
  }
  func.func @transform_0(%arg0: i32, %arg1: i32, %arg2: i32) -> (i32, i32) {
    %c0_i32 = arith.constant 0 : i32
    return %arg0, %arg2 : i32, i32
  }
  func.func @transform_1(%arg0: i32, %arg1: i32, %arg2: i32) -> (i32, i32) {
    %c0_i32 = arith.constant 0 : i32
    return %arg2, %arg1 : i32, i32
  }
  func.func @transform_2(%arg0: i32, %arg1: i32, %arg2: i32) -> (i32, i32) {
    %c0_i32 = arith.constant 0 : i32
    %c0_i32_0 = arith.constant 0 : i32
    return %c0_i32, %arg1 : i32, i32
  }
  func.func @transform_3(%arg0: i32, %arg1: i32, %arg2: i32) -> (i32, i32) {
    %c0_i32 = arith.constant 0 : i32
    return %arg0, %arg1 : i32, i32
  }
}

module attributes {stable_mosaic.version = 11 : i64} {
  func.func @_matmul_bias_kernel(%arg0: i32, %arg1: i32, %arg2: i32, %arg3: memref<16x512xbf16, #tpu.memory_space<vmem>>, %arg4: memref<512x256xbf16, #tpu.memory_space<vmem>>, %arg5: memref<1x256xf32, #tpu.memory_space<vmem>>, %arg6: memref<16x256xf32, #tpu.memory_space<vmem>>) attributes {dimension_semantics = [#tpu.dimension_semantics<parallel>, #tpu.dimension_semantics<parallel>, #tpu.dimension_semantics<arbitrary>], iteration_bounds = array<i64: 1, 1, 7>, scalar_prefetch = 0 : i64, scratch_operands = 0 : i64, tpu.core_type = #tpu.core_type<tc>, window_params = [{transform_indices = @transform_0, window_bounds = array<i64: 16, 512>}, {transform_indices = @transform_1, window_bounds = array<i64: 512, 256>}, {transform_indices = @transform_2, window_bounds = array<i64: 1, 256>}, {transform_indices = @transform_3, window_bounds = array<i64: 16, 256>}]} {
    %c0_i32 = arith.constant 0 : i32
    %0 = arith.cmpi eq, %arg2, %c0_i32 : i32
    %1 = arith.extui %0 : i1 to i32
    %c0_i32_0 = arith.constant 0 : i32
    %2 = arith.cmpi ne, %1, %c0_i32_0 : i32
    scf.if %2 {
      %cst_9 = arith.constant 0.000000e+00 : f32
      %12 = vector.broadcast %cst_9 : f32 to vector<16x256xf32>
      %c0_10 = arith.constant 0 : index
      %c0_11 = arith.constant 0 : index
      %13 = vector.load %arg6[%c0_10, %c0_11] : memref<16x256xf32, #tpu.memory_space<vmem>>, vector<16x256xf32>
      tpu.vector_store %arg6[%c0_10, %c0_11], %12 {strides = array<i32>} : memref<16x256xf32, #tpu.memory_space<vmem>>, vector<16x256xf32>,
    } else {
    }
    %c0 = arith.constant 0 : index
    %c0_1 = arith.constant 0 : index
    %3 = vector.load %arg6[%c0, %c0_1] : memref<16x256xf32, #tpu.memory_space<vmem>>, vector<16x256xf32>
    %c0_2 = arith.constant 0 : index
    %c0_3 = arith.constant 0 : index
    %4 = vector.load %arg3[%c0_2, %c0_3] : memref<16x512xbf16, #tpu.memory_space<vmem>>, vector<16x512xbf16>
    %c0_4 = arith.constant 0 : index
    %c0_5 = arith.constant 0 : index
    %5 = vector.load %arg4[%c0_4, %c0_5] : memref<512x256xbf16, #tpu.memory_space<vmem>>, vector<512x256xbf16>
    %cst = arith.constant dense<0.000000e+00> : vector<16x256xf32>
    %6 = tpu.matmul %4, %5, %cst {dimension_numbers = #tpu.dot_dimension_numbers<[1], [0], [0], [1], [0, 0, 1, 1], [], []>} : vector<16x512xbf16>, vector<512x256xbf16>, vector<16x256xf32> -> vector<16x256xf32>
    %7 = arith.addf %3, %6 : vector<16x256xf32>
    %c0_6 = arith.constant 0 : index
    %c0_7 = arith.constant 0 : index
    %8 = vector.load %arg6[%c0_6, %c0_7] : memref<16x256xf32, #tpu.memory_space<vmem>>, vector<16x256xf32>
    tpu.vector_store %arg6[%c0_6, %c0_7], %7 {strides = array<i32>} : memref<16x256xf32, #tpu.memory_space<vmem>>, vector<16x256xf32>,
    %c6_i32 = arith.constant 6 : i32
    %9 = arith.cmpi eq, %arg2, %c6_i32 : i32
    %10 = arith.extui %9 : i1 to i32
    %c0_i32_8 = arith.constant 0 : i32
    %11 = arith.cmpi ne, %10, %c0_i32_8 : i32
    scf.if %11 {
      %c0_9 = arith.constant 0 : index
      %c0_10 = arith.constant 0 : index
      %12 = vector.load %arg6[%c0_9, %c0_10] : memref<16x256xf32, #tpu.memory_space<vmem>>, vector<16x256xf32>
      %c0_11 = arith.constant 0 : index
      %c0_12 = arith.constant 0 : index
      %13 = vector.load %arg5[%c0_11, %c0_12] : memref<1x256xf32, #tpu.memory_space<vmem>>, vector<1x256xf32>
      %14 = vector.broadcast %13 : vector<1x256xf32> to vector<16x256xf32>
      %15 = arith.addf %12, %14 : vector<16x256xf32>
      %cst_13 = arith.constant 0.000000e+00 : f32
      %16 = vector.broadcast %cst_13 : f32 to vector<16x256xf32>
      %17 = arith.maximumf %15, %16 : vector<16x256xf32>
      %c0_14 = arith.constant 0 : index
      %c0_15 = arith.constant 0 : index
      %18 = vector.load %arg6[%c0_14, %c0_15] : memref<16x256xf32, #tpu.memory_space<vmem>>, vector<16x256xf32>
      tpu.vector_store %arg6[%c0_14, %c0_15], %17 {strides = array<i32>} : memref<16x256xf32, #tpu.memory_space<vmem>>, vector<16x256xf32>,
    } else {
    }
    return
  }
  func.func @transform_0(%arg0: i32, %arg1: i32, %arg2: i32) -> (i32, i32) {
    %c0_i32 = arith.constant 0 : i32
    return %arg0, %arg2 : i32, i32
  }
  func.func @transform_1(%arg0: i32, %arg1: i32, %arg2: i32) -> (i32, i32) {
    %c0_i32 = arith.constant 0 : i32
    return %arg2, %arg1 : i32, i32
  }
  func.func @transform_2(%arg0: i32, %arg1: i32, %arg2: i32) -> (i32, i32) {
    %c0_i32 = arith.constant 0 : i32
    %c0_i32_0 = arith.constant 0 : i32
    return %c0_i32, %arg1 : i32, i32
  }
  func.func @transform_3(%arg0: i32, %arg1: i32, %arg2: i32) -> (i32, i32) {
    %c0_i32 = arith.constant 0 : i32
    return %arg0, %arg1 : i32, i32
  }
}

module attributes {stable_mosaic.version = 11 : i64} {
  func.func @_matmul_bias_kernel(%arg0: i32, %arg1: i32, %arg2: i32, %arg3: memref<16x256xbf16, #tpu.memory_space<vmem>>, %arg4: memref<256x256xbf16, #tpu.memory_space<vmem>>, %arg5: memref<1x256xf32, #tpu.memory_space<vmem>>, %arg6: memref<16x256xf32, #tpu.memory_space<vmem>>) attributes {dimension_semantics = [#tpu.dimension_semantics<parallel>, #tpu.dimension_semantics<parallel>, #tpu.dimension_semantics<arbitrary>], iteration_bounds = array<i64: 1, 1, 1>, scalar_prefetch = 0 : i64, scratch_operands = 0 : i64, tpu.core_type = #tpu.core_type<tc>, window_params = [{transform_indices = @transform_0, window_bounds = array<i64: 16, 256>}, {transform_indices = @transform_1, window_bounds = array<i64: 256, 256>}, {transform_indices = @transform_2, window_bounds = array<i64: 1, 256>}, {transform_indices = @transform_3, window_bounds = array<i64: 16, 256>}]} {
    %c0_i32 = arith.constant 0 : i32
    %0 = arith.cmpi eq, %arg2, %c0_i32 : i32
    %1 = arith.extui %0 : i1 to i32
    %c0_i32_0 = arith.constant 0 : i32
    %2 = arith.cmpi ne, %1, %c0_i32_0 : i32
    scf.if %2 {
      %cst_10 = arith.constant 0.000000e+00 : f32
      %12 = vector.broadcast %cst_10 : f32 to vector<16x256xf32>
      %c0_11 = arith.constant 0 : index
      %c0_12 = arith.constant 0 : index
      %13 = vector.load %arg6[%c0_11, %c0_12] : memref<16x256xf32, #tpu.memory_space<vmem>>, vector<16x256xf32>
      tpu.vector_store %arg6[%c0_11, %c0_12], %12 {strides = array<i32>} : memref<16x256xf32, #tpu.memory_space<vmem>>, vector<16x256xf32>,
    } else {
    }
    %c0 = arith.constant 0 : index
    %c0_1 = arith.constant 0 : index
    %3 = vector.load %arg6[%c0, %c0_1] : memref<16x256xf32, #tpu.memory_space<vmem>>, vector<16x256xf32>
    %c0_2 = arith.constant 0 : index
    %c0_3 = arith.constant 0 : index
    %4 = vector.load %arg3[%c0_2, %c0_3] : memref<16x256xbf16, #tpu.memory_space<vmem>>, vector<16x256xbf16>
    %c0_4 = arith.constant 0 : index
    %c0_5 = arith.constant 0 : index
    %5 = vector.load %arg4[%c0_4, %c0_5] : memref<256x256xbf16, #tpu.memory_space<vmem>>, vector<256x256xbf16>
    %cst = arith.constant dense<0.000000e+00> : vector<16x256xf32>
    %6 = tpu.matmul %4, %5, %cst {dimension_numbers = #tpu.dot_dimension_numbers<[1], [0], [0], [1], [0, 0, 1, 1], [], []>} : vector<16x256xbf16>, vector<256x256xbf16>, vector<16x256xf32> -> vector<16x256xf32>
    %7 = arith.addf %3, %6 : vector<16x256xf32>
    %c0_6 = arith.constant 0 : index
    %c0_7 = arith.constant 0 : index
    %8 = vector.load %arg6[%c0_6, %c0_7] : memref<16x256xf32, #tpu.memory_space<vmem>>, vector<16x256xf32>
    tpu.vector_store %arg6[%c0_6, %c0_7], %7 {strides = array<i32>} : memref<16x256xf32, #tpu.memory_space<vmem>>, vector<16x256xf32>,
    %c0_i32_8 = arith.constant 0 : i32
    %9 = arith.cmpi eq, %arg2, %c0_i32_8 : i32
    %10 = arith.extui %9 : i1 to i32
    %c0_i32_9 = arith.constant 0 : i32
    %11 = arith.cmpi ne, %10, %c0_i32_9 : i32
    scf.if %11 {
      %c0_10 = arith.constant 0 : index
      %c0_11 = arith.constant 0 : index
      %12 = vector.load %arg6[%c0_10, %c0_11] : memref<16x256xf32, #tpu.memory_space<vmem>>, vector<16x256xf32>
      %c0_12 = arith.constant 0 : index
      %c0_13 = arith.constant 0 : index
      %13 = vector.load %arg5[%c0_12, %c0_13] : memref<1x256xf32, #tpu.memory_space<vmem>>, vector<1x256xf32>
      %14 = vector.broadcast %13 : vector<1x256xf32> to vector<16x256xf32>
      %15 = arith.addf %12, %14 : vector<16x256xf32>
      %cst_14 = arith.constant 0.000000e+00 : f32
      %16 = vector.broadcast %cst_14 : f32 to vector<16x256xf32>
      %17 = arith.maximumf %15, %16 : vector<16x256xf32>
      %c0_15 = arith.constant 0 : index
      %c0_16 = arith.constant 0 : index
      %18 = vector.load %arg6[%c0_15, %c0_16] : memref<16x256xf32, #tpu.memory_space<vmem>>, vector<16x256xf32>
      tpu.vector_store %arg6[%c0_15, %c0_16], %17 {strides = array<i32>} : memref<16x256xf32, #tpu.memory_space<vmem>>, vector<16x256xf32>,
    } else {
    }
    return
  }
  func.func @transform_0(%arg0: i32, %arg1: i32, %arg2: i32) -> (i32, i32) {
    %c0_i32 = arith.constant 0 : i32
    return %arg0, %arg2 : i32, i32
  }
  func.func @transform_1(%arg0: i32, %arg1: i32, %arg2: i32) -> (i32, i32) {
    %c0_i32 = arith.constant 0 : i32
    return %arg2, %arg1 : i32, i32
  }
  func.func @transform_2(%arg0: i32, %arg1: i32, %arg2: i32) -> (i32, i32) {
    %c0_i32 = arith.constant 0 : i32
    %c0_i32_0 = arith.constant 0 : i32
    return %c0_i32, %arg1 : i32, i32
  }
  func.func @transform_3(%arg0: i32, %arg1: i32, %arg2: i32) -> (i32, i32) {
    %c0_i32 = arith.constant 0 : i32
    return %arg0, %arg1 : i32, i32
  }
}

module attributes {stable_mosaic.version = 11 : i64} {
  func.func @_matmul_bias_kernel(%arg0: i32, %arg1: i32, %arg2: i32, %arg3: memref<16x256xbf16, #tpu.memory_space<vmem>>, %arg4: memref<256x128xbf16, #tpu.memory_space<vmem>>, %arg5: memref<1x128xf32, #tpu.memory_space<vmem>>, %arg6: memref<16x128xf32, #tpu.memory_space<vmem>>) attributes {dimension_semantics = [#tpu.dimension_semantics<parallel>, #tpu.dimension_semantics<parallel>, #tpu.dimension_semantics<arbitrary>], iteration_bounds = array<i64: 1, 1, 1>, scalar_prefetch = 0 : i64, scratch_operands = 0 : i64, tpu.core_type = #tpu.core_type<tc>, window_params = [{transform_indices = @transform_0, window_bounds = array<i64: 16, 256>}, {transform_indices = @transform_1, window_bounds = array<i64: 256, 128>}, {transform_indices = @transform_2, window_bounds = array<i64: 1, 128>}, {transform_indices = @transform_3, window_bounds = array<i64: 16, 128>}]} {
    %c0_i32 = arith.constant 0 : i32
    %0 = arith.cmpi eq, %arg2, %c0_i32 : i32
    %1 = arith.extui %0 : i1 to i32
    %c0_i32_0 = arith.constant 0 : i32
    %2 = arith.cmpi ne, %1, %c0_i32_0 : i32
    scf.if %2 {
      %cst_10 = arith.constant 0.000000e+00 : f32
      %12 = vector.broadcast %cst_10 : f32 to vector<16x128xf32>
      %c0_11 = arith.constant 0 : index
      %c0_12 = arith.constant 0 : index
      %13 = vector.load %arg6[%c0_11, %c0_12] : memref<16x128xf32, #tpu.memory_space<vmem>>, vector<16x128xf32>
      tpu.vector_store %arg6[%c0_11, %c0_12], %12 {strides = array<i32>} : memref<16x128xf32, #tpu.memory_space<vmem>>, vector<16x128xf32>,
    } else {
    }
    %c0 = arith.constant 0 : index
    %c0_1 = arith.constant 0 : index
    %3 = vector.load %arg6[%c0, %c0_1] : memref<16x128xf32, #tpu.memory_space<vmem>>, vector<16x128xf32>
    %c0_2 = arith.constant 0 : index
    %c0_3 = arith.constant 0 : index
    %4 = vector.load %arg3[%c0_2, %c0_3] : memref<16x256xbf16, #tpu.memory_space<vmem>>, vector<16x256xbf16>
    %c0_4 = arith.constant 0 : index
    %c0_5 = arith.constant 0 : index
    %5 = vector.load %arg4[%c0_4, %c0_5] : memref<256x128xbf16, #tpu.memory_space<vmem>>, vector<256x128xbf16>
    %cst = arith.constant dense<0.000000e+00> : vector<16x128xf32>
    %6 = tpu.matmul %4, %5, %cst {dimension_numbers = #tpu.dot_dimension_numbers<[1], [0], [0], [1], [0, 0, 1, 1], [], []>} : vector<16x256xbf16>, vector<256x128xbf16>, vector<16x128xf32> -> vector<16x128xf32>
    %7 = arith.addf %3, %6 : vector<16x128xf32>
    %c0_6 = arith.constant 0 : index
    %c0_7 = arith.constant 0 : index
    %8 = vector.load %arg6[%c0_6, %c0_7] : memref<16x128xf32, #tpu.memory_space<vmem>>, vector<16x128xf32>
    tpu.vector_store %arg6[%c0_6, %c0_7], %7 {strides = array<i32>} : memref<16x128xf32, #tpu.memory_space<vmem>>, vector<16x128xf32>,
    %c0_i32_8 = arith.constant 0 : i32
    %9 = arith.cmpi eq, %arg2, %c0_i32_8 : i32
    %10 = arith.extui %9 : i1 to i32
    %c0_i32_9 = arith.constant 0 : i32
    %11 = arith.cmpi ne, %10, %c0_i32_9 : i32
    scf.if %11 {
      %c0_10 = arith.constant 0 : index
      %c0_11 = arith.constant 0 : index
      %12 = vector.load %arg6[%c0_10, %c0_11] : memref<16x128xf32, #tpu.memory_space<vmem>>, vector<16x128xf32>
      %c0_12 = arith.constant 0 : index
      %c0_13 = arith.constant 0 : index
      %13 = vector.load %arg5[%c0_12, %c0_13] : memref<1x128xf32, #tpu.memory_space<vmem>>, vector<1x128xf32>
      %14 = vector.broadcast %13 : vector<1x128xf32> to vector<16x128xf32>
      %15 = arith.addf %12, %14 : vector<16x128xf32>
      %cst_14 = arith.constant 0.000000e+00 : f32
      %16 = vector.broadcast %cst_14 : f32 to vector<16x128xf32>
      %17 = arith.maximumf %15, %16 : vector<16x128xf32>
      %c0_15 = arith.constant 0 : index
      %c0_16 = arith.constant 0 : index
      %18 = vector.load %arg6[%c0_15, %c0_16] : memref<16x128xf32, #tpu.memory_space<vmem>>, vector<16x128xf32>
      tpu.vector_store %arg6[%c0_15, %c0_16], %17 {strides = array<i32>} : memref<16x128xf32, #tpu.memory_space<vmem>>, vector<16x128xf32>,
    } else {
    }
    return
  }
  func.func @transform_0(%arg0: i32, %arg1: i32, %arg2: i32) -> (i32, i32) {
    %c0_i32 = arith.constant 0 : i32
    return %arg0, %arg2 : i32, i32
  }
  func.func @transform_1(%arg0: i32, %arg1: i32, %arg2: i32) -> (i32, i32) {
    %c0_i32 = arith.constant 0 : i32
    return %arg2, %arg1 : i32, i32
  }
  func.func @transform_2(%arg0: i32, %arg1: i32, %arg2: i32) -> (i32, i32) {
    %c0_i32 = arith.constant 0 : i32
    %c0_i32_0 = arith.constant 0 : i32
    return %c0_i32, %arg1 : i32, i32
  }
  func.func @transform_3(%arg0: i32, %arg1: i32, %arg2: i32) -> (i32, i32) {
    %c0_i32 = arith.constant 0 : i32
    return %arg0, %arg1 : i32, i32
  }
}

</mosaic_0001>

<bundles_post_ra>
// kernel: alexnet_forward.10
= control target key start
LH: loop header
LB: loop body
LE: loop exit
PB: predicated region body
PF: predicated region fallthrough
CT: control target
= control target key end

     0   :  { %s2019_s1 = inlined_call_operand.vmem [shape: bf16[384,128], index: 1, kind: input, shape index: {}]   ;;  %s2020_s0 = inlined_call_operand.vmem [shape: bf16[256,384], index: 0, kind: input, shape index: {}]   ;;  %s2021_s2 = inlined_call_operand.vmem [shape: f32[1,128], index: 2, kind: input, shape index: {}]   ;;  %s2022_s3 = inlined_call_operand.vmem [shape: f32[256,128], index: 3, kind: output, shape index: {}]  }
   0x1   :  { %v1375_v0 = vld [vmem:[%s2019_s1 + $0x38] sm:$0xff]  ;;  %v1374_v3 = vld [vmem:[%s2019_s1 + $0x30] sm:$0xff]  ;;  %v1373_v6 = vld [vmem:[%s2019_s1 + $0x28] sm:$0xff] }
   0x2   :  { %v1444_v1 = vld [vmem:[%s2019_s1 + $0x78] sm:$0xff]  ;;  %594 = vmatpush.bf16.msra.mxu0 %v1375_v0  ;;  %1392 = vmatpush.bf16.msra.mxu3 %v1375_v0  ;;  %v1459_v4 = vld [vmem:[%s2019_s1 + $0x70] sm:$0xff]  ;;  %v1381_v7 = vld [vmem:[%s2019_s1 + $0x68] sm:$0xff] }
   0x3   :  { %v1449_v2 = vld [vmem:[%s2019_s1 + $0xb8] sm:$0xff]  ;;  %683 = vmatpush.bf16.msra.mxu1 %v1444_v1  ;;  %v1464_v5 = vld [vmem:[%s2019_s1 + $0xb0] sm:$0xff]  ;;  %v1477_v8 = vld [vmem:[%s2019_s1 + $0xa8] sm:$0xff] }
   0x4   :  { %772 = vmatpush.bf16.msra.mxu2 %v1449_v2  ;;  %v1372_v9 = vld [vmem:[%s2019_s1 + $0x20] sm:$0xff]  ;;  %v1371_v12 = vld [vmem:[%s2019_s1 + $0x18] sm:$0xff]  ;;  %v1370_v15 = vld [vmem:[%s2019_s1 + $0x10] sm:$0xff] }
   0x5   :  { %v1380_v10 = vld [vmem:[%s2019_s1 + $0x60] sm:$0xff]  ;;  %v1379_v13 = vld [vmem:[%s2019_s1 + $0x58] sm:$0xff]  ;;  %v1378_v16 = vld [vmem:[%s2019_s1 + $0x50] sm:$0xff] }
   0x6   :  { %595 = vmatpush.bf16.msra.mxu0 %v1374_v3  ;;  %1393 = vmatpush.bf16.msra.mxu3 %v1374_v3  ;;  %v1489_v11 = vld [vmem:[%s2019_s1 + $0xa0] sm:$0xff]  ;;  %v1501_v14 = vld [vmem:[%s2019_s1 + $0x98] sm:$0xff]  ;;  %v1513_v17 = vld [vmem:[%s2019_s1 + $0x90] sm:$0xff] }
   0x7   :  { %684 = vmatpush.bf16.msra.mxu1 %v1459_v4  ;;  %v1369_v18 = vld [vmem:[%s2019_s1 + $0x8] sm:$0xff]  ;;  %v1368_v21 = vld [vmem:[%s2019_s1] sm:$0xff]  ;;  %v1036_v29 = vld [vmem:[%s2020_s0 + $0xc] sm:$0xf0] }
   0x8   :  { %773 = vmatpush.bf16.msra.mxu2 %v1464_v5  ;;  %v1377_v19 = vld [vmem:[%s2019_s1 + $0x48] sm:$0xff]  ;;  %v1376_v22 = vld [vmem:[%s2019_s1 + $0x40] sm:$0xff]  ;;  %v1322_v31 = vld [vmem:[%s2020_s0 + $0x10] sm:$0xf0] }
   0x9   :  { %v1525_v20 = vld [vmem:[%s2019_s1 + $0x88] sm:$0xff]  ;;  %v1536_v23 = vld [vmem:[%s2019_s1 + $0x80] sm:$0xff]  ;;  %v1046_v36 = vld [vmem:[%s2020_s0 + $0x18] sm:$0xf] }
   0xa   :  { %596 = vmatpush.bf16.msra.mxu0 %v1373_v6  ;;  %1394 = vmatpush.bf16.msra.mxu3 %v1373_v6  ;;  %v1034_v24 = vld [vmem:[%s2020_s0] sm:$0xf]  ;;  %v1321_v25 = vld [vmem:[%s2020_s0 + $0x8] sm:$0xf0]  ;;  %v1320_v28 = vld [vmem:[%s2020_s0 + $0x4] sm:$0xf] }
   0xb   :  { %685 = vmatpush.bf16.msra.mxu1 %v1381_v7  ;;  %v1178_v26 = vld [vmem:[%s2020_s0 + $0x120] sm:$0xf]  ;;  %v1357_v27 = vld [vmem:[%s2020_s0 + $0x128] sm:$0xf0]  ;;  %v1042_v30 = vld [vmem:[%s2020_s0 + $0x8] sm:$0xf]  ;;  %v1035_v32 = vor.u32 %v1321_v25, %v1034_v24  ;;  %v1039_v34 = vor.u32 %v1320_v28, %v1036_v29 }
   0xc   :  { %774 = vmatpush.bf16.msra.mxu2 %v1477_v8  ;;  %v1179_v33 = vor.u32 %v1357_v27, %v1178_v26  ;;  %v1043_v35 = vor.u32 %v1322_v31, %v1042_v30  ;;  %v1324_v37 = vld [vmem:[%s2020_s0 + $0x20] sm:$0xf0]  ;;  %v1190_v38 = vld [vmem:[%s2020_s0 + $0x138] sm:$0xf]  ;;  %v1323_v40 = vld [vmem:[%s2020_s0 + $0x1c] sm:$0xf] }
   0xd   :  { %v1360_v39 = vld [vmem:[%s2020_s0 + $0x140] sm:$0xf0]  ;;  %v1048_v41 = vld [vmem:[%s2020_s0 + $0x24] sm:$0xf0]  ;;  %v1054_v42 = vld [vmem:[%s2020_s0 + $0x20] sm:$0xf]  ;;  %v1047_v44 = vor.u32 %v1324_v37, %v1046_v36 }
   0xe   :  { %597 = vmatpush.bf16.msra.mxu0 %v1372_v9  ;;  %1395 = vmatpush.bf16.msra.mxu3 %v1372_v9  ;;  %v1325_v43 = vld [vmem:[%s2020_s0 + $0x28] sm:$0xf0]  ;;  %v1191_v45 = vor.u32 %v1360_v39, %v1190_v38  ;;  %v1051_v46 = vor.u32 %v1323_v40, %v1048_v41  ;;  %v1058_v48 = vld [vmem:[%s2020_s0 + $0x30] sm:$0xf]  ;;  %v1327_v49 = vld [vmem:[%s2020_s0 + $0x38] sm:$0xf0] }
   0xf   :  { %686 = vmatpush.bf16.msra.mxu1 %v1380_v10  ;;  %v1055_v47 = vor.u32 %v1325_v43, %v1054_v42  ;;  %v1202_v50 = vld [vmem:[%s2020_s0 + $0x150] sm:$0xf]  ;;  %v1363_v51 = vld [vmem:[%s2020_s0 + $0x158] sm:$0xf0]  ;;  %v1326_v52 = vld [vmem:[%s2020_s0 + $0x34] sm:$0xf]  ;;  %v1059_v56 = vor.u32 %v1327_v49, %v1058_v48 }
  0x10   :  { %775 = vmatpush.bf16.msra.mxu2 %v1489_v11  ;;  %v1060_v53 = vld [vmem:[%s2020_s0 + $0x3c] sm:$0xf0]  ;;  %v1066_v54 = vld [vmem:[%s2020_s0 + $0x38] sm:$0xf]  ;;  %v1328_v55 = vld [vmem:[%s2020_s0 + $0x40] sm:$0xf0]  ;;  %v1203_v57 = vor.u32 %v1363_v51, %v1202_v50 }
  0x11   :  { %v1063_v58 = vor.u32 %v1326_v52, %v1060_v53  ;;  %v1067_v59 = vor.u32 %v1328_v55, %v1066_v54  ;;  %v1070_v60 = vld [vmem:[%s2020_s0 + $0x48] sm:$0xf]  ;;  %v1330_v61 = vld [vmem:[%s2020_s0 + $0x50] sm:$0xf0]  ;;  %v1329_v0 = vld [vmem:[%s2020_s0 + $0x4c] sm:$0xf] }
  0x12   :  { %598 = vmatpush.bf16.msra.mxu0 %v1371_v12  ;;  %1396 = vmatpush.bf16.msra.mxu3 %v1371_v12  ;;  %v1214_v62 = vld [vmem:[%s2020_s0 + $0x168] sm:$0xf]  ;;  %v1366_v63 = vld [vmem:[%s2020_s0 + $0x170] sm:$0xf0]  ;;  %v1331_v3 = vld [vmem:[%s2020_s0 + $0x58] sm:$0xf0] }
  0x13   :  { %687 = vmatpush.bf16.msra.mxu1 %v1379_v13  ;;  %v1333_v9 = vld [vmem:[%s2020_s0 + $0x68] sm:$0xf0]  ;;  %v1180_v12 = vld [vmem:[%s2020_s0 + $0x12c] sm:$0xf0]  ;;  %v1192_v24 = vld [vmem:[%s2020_s0 + $0x144] sm:$0xf0] }
  0x14   :  { %776 = vmatpush.bf16.msra.mxu2 %v1501_v14  ;;  %v1096_v25 = vld [vmem:[%s2020_s0 + $0x84] sm:$0xf0]  ;;  %v1102_v26 = vld [vmem:[%s2020_s0 + $0x80] sm:$0xf]  ;;  %v1337_v27 = vld [vmem:[%s2020_s0 + $0x88] sm:$0xf0] }
  0x15   :  { %v1103_v31 = vor.u32 %v1337_v27, %v1102_v26  ;;  %v1204_v36 = vld [vmem:[%s2020_s0 + $0x15c] sm:$0xf0]  ;;  %v1114_v38 = vld [vmem:[%s2020_s0 + $0x98] sm:$0xf]  ;;  %v1340_v39 = vld [vmem:[%s2020_s0 + $0xa0] sm:$0xf0] }
  0x16   :  { %599 = vmatpush.bf16.msra.mxu0 %v1370_v15  ;;  %1397 = vmatpush.bf16.msra.mxu3 %v1370_v15  ;;  %v1334_v15 = vld [vmem:[%s2020_s0 + $0x70] sm:$0xf0]  ;;  %v1108_v37 = vld [vmem:[%s2020_s0 + $0x9c] sm:$0xf0]  ;;  %v1115_v43 = vor.u32 %v1340_v39, %v1114_v38  ;;  %v1216_v48 = vld [vmem:[%s2020_s0 + $0x174] sm:$0xf0] }
  0x17   :  { %688 = vmatpush.bf16.msra.mxu1 %v1378_v16  ;;  %v1120_v49 = vld [vmem:[%s2020_s0 + $0xb4] sm:$0xf0]  ;;  %v1126_v50 = vld [vmem:[%s2020_s0 + $0xb0] sm:$0xf]  ;;  %v1343_v51 = vld [vmem:[%s2020_s0 + $0xb8] sm:$0xf0] }
  0x18   :  { %777 = vmatpush.bf16.msra.mxu2 %v1513_v17  ;;  %v1127_v55 = vor.u32 %v1343_v51, %v1126_v50  ;;  %v1154_v39 = vld [vmem:[%s2020_s0 + $0xf0] sm:$0xf] }
  0x1a   :  { %600 = vmatpush.bf16.msra.mxu0 %v1369_v18  ;;  %1398 = vmatpush.bf16.msra.mxu3 %v1369_v18 }
  0x1b   :  { %689 = vmatpush.bf16.msra.mxu1 %v1377_v19 }
  0x1c   :  { %778 = vmatpush.bf16.msra.mxu2 %v1525_v20 }
  0x1e   :  { %601 = vmatpush.bf16.msra.mxu0 %v1368_v21  ;;  %1399 = vmatpush.bf16.msra.mxu3 %v1368_v21  ;;  %v1336_v21 = vld [vmem:[%s2020_s0 + $0x80] sm:$0xf0] }
  0x1f   :  { %690 = vmatpush.bf16.msra.mxu1 %v1376_v22 }
  0x20   :  { %779 = vmatpush.bf16.msra.mxu2 %v1536_v23 }
  0x21   :  { %602 = vmatmul.bf16.vlgmr.msra.gmra.mxu0 %v1035_v32  ;;  %662 = vmatmul.bf16.vlgmr.msra.gmra.mxu3 %v1179_v33  ;;  %v1106_v32 = vld [vmem:[%s2020_s0 + $0x90] sm:$0xf]  ;;  %v1339_v33 = vld [vmem:[%s2020_s0 + $0x98] sm:$0xf0] }
  0x22   :  { %1400 = vmatpush.bf16.msrb.mxu3 %v1444_v1  ;;  %691 = vmatmul.bf16.vlgmr.msra.gmra.mxu1 %v1039_v34  ;;  %v1072_v1 = vld [vmem:[%s2020_s0 + $0x54] sm:$0xf0]  ;;  %v1338_v34 = vld [vmem:[%s2020_s0 + $0x94] sm:$0xf]  ;;  %v1107_v40 = vor.u32 %v1339_v33, %v1106_v32 }
  0x23   :  { %780 = vmatmul.bf16.vlgmr.msra.gmra.mxu2 %v1043_v35  ;;  %v1075_v6 = vor.u32 %v1329_v0, %v1072_v1  ;;  %v1362_v35 = vld [vmem:[%s2020_s0 + $0x154] sm:$0xf]  ;;  %v1111_v42 = vor.u32 %v1338_v34, %v1108_v37 }
  0x24   :  { %v1207_v41 = vor.u32 %v1362_v35, %v1204_v36 }
  0x26   :  { %1401 = vmatpush.bf16.msrb.mxu3 %v1459_v4  ;;  %v1071_v4 = vor.u32 %v1330_v61, %v1070_v60  ;;  %v1358_v60 = vld [vmem:[%s2020_s0 + $0x130] sm:$0xf0]  ;;  %v1132_v61 = vld [vmem:[%s2020_s0 + $0xcc] sm:$0xf0] }
  0x2a   :  { %1402 = vmatpush.bf16.msrb.mxu3 %v1381_v7 }
  0x2e   :  { %1403 = vmatpush.bf16.msrb.mxu3 %v1380_v10  ;;  %v1332_v10 = vld [vmem:[%s2020_s0 + $0x64] sm:$0xf] }
  0x31   :  { %607 = vmatmul.bf16.gmra.mxu0 %v1047_v44  ;;  %667 = vmatmul.bf16.gmra.mxu3 %v1191_v45  ;;  %v1118_v44 = vld [vmem:[%s2020_s0 + $0xa8] sm:$0xf]  ;;  %v1342_v45 = vld [vmem:[%s2020_s0 + $0xb0] sm:$0xf0] }
  0x32   :  { %1404 = vmatpush.bf16.msrb.mxu3 %v1379_v13  ;;  %696 = vmatmul.bf16.gmra.mxu1 %v1051_v46  ;;  %v1084_v13 = vld [vmem:[%s2020_s0 + $0x6c] sm:$0xf0]  ;;  %v1341_v46 = vld [vmem:[%s2020_s0 + $0xac] sm:$0xf]  ;;  %v1119_v52 = vor.u32 %v1342_v45, %v1118_v44  ;;  %v1364_v44 = vld [vmem:[%s2020_s0 + $0x160] sm:$0xf0] }
  0x33   :  { %785 = vmatmul.bf16.gmra.mxu2 %v1055_v47  ;;  %v1087_v18 = vor.u32 %v1332_v10, %v1084_v13  ;;  %v1365_v47 = vld [vmem:[%s2020_s0 + $0x16c] sm:$0xf]  ;;  %v1123_v54 = vor.u32 %v1341_v46, %v1120_v49  ;;  %v1771_v10 = vld [vmem:[%s2021_s2] ss:$0 sm:$0xff]  ;;  %v1142_v13 = vld [vmem:[%s2020_s0 + $0xd8] sm:$0xf] }
  0x34   :  { %v1219_v53 = vor.u32 %v1365_v47, %v1216_v48  ;;  %v1156_v45 = vld [vmem:[%s2020_s0 + $0xfc] sm:$0xf0]  ;;  %v1162_v46 = vld [vmem:[%s2020_s0 + $0xf8] sm:$0xf]  ;;  %v1352_v47 = vld [vmem:[%s2020_s0 + $0x100] sm:$0xf0] }
  0x36   :  { %1405 = vmatpush.bf16.msrb.mxu3 %v1378_v16 }
  0x3a   :  { %1406 = vmatpush.bf16.msrb.mxu3 %v1377_v19 }
  0x3e   :  { %1407 = vmatpush.bf16.msrb.mxu3 %v1376_v22  ;;  %v1335_v22 = vld [vmem:[%s2020_s0 + $0x7c] sm:$0xf] }
  0x3f   :  { %v1099_v30 = vor.u32 %v1335_v22, %v1096_v25 }
  0x41   :  { %612 = vmatmul.bf16.gmra.mxu0 %v1059_v56  ;;  %672 = vmatmul.bf16.gmra.mxu3 %v1203_v57  ;;  %v1130_v56 = vld [vmem:[%s2020_s0 + $0xc0] sm:$0xf]  ;;  %v1345_v57 = vld [vmem:[%s2020_s0 + $0xc8] sm:$0xf0] }
  0x42   :  { %1408 = vmatpush.bf16.msra.mxu3 %v1449_v2  ;;  %701 = vmatmul.bf16.gmra.mxu1 %v1063_v58  ;;  %v1078_v2 = vld [vmem:[%s2020_s0 + $0x50] sm:$0xf]  ;;  %v1344_v58 = vld [vmem:[%s2020_s0 + $0xc4] sm:$0xf]  ;;  %v1131_v0 = vor.u32 %v1345_v57, %v1130_v56  ;;  %v1163_v56 = vor.u32 %v1352_v47, %v1162_v46 }
  0x43   :  { %790 = vmatmul.bf16.gmra.mxu2 %v1067_v59  ;;  %v1079_v7 = vor.u32 %v1331_v3, %v1078_v2  ;;  %v1186_v59 = vld [vmem:[%s2020_s0 + $0x128] sm:$0xf]  ;;  %v1135_v3 = vor.u32 %v1344_v58, %v1132_v61 }
  0x44   :  { %v1187_v1 = vor.u32 %v1358_v60, %v1186_v59 }
  0x46   :  { %1409 = vmatpush.bf16.msra.mxu3 %v1464_v5  ;;  %v1215_v5 = vor.u32 %v1366_v63, %v1214_v62  ;;  %v1138_v62 = vld [vmem:[%s2020_s0 + $0xc8] sm:$0xf]  ;;  %v1346_v63 = vld [vmem:[%s2020_s0 + $0xd0] sm:$0xf0] }
  0x4a   :  { %1410 = vmatpush.bf16.msra.mxu3 %v1477_v8  ;;  %v1082_v8 = vld [vmem:[%s2020_s0 + $0x60] sm:$0xf] }
  0x4b   :  { %v1083_v16 = vor.u32 %v1333_v9, %v1082_v8 }
  0x4e   :  { %1411 = vmatpush.bf16.msra.mxu3 %v1489_v11  ;;  %v1356_v11 = vld [vmem:[%s2020_s0 + $0x124] sm:$0xf] }
  0x51   :  { %617 = vmatmul.bf16.gmra.mxu0 %v1071_v4  ;;  %677 = vmatmul.bf16.gmra.mxu3 %v1215_v5  ;;  %v1139_v4 = vor.u32 %v1346_v63, %v1138_v62 }
  0x52   :  { %1412 = vmatpush.bf16.msra.mxu3 %v1501_v14  ;;  %706 = vmatmul.bf16.gmra.mxu1 %v1075_v6  ;;  %v1090_v14 = vld [vmem:[%s2020_s0 + $0x68] sm:$0xf] }
  0x53   :  { %795 = vmatmul.bf16.gmra.mxu2 %v1079_v7  ;;  %v1091_v19 = vor.u32 %v1334_v15, %v1090_v14  ;;  %v1348_v14 = vld [vmem:[%s2020_s0 + $0xe0] sm:$0xf0] }
  0x54   :  { %v1143_v25 = vor.u32 %v1348_v14, %v1142_v13 }
  0x56   :  { %1413 = vmatpush.bf16.msra.mxu3 %v1513_v17  ;;  %v1183_v17 = vor.u32 %v1356_v11, %v1180_v12 }
  0x5a   :  { %1414 = vmatpush.bf16.msra.mxu3 %v1525_v20  ;;  %v1094_v20 = vld [vmem:[%s2020_s0 + $0x78] sm:$0xf] }
  0x5b   :  { %v1095_v28 = vor.u32 %v1336_v21, %v1094_v20  ;;  %v1150_v20 = vld [vmem:[%s2020_s0 + $0xe0] sm:$0xf]  ;;  %v1349_v21 = vld [vmem:[%s2020_s0 + $0xe8] sm:$0xf0] }
  0x5e   :  { %1415 = vmatpush.bf16.msra.mxu3 %v1536_v23  ;;  %v1359_v23 = vld [vmem:[%s2020_s0 + $0x13c] sm:$0xf] }
  0x5f   :  { %v1195_v29 = vor.u32 %v1359_v23, %v1192_v24 }
  0x61   :  { %622 = vmatmul.bf16.gmra.mxu0 %v1083_v16  ;;  %751 = vmatmul.bf16.vlgmr.msrb.gmra.mxu3 %v1183_v17  ;;  %v1347_v16 = vld [vmem:[%s2020_s0 + $0xdc] sm:$0xf]  ;;  %v1198_v17 = vld [vmem:[%s2020_s0 + $0x140] sm:$0xf] }
  0x62   :  { %711 = vmatmul.bf16.gmra.mxu1 %v1087_v18  ;;  %v1361_v18 = vld [vmem:[%s2020_s0 + $0x148] sm:$0xf0] }
  0x63   :  { %800 = vmatmul.bf16.gmra.mxu2 %v1091_v19  ;;  %v1144_v19 = vld [vmem:[%s2020_s0 + $0xe4] sm:$0xf0]  ;;  %v1199_v26 = vor.u32 %v1361_v18, %v1198_v17 }
  0x71   :  { %627 = vmatmul.bf16.gmra.mxu0 %v1095_v28  ;;  %756 = vmatmul.bf16.gmra.mxu3 %v1195_v29  ;;  %v1147_v29 = vor.u32 %v1347_v16, %v1144_v19 }
  0x72   :  { %716 = vmatmul.bf16.gmra.mxu1 %v1099_v30  ;;  %v1151_v30 = vor.u32 %v1349_v21, %v1150_v20 }
  0x73   :  { %805 = vmatmul.bf16.gmra.mxu2 %v1103_v31 }
  0x81   :  { %632 = vmatmul.bf16.gmra.mxu0 %v1107_v40  ;;  %761 = vmatmul.bf16.gmra.mxu3 %v1207_v41  ;;  %v1351_v40 = vld [vmem:[%s2020_s0 + $0xf8] sm:$0xf0] }
  0x82   :  { %721 = vmatmul.bf16.gmra.mxu1 %v1111_v42  ;;  %v1350_v42 = vld [vmem:[%s2020_s0 + $0xf4] sm:$0xf]  ;;  %v1155_v51 = vor.u32 %v1351_v40, %v1154_v39 }
  0x83   :  { %810 = vmatmul.bf16.gmra.mxu2 %v1115_v43  ;;  %v1210_v43 = vld [vmem:[%s2020_s0 + $0x158] sm:$0xf] }
  0x91   :  { %637 = vmatmul.bf16.gmra.mxu0 %v1119_v52  ;;  %766 = vmatmul.bf16.gmra.mxu3 %v1219_v53  ;;  %v1211_v52 = vor.u32 %v1364_v44, %v1210_v43 }
  0x92   :  { %726 = vmatmul.bf16.gmra.mxu1 %v1123_v54 }
  0x93   :  { %815 = vmatmul.bf16.gmra.mxu2 %v1127_v55  ;;  %v1159_v55 = vor.u32 %v1350_v42, %v1156_v45 }
  0x9e   :  { %v603_v2 = vpop.f32.mrf.mxu0 }
  0x9f   :  { %v692_v5 = vpop.f32.mrf.mxu1 }
  0xa0   :  { %v693_v6 = vadd.f32 %v692_v5, %v603_v2  ;;  %v1354_v2 = vld [vmem:[%s2020_s0 + $0x110] sm:$0xf0]  ;;  %v1222_v5 = vld [vmem:[%s2020_s0 + $0x170] sm:$0xf] }
  0xa1   :  { %642 = vmatmul.bf16.gmra.mxu0 %v1131_v0  ;;  %840 = vmatmul.bf16.vlgmr.msra.gmra.mxu3 %v1187_v1  ;;  %v1166_v1 = vld [vmem:[%s2020_s0 + $0x108] sm:$0xf] }
  0xa2   :  { %731 = vmatmul.bf16.gmra.mxu1 %v1135_v3 }
  0xa3   :  { %820 = vmatmul.bf16.gmra.mxu2 %v1139_v4  ;;  %v1353_v4 = vld [vmem:[%s2020_s0 + $0x10c] sm:$0xf] }
  0xa4   :  { %v1766_v7 = vpop.f32.mrf.mxu3 }
  0xa6   :  { %v781_v8 = vpop.f32.mrf.mxu2  ;;  %v605_v11 = vpop.f32.mrf.mxu0 }
  0xa7   :  { %v782_v9 = vadd.f32 %v781_v8, %v693_v6  ;;  %v694_v12 = vpop.f32.mrf.mxu1  ;;  %v1367_v6 = vld [vmem:[%s2020_s0 + $0x178] sm:$0xf0]  ;;  %v1168_v8 = vld [vmem:[%s2020_s0 + $0x114] sm:$0xf0] }
  0xa8   :  { %v695_v22 = vadd.f32 %v694_v12, %v605_v11  ;;  %v1355_v11 = vld [vmem:[%s2020_s0 + $0x118] sm:$0xf0]  ;;  %v1223_v16 = vor.u32 %v1367_v6, %v1222_v5  ;;  %v1171_v19 = vor.u32 %v1353_v4, %v1168_v8 }
  0xa9   :  { %v964_v15 = vadd.f32 %v1771_v10, %v782_v9  ;;  %v1174_v9 = vld [vmem:[%s2020_s0 + $0x110] sm:$0xf] }
  0xaa   :  { %v1175_v20 = vor.u32 %v1355_v11, %v1174_v9 }
  0xab   :  { %996 = vst [vmem:[%s2022_s3] sm:$0xff] %v964_v15  ;;  %v1167_v15 = vor.u32 %v1354_v2, %v1166_v1 }
  0xac   :  { %v1801_v23 = vpop.f32.mrf.mxu3 }
  0xae   :  { %v783_v24 = vpop.f32.mrf.mxu2  ;;  %v608_v28 = vpop.f32.mrf.mxu0 }
  0xaf   :  { %v784_v27 = vadd.f32 %v783_v24, %v695_v22  ;;  %v697_v31 = vpop.f32.mrf.mxu1 }
  0xb0   :  { %v698_v33 = vadd.f32 %v697_v31, %v608_v28 }
  0xb1   :  { %647 = vmatmul.bf16.gmra.mxu0 %v1143_v25  ;;  %845 = vmatmul.bf16.gmra.mxu3 %v1199_v26  ;;  %v965_v32 = vadd.f32 %v1771_v10, %v784_v27 }
  0xb2   :  { %736 = vmatmul.bf16.gmra.mxu1 %v1147_v29 }
  0xb3   :  { %825 = vmatmul.bf16.gmra.mxu2 %v1151_v30  ;;  %997 = vst [vmem:[%s2022_s3 + $0x8] sm:$0xff] %v965_v32 }
  0xb4   :  { %v1807_v34 = vpop.f32.mrf.mxu3 }
  0xb6   :  { %v786_v35 = vpop.f32.mrf.mxu2  ;;  %v610_v37 = vpop.f32.mrf.mxu0 }
  0xb7   :  { %v787_v36 = vadd.f32 %v786_v35, %v698_v33  ;;  %v699_v38 = vpop.f32.mrf.mxu1 }
  0xb8   :  { %v700_v48 = vadd.f32 %v699_v38, %v610_v37 }
  0xb9   :  { %v966_v41 = vadd.f32 %v1771_v10, %v787_v36 }
  0xbb   :  { %998 = vst [vmem:[%s2022_s3 + $0x10] sm:$0xff] %v966_v41 }
  0xbc   :  { %v1837_v49 = vpop.f32.mrf.mxu3 }
  0xbe   :  { %v788_v50 = vpop.f32.mrf.mxu2  ;;  %v613_v54 = vpop.f32.mrf.mxu0 }
  0xbf   :  { %v789_v53 = vadd.f32 %v788_v50, %v700_v48  ;;  %v702_v57 = vpop.f32.mrf.mxu1 }
  0xc0   :  { %v703_v59 = vadd.f32 %v702_v57, %v613_v54 }
  0xc1   :  { %652 = vmatmul.bf16.gmra.mxu0 %v1155_v51  ;;  %850 = vmatmul.bf16.gmra.mxu3 %v1211_v52  ;;  %v967_v58 = vadd.f32 %v1771_v10, %v789_v53 }
  0xc2   :  { %741 = vmatmul.bf16.gmra.mxu1 %v1159_v55 }
  0xc3   :  { %830 = vmatmul.bf16.gmra.mxu2 %v1163_v56  ;;  %999 = vst [vmem:[%s2022_s3 + $0x18] sm:$0xff] %v967_v58 }
  0xc4   :  { %v1843_v60 = vpop.f32.mrf.mxu3 }
  0xc6   :  { %v791_v61 = vpop.f32.mrf.mxu2  ;;  %v615_v63 = vpop.f32.mrf.mxu0 }
  0xc7   :  { %v792_v62 = vadd.f32 %v791_v61, %v703_v59  ;;  %v704_v0 = vpop.f32.mrf.mxu1 }
  0xc8   :  { %v705_v12 = vadd.f32 %v704_v0, %v615_v63 }
  0xc9   :  { %v968_v3 = vadd.f32 %v1771_v10, %v792_v62 }
  0xcb   :  { %1000 = vst [vmem:[%s2022_s3 + $0x20] sm:$0xff] %v968_v3 }
  0xcc   :  { %v1873_v13 = vpop.f32.mrf.mxu3 }
  0xce   :  { %v793_v14 = vpop.f32.mrf.mxu2  ;;  %v618_v18 = vpop.f32.mrf.mxu0 }
  0xcf   :  { %v794_v17 = vadd.f32 %v793_v14, %v705_v12  ;;  %v707_v21 = vpop.f32.mrf.mxu1 }
  0xd0   :  { %v708_v24 = vadd.f32 %v707_v21, %v618_v18 }
  0xd1   :  { %657 = vmatmul.bf16.gmra.mxu0 %v1167_v15  ;;  %855 = vmatmul.bf16.gmra.mxu3 %v1223_v16  ;;  %v969_v22 = vadd.f32 %v1771_v10, %v794_v17 }
  0xd2   :  { %746 = vmatmul.bf16.gmra.mxu1 %v1171_v19 }
  0xd3   :  { %835 = vmatmul.bf16.gmra.mxu2 %v1175_v20  ;;  %1001 = vst [vmem:[%s2022_s3 + $0x28] sm:$0xff] %v969_v22 }
  0xd4   :  { %v1879_v25 = vpop.f32.mrf.mxu3 }
  0xd6   :  { %v796_v26 = vpop.f32.mrf.mxu2  ;;  %v620_v28 = vpop.f32.mrf.mxu0 }
  0xd7   :  { %v797_v27 = vadd.f32 %v796_v26, %v708_v24  ;;  %v709_v29 = vpop.f32.mrf.mxu1 }
  0xd8   :  { %v710_v31 = vadd.f32 %v709_v29, %v620_v28 }
  0xd9   :  { %v970_v30 = vadd.f32 %v1771_v10, %v797_v27 }
  0xdb   :  { %1002 = vst [vmem:[%s2022_s3 + $0x30] sm:$0xff] %v970_v30 }
  0xdc   :  { %v1885_v32 = vpop.f32.mrf.mxu3 }
  0xde   :  { %v798_v33 = vpop.f32.mrf.mxu2  ;;  %v623_v36 = vpop.f32.mrf.mxu0 }
  0xdf   :  { %v799_v35 = vadd.f32 %v798_v33, %v710_v31  ;;  %v712_v37 = vpop.f32.mrf.mxu1 }
  0xe0   :  { %v713_v39 = vadd.f32 %v712_v37, %v623_v36 }
  0xe1   :  { %v971_v38 = vadd.f32 %v1771_v10, %v799_v35 }
  0xe3   :  { %1003 = vst [vmem:[%s2022_s3 + $0x38] sm:$0xff] %v971_v38 }
  0xe4   :  { %v1891_v40 = vpop.f32.mrf.mxu3 }
  0xe6   :  { %v801_v41 = vpop.f32.mrf.mxu2  ;;  %v625_v43 = vpop.f32.mrf.mxu0 }
  0xe7   :  { %v802_v42 = vadd.f32 %v801_v41, %v713_v39  ;;  %v714_v44 = vpop.f32.mrf.mxu1 }
  0xe8   :  { %v715_v46 = vadd.f32 %v714_v44, %v625_v43 }
  0xe9   :  { %v972_v45 = vadd.f32 %v1771_v10, %v802_v42  ;;  %v753_v42 = vadd.f32 %v1891_v40, %v1766_v7 }
  0xeb   :  { %1004 = vst [vmem:[%s2022_s3 + $0x40] sm:$0xff] %v972_v45 }
  0xec   :  { %v1897_v47 = vpop.f32.mrf.mxu3 }
  0xee   :  { %v803_v48 = vpop.f32.mrf.mxu2  ;;  %v628_v51 = vpop.f32.mrf.mxu0 }
  0xef   :  { %v804_v50 = vadd.f32 %v803_v48, %v715_v46  ;;  %v717_v52 = vpop.f32.mrf.mxu1 }
  0xf0   :  { %v718_v54 = vadd.f32 %v717_v52, %v628_v51 }
  0xf1   :  { %v973_v53 = vadd.f32 %v1771_v10, %v804_v50 }
  0xf3   :  { %1005 = vst [vmem:[%s2022_s3 + $0x48] sm:$0xff] %v973_v53  ;;  %v755_v53 = vadd.f32 %v1897_v47, %v1801_v23 }
  0xf4   :  { %v1903_v55 = vpop.f32.mrf.mxu3 }
  0xf5   :  { %v758_v47 = vadd.f32 %v1903_v55, %v1807_v34 }
  0xf6   :  { %v806_v56 = vpop.f32.mrf.mxu2  ;;  %v630_v58 = vpop.f32.mrf.mxu0 }
  0xf7   :  { %v807_v57 = vadd.f32 %v806_v56, %v718_v54  ;;  %v719_v59 = vpop.f32.mrf.mxu1 }
  0xf8   :  { %v720_v62 = vadd.f32 %v719_v59, %v630_v58 }
  0xf9   :  { %v974_v61 = vadd.f32 %v1771_v10, %v807_v57 }
  0xfb   :  { %1006 = vst [vmem:[%s2022_s3 + $0x50] sm:$0xff] %v974_v61 }
  0xfc   :  { %v1909_v63 = vpop.f32.mrf.mxu3 }
  0xfd   :  { %v760_v34 = vadd.f32 %v1909_v63, %v1837_v49 }
  0xfe   :  { %v808_v0 = vpop.f32.mrf.mxu2  ;;  %v633_v2 = vpop.f32.mrf.mxu0 }
  0xff   :  { %v809_v1 = vadd.f32 %v808_v0, %v720_v62  ;;  %v722_v3 = vpop.f32.mrf.mxu1 }
 0x100   :  { %v723_v5 = vadd.f32 %v722_v3, %v633_v2 }
 0x101   :  { %v975_v4 = vadd.f32 %v1771_v10, %v809_v1 }
 0x103   :  { %1007 = vst [vmem:[%s2022_s3 + $0x58] sm:$0xff] %v975_v4 }
 0x104   :  { %v1915_v6 = vpop.f32.mrf.mxu3 }
 0x105   :  { %v763_v63 = vadd.f32 %v1915_v6, %v1843_v60 }
 0x106   :  { %v811_v8 = vpop.f32.mrf.mxu2  ;;  %v635_v11 = vpop.f32.mrf.mxu0 }
 0x107   :  { %v812_v9 = vadd.f32 %v811_v8, %v723_v5  ;;  %v724_v12 = vpop.f32.mrf.mxu1 }
 0x108   :  { %v725_v15 = vadd.f32 %v724_v12, %v635_v11 }
 0x109   :  { %v976_v14 = vadd.f32 %v1771_v10, %v812_v9 }
 0x10b   :  { %1008 = vst [vmem:[%s2022_s3 + $0x60] sm:$0xff] %v976_v14 }
 0x10c   :  { %v1921_v16 = vpop.f32.mrf.mxu3 }
 0x10d   :  { %v765_v60 = vadd.f32 %v1921_v16, %v1873_v13 }
 0x10e   :  { %v813_v17 = vpop.f32.mrf.mxu2  ;;  %v638_v19 = vpop.f32.mrf.mxu0 }
 0x10f   :  { %v814_v18 = vadd.f32 %v813_v17, %v725_v15  ;;  %v727_v20 = vpop.f32.mrf.mxu1 }
 0x110   :  { %v728_v22 = vadd.f32 %v727_v20, %v638_v19 }
 0x111   :  { %v977_v21 = vadd.f32 %v1771_v10, %v814_v18 }
 0x113   :  { %1009 = vst [vmem:[%s2022_s3 + $0x68] sm:$0xff] %v977_v21 }
 0x114   :  { %v1927_v24 = vpop.f32.mrf.mxu3 }
 0x115   :  { %v768_v16 = vadd.f32 %v1927_v24, %v1879_v25 }
 0x116   :  { %v816_v26 = vpop.f32.mrf.mxu2  ;;  %v640_v28 = vpop.f32.mrf.mxu0 }
 0x117   :  { %v817_v27 = vadd.f32 %v816_v26, %v728_v22  ;;  %v729_v29 = vpop.f32.mrf.mxu1 }
 0x118   :  { %v730_v31 = vadd.f32 %v729_v29, %v640_v28 }
 0x119   :  { %v978_v30 = vadd.f32 %v1771_v10, %v817_v27 }
 0x11b   :  { %1010 = vst [vmem:[%s2022_s3 + $0x70] sm:$0xff] %v978_v30 }
 0x11c   :  { %v1933_v33 = vpop.f32.mrf.mxu3 }
 0x11d   :  { %v770_v25 = vadd.f32 %v1933_v33, %v1885_v32 }
 0x11e   :  { %v818_v35 = vpop.f32.mrf.mxu2  ;;  %v643_v37 = vpop.f32.mrf.mxu0 }
 0x11f   :  { %v819_v36 = vadd.f32 %v818_v35, %v730_v31  ;;  %v732_v38 = vpop.f32.mrf.mxu1 }
 0x120   :  { %v733_v41 = vadd.f32 %v732_v38, %v643_v37 }
 0x121   :  { %v979_v39 = vadd.f32 %v1771_v10, %v819_v36 }
 0x123   :  { %1011 = vst [vmem:[%s2022_s3 + $0x78] sm:$0xff] %v979_v39 }
 0x124   :  { %v841_v43 = vpop.f32.mrf.mxu3 }
 0x125   :  { %v842_v45 = vadd.f32 %v841_v43, %v753_v42 }
 0x126   :  { %v821_v44 = vpop.f32.mrf.mxu2  ;;  %v645_v48 = vpop.f32.mrf.mxu0 }
 0x127   :  { %v822_v46 = vadd.f32 %v821_v44, %v733_v41  ;;  %v734_v50 = vpop.f32.mrf.mxu1  ;;  %v988_v51 = vadd.f32 %v1771_v10, %v842_v45 }
 0x128   :  { %v735_v7 = vadd.f32 %v734_v50, %v645_v48 }
 0x129   :  { %v980_v52 = vadd.f32 %v1771_v10, %v822_v46  ;;  %1020 = vst [vmem:[%s2022_s3 + $0xc0] sm:$0xff] %v988_v51 }
 0x12b   :  { %1012 = vst [vmem:[%s2022_s3 + $0x80] sm:$0xff] %v980_v52 }
 0x12c   :  { %v843_v40 = vpop.f32.mrf.mxu3 }
 0x12d   :  { %v844_v56 = vadd.f32 %v843_v40, %v755_v53 }
 0x12e   :  { %v823_v54 = vpop.f32.mrf.mxu2  ;;  %v648_v58 = vpop.f32.mrf.mxu0 }
 0x12f   :  { %v824_v57 = vadd.f32 %v823_v54, %v735_v7  ;;  %v737_v59 = vpop.f32.mrf.mxu1  ;;  %v989_v61 = vadd.f32 %v1771_v10, %v844_v56 }
 0x130   :  { %v738_v23 = vadd.f32 %v737_v59, %v648_v58 }
 0x131   :  { %v981_v62 = vadd.f32 %v1771_v10, %v824_v57  ;;  %1021 = vst [vmem:[%s2022_s3 + $0xc8] sm:$0xff] %v989_v61 }
 0x133   :  { %1013 = vst [vmem:[%s2022_s3 + $0x88] sm:$0xff] %v981_v62 }
 0x134   :  { %v846_v0 = vpop.f32.mrf.mxu3 }
 0x135   :  { %v847_v2 = vadd.f32 %v846_v0, %v758_v47 }
 0x136   :  { %v826_v1 = vpop.f32.mrf.mxu2  ;;  %v650_v4 = vpop.f32.mrf.mxu0 }
 0x137   :  { %v827_v3 = vadd.f32 %v826_v1, %v738_v23  ;;  %v739_v5 = vpop.f32.mrf.mxu1  ;;  %v990_v8 = vadd.f32 %v1771_v10, %v847_v2 }
 0x138   :  { %v740_v55 = vadd.f32 %v739_v5, %v650_v4 }
 0x139   :  { %v982_v9 = vadd.f32 %v1771_v10, %v827_v3  ;;  %1022 = vst [vmem:[%s2022_s3 + $0xd0] sm:$0xff] %v990_v8 }
 0x13b   :  { %1014 = vst [vmem:[%s2022_s3 + $0x90] sm:$0xff] %v982_v9 }
 0x13c   :  { %v848_v11 = vpop.f32.mrf.mxu3 }
 0x13d   :  { %v849_v14 = vadd.f32 %v848_v11, %v760_v34 }
 0x13e   :  { %v828_v12 = vpop.f32.mrf.mxu2  ;;  %v653_v17 = vpop.f32.mrf.mxu0 }
 0x13f   :  { %v829_v15 = vadd.f32 %v828_v12, %v740_v55  ;;  %v742_v18 = vpop.f32.mrf.mxu1  ;;  %v991_v19 = vadd.f32 %v1771_v10, %v849_v14 }
 0x140   :  { %v743_v49 = vadd.f32 %v742_v18, %v653_v17 }
 0x141   :  { %v983_v20 = vadd.f32 %v1771_v10, %v829_v15  ;;  %1023 = vst [vmem:[%s2022_s3 + $0xd8] sm:$0xff] %v991_v19 }
 0x143   :  { %1015 = vst [vmem:[%s2022_s3 + $0x98] sm:$0xff] %v983_v20 }
 0x144   :  { %v851_v21 = vpop.f32.mrf.mxu3 }
 0x145   :  { %v852_v26 = vadd.f32 %v851_v21, %v763_v63 }
 0x146   :  { %v831_v22 = vpop.f32.mrf.mxu2  ;;  %v655_v28 = vpop.f32.mrf.mxu0 }
 0x147   :  { %v832_v27 = vadd.f32 %v831_v22, %v743_v49  ;;  %v744_v29 = vpop.f32.mrf.mxu1  ;;  %v992_v30 = vadd.f32 %v1771_v10, %v852_v26 }
 0x148   :  { %v745_v6 = vadd.f32 %v744_v29, %v655_v28 }
 0x149   :  { %v984_v31 = vadd.f32 %v1771_v10, %v832_v27  ;;  %1024 = vst [vmem:[%s2022_s3 + $0xe0] sm:$0xff] %v992_v30 }
 0x14b   :  { %1016 = vst [vmem:[%s2022_s3 + $0xa0] sm:$0xff] %v984_v31 }
 0x14c   :  { %v853_v35 = vpop.f32.mrf.mxu3 }
 0x14d   :  { %v854_v37 = vadd.f32 %v853_v35, %v765_v60 }
 0x14e   :  { %v833_v36 = vpop.f32.mrf.mxu2  ;;  %v658_v39 = vpop.f32.mrf.mxu0 }
 0x14f   :  { %v834_v38 = vadd.f32 %v833_v36, %v745_v6  ;;  %v747_v41 = vpop.f32.mrf.mxu1  ;;  %v993_v42 = vadd.f32 %v1771_v10, %v854_v37 }
 0x150   :  { %v748_v13 = vadd.f32 %v747_v41, %v658_v39 }
 0x151   :  { %v985_v43 = vadd.f32 %v1771_v10, %v834_v38  ;;  %1025 = vst [vmem:[%s2022_s3 + $0xe8] sm:$0xff] %v993_v42 }
 0x153   :  { %1017 = vst [vmem:[%s2022_s3 + $0xa8] sm:$0xff] %v985_v43 }
 0x154   :  { %v856_v44 = vpop.f32.mrf.mxu3 }
 0x155   :  { %v857_v46 = vadd.f32 %v856_v44, %v768_v16 }
 0x156   :  { %v836_v45 = vpop.f32.mrf.mxu2  ;;  %v660_v51 = vpop.f32.mrf.mxu0 }
 0x157   :  { %v837_v48 = vadd.f32 %v836_v45, %v748_v13  ;;  %v994_v50 = vadd.f32 %v1771_v10, %v857_v46  ;;  %v749_v52 = vpop.f32.mrf.mxu1 }
 0x158   :  { %v750_v24 = vadd.f32 %v749_v52, %v660_v51 }
 0x159   :  { %v986_v53 = vadd.f32 %v1771_v10, %v837_v48  ;;  %1026 = vst [vmem:[%s2022_s3 + $0xf0] sm:$0xff] %v994_v50 }
 0x15b   :  { %1018 = vst [vmem:[%s2022_s3 + $0xb0] sm:$0xff] %v986_v53 }
 0x15c   :  { %v858_v7 = vpop.f32.mrf.mxu3 }
 0x15d   :  { %v859_v54 = vadd.f32 %v858_v7, %v770_v25 }
 0x15e   :  { %v838_v40 = vpop.f32.mrf.mxu2 }
 0x15f   :  { %v839_v56 = vadd.f32 %v838_v40, %v750_v24  ;;  %v995_v57 = vadd.f32 %v1771_v10, %v859_v54 }
 0x161   :  { %v987_v58 = vadd.f32 %v1771_v10, %v839_v56  ;;  %1027 = vst [vmem:[%s2022_s3 + $0xf8] sm:$0xff] %v995_v57 }
 0x163   :  { %1019 = vst [vmem:[%s2022_s3 + $0xb8] sm:$0xff] %v987_v58 }

// kernel: alexnet_forward.11
= control target key start
LH: loop header
LB: loop body
LE: loop exit
PB: predicated region body
PF: predicated region fallthrough
CT: control target
= control target key end

     0   :  { %s405_s6 = smov 0   ;;  %s407_s7 = smov 0   ;;  %s522_s0 = inlined_call_operand.vmem [shape: f32[56,128], index: 0, kind: input, shape index: {}]   ;;  %s523_s1 = inlined_call_operand.vmem [shape: f32[56,128], index: 1, kind: output, shape index: {}]  }
   0x1   :  { %s409_s8 = smov 0  }
   0x2 LB: > { %s23_s9 = sadd.s32 1, %s388_s7  ;;  %p330_p0 = scmp.ge.s32.totalorder %s392_s8, 1  ;;  %s392_s8 = sphi %s409_s8, %s11_s8   ;;  %s388_s7 = sphi %s407_s7, %s525_s7   ;;  %s384_s6 = sphi %s405_s6, %s524_s6  }
   0x3   : > { %p25_p1 = scmp.ge.s32.totalorder %s23_s9, 2  ;;  %p102_p2 = scmp.lt.s32.totalorder %s392_s8, 3 }
   0x5   : > { %s527_s9 = smov (%p25_p1, %s23_s9), 0  ;;  %p103_p3 = pnand %p330_p0, %p102_p2 }
   0x6   : > { %p137_p4 = scmp.eq.s32.totalorder (!%p103_p3), %s384_s6, 0 }
   0x7   : > { %106 = sbr.rel (%p103_p3) target bundleno = 104 (0x68), region = 24 }
   0xc   : > { %142 = sbr.rel (!%p137_p4) target bundleno = 17 (0x11), region = 28  ;;  %v394_v0 = vmov (%p137_p4), 0.0  }
   0xd   : > { %143 = vst [vmem:[#allocation2] sm:$0x1] (%p137_p4), %v394_v0 }
   0xe   : > { %144 = vst [vmem:[#allocation3] sm:$0x1] (%p137_p4), %v394_v0 }
  0x11 PF: > { %v145_v1 = vld [vmem:[%s522_s0] sm:$0xff]  ;;  %v146_v2 = vld [vmem:[%s522_s0 + $0x8] sm:$0xff]  ;;  %v147_v3 = vld [vmem:[%s522_s0 + $0x10] sm:$0xff]  ;;  %p332_p5 = scmp.ne.s32.totalorder %s384_s6, 0 }
  0x12   : > { %v148_v4 = vld [vmem:[%s522_s0 + $0x18] sm:$0xff]  ;;  %v149_v5 = vld [vmem:[%s522_s0 + $0x20] sm:$0xff]  ;;  %v150_v6 = vld [vmem:[%s522_s0 + $0x28] sm:$0xff]  ;;  %v444_v7 = vmax.f32 %v145_v1, 0.0  ;;  %v446_v8 = vmax.f32 %v146_v2, 0.0  ;;  %v448_v9 = vmax.f32 %v147_v3, 0.0 }
  0x13   : > { %v151_v10 = vld [vmem:[%s522_s0 + $0x30] sm:$0xff]  ;;  %v453_v11 = vmax.f32 %v148_v4, 0.0  ;;  %v455_v12 = vmax.f32 %v149_v5, 0.0  ;;  %v457_v13 = vmax.f32 %v150_v6, 0.0  ;;  %161 = sbr.rel (%p332_p5) target bundleno = 53 (0x35), region = 32 }
  0x14   : > { %v459_v14 = vmax.f32 %v151_v10, 0.0 }
  0x18   : > { %v163_v15 = vadd.f32 %v446_v8, %v444_v7  ;;  %v178_v16 = vmul.f32 %v444_v7, %v444_v7  ;;  %v179_v17 = vmul.f32 %v446_v8, %v446_v8  ;;  %v180_v18 = vmul.f32 %v448_v9, %v448_v9  ;;  %v162_v43 = vld [vmem:[#allocation2] sm:$0x1]  ;;  %v177_v46 = vld [vmem:[#allocation3] sm:$0x1] }
  0x19   : > { %v181_v20 = vmul.f32 %v453_v11, %v453_v11  ;;  %v182_v23 = vmul.f32 %v455_v12, %v455_v12  ;;  %v183_v26 = vmul.f32 %v457_v13, %v457_v13  ;;  %v184_v29 = vmul.f32 %v459_v14, %v459_v14 }
  0x1a   : > { %v164_v19 = vadd.f32 %v163_v15, %v448_v9  ;;  %v185_v21 = vadd.f32 %v179_v17, %v178_v16 }
  0x1c   : > { %v165_v22 = vadd.f32 %v164_v19, %v453_v11  ;;  %v186_v24 = vadd.f32 %v185_v21, %v180_v18 }
  0x1e   : > { %v166_v25 = vadd.f32 %v165_v22, %v455_v12  ;;  %v187_v27 = vadd.f32 %v186_v24, %v181_v20 }
  0x20   : > { %v167_v28 = vadd.f32 %v166_v25, %v457_v13  ;;  %v188_v30 = vadd.f32 %v187_v27, %v182_v23 }
  0x22   : > { %v168_v31 = vadd.f32 %v167_v28, %v459_v14  ;;  %v189_v32 = vadd.f32 %v188_v30, %v183_v26 }
  0x24   : > { %v169_v33 = vrot.slane %v168_v31, 4  ;;  %v190_v34 = vadd.f32 %v189_v32, %v184_v29 }
  0x26   : > { %v170_v35 = vadd.f32 %v169_v33, %v168_v31  ;;  %v191_v36 = vrot.slane %v190_v34, 4 }
  0x28   : > { %v171_v37 = vrot.slane %v170_v35, 2  ;;  %v192_v38 = vadd.f32 %v191_v36, %v190_v34 }
  0x2a   : > { %v172_v39 = vadd.f32 %v171_v37, %v170_v35  ;;  %v193_v40 = vrot.slane %v192_v38, 2 }
  0x2c   : > { %v173_v41 = vrot.slane %v172_v39, 1  ;;  %v194_v42 = vadd.f32 %v193_v40, %v192_v38 }
  0x2e   : > { %v174_v44 = vadd.f32 %v173_v41, %v172_v39  ;;  %v195_v45 = vrot.slane %v194_v42, 1 }
  0x30   : > { %v175_v47 = vadd.f32 %v174_v44, %v162_v43  ;;  %v196_v48 = vadd.f32 %v195_v45, %v194_v42 }
  0x32   : > { %176 = vst [vmem:[#allocation2] sm:$0x1] %v175_v47  ;;  %v197_v49 = vadd.f32 %v196_v48, %v177_v46 }
  0x34   : > { %198 = vst [vmem:[#allocation3] sm:$0x1] %v197_v49 }
  0x35 PF: > { %p199_p6 = scmp.eq.s32.totalorder %s384_s6, 1 }
  0x37   : > { %203 = sbr.rel (!%p199_p6) target bundleno = 85 (0x55), region = 36 }
  0x39   : > { %v204_v50 = vld [vmem:[#allocation2] sm:$0x1] (%p199_p6) }
  0x3a   : > { %v205_v52 = vmul.f32 (%p199_p6), 0.02, %v204_v50 }
  0x3b   : > { %v206_v51 = vld [vmem:[#allocation3] sm:$0x1] (%p199_p6) }
  0x3c   : > { %v207_v53 = vmul.f32 0.02, %v206_v51  ;;  %v208_v54 = vmul.f32 %v205_v52, %v205_v52  ;;  %210 = vst [vmem:[#allocation2] sm:$0x1] %v205_v52 }
  0x3e   : > { %v209_v55 = vsub.f32 %v207_v53, %v208_v54 }
  0x40   : > { %v211_v56 = vadd.f32 1e-05, %v209_v55 }
  0x42   : > { %366 = vrsqrt.f32 %v211_v56  ;;  %vm218_vm0 = vweird.f32 %v211_v56 }
  0x48   : > { %v367_v57 = vpop.eup %366 }
  0x49   : > { %v213_v58 = vmul.f32 %v367_v57, %v211_v56  ;;  %vm219_vm1 = vweird.f32 %v367_v57 }
  0x4a   : > { %vm220_vm2 = vmor %vm218_vm0, %vm219_vm1 }
  0x4b   : > { %v214_v59 = vmul.f32 %v367_v57, %v213_v58 }
  0x4d   : > { %v215_v60 = vmul.f32 0.5, %v214_v59 }
  0x4f   : > { %v216_v61 = vsub.f32 1.5, %v215_v60 }
  0x51   : > { %v217_v62 = vmul.f32 %v367_v57, %v216_v61 }
  0x53   : > { %v221_v63 = vsel %vm220_vm2, %v367_v57, %v217_v62 }
  0x54   : > { %222 = vst [vmem:[#allocation3] sm:$0x1] %v221_v63 }
  0x55 PF: > { %p334_p7 = scmp.ne.s32.totalorder %s384_s6, 1 }
  0x57   : > { %225 = sbr.rel (%p334_p7) target bundleno = 104 (0x68), region = 40 }
  0x5c   : > { %v368_v0 = vld [vmem:[#allocation2] ss:$0 sm:$0xff]  ;;  %v369_v1 = vld [vmem:[#allocation3] ss:$0 sm:$0xff] }
  0x5d   : > { %v230_v2 = vsub.f32 %v444_v7, %v368_v0  ;;  %v231_v3 = vsub.f32 %v446_v8, %v368_v0  ;;  %v232_v4 = vsub.f32 %v448_v9, %v368_v0  ;;  %v233_v5 = vsub.f32 %v453_v11, %v368_v0 }
  0x5e   : > { %v234_v6 = vsub.f32 %v455_v12, %v368_v0  ;;  %v235_v10 = vsub.f32 %v457_v13, %v368_v0  ;;  %v236_v18 = vsub.f32 %v459_v14, %v368_v0 }
  0x5f   : > { %v241_v15 = vmul.f32 %v369_v1, %v230_v2  ;;  %v242_v16 = vmul.f32 %v369_v1, %v231_v3  ;;  %v243_v17 = vmul.f32 %v369_v1, %v232_v4  ;;  %v244_v19 = vmul.f32 %v369_v1, %v233_v5 }
  0x60   : > { %v245_v7 = vmul.f32 %v369_v1, %v234_v6  ;;  %v246_v8 = vmul.f32 %v369_v1, %v235_v10  ;;  %v247_v9 = vmul.f32 %v369_v1, %v236_v18 }
  0x61   : > { %248 = vst [vmem:[%s523_s1] sm:$0xff] %v241_v15 }
  0x62   : > { %249 = vst [vmem:[%s523_s1 + $0x8] sm:$0xff] %v242_v16 }
  0x63   : > { %250 = vst [vmem:[%s523_s1 + $0x10] sm:$0xff] %v243_v17 }
  0x64   : > { %251 = vst [vmem:[%s523_s1 + $0x18] sm:$0xff] %v244_v19 }
  0x65   : > { %252 = vst [vmem:[%s523_s1 + $0x20] sm:$0xff] %v245_v7 }
  0x66   : > { %253 = vst [vmem:[%s523_s1 + $0x28] sm:$0xff] %v246_v8 }
  0x67   : > { %254 = vst [vmem:[%s523_s1 + $0x30] sm:$0xff] %v247_v9 }
  0x68 PF: > { %s11_s8 = sadd.s32 1, %s392_s8   ;;  %s524_s6 = smov %s388_s7 }
  0x69   : > { %p8_p8 = scmp.ge.s32.totalorder %s11_s8, 4   ;;  %s525_s7 = smov %s527_s9 }
  0x6b   :  { %10 = sbr.rel (!%p8_p8) target bundleno = 2 (0x2), region = 70 }

// kernel: alexnet_forward.12
= control target key start
LH: loop header
LB: loop body
LE: loop exit
PB: predicated region body
PF: predicated region fallthrough
CT: control target
= control target key end

     0   :  { %s1564_s12 = smov 0   ;;  %s1566_s13 = smov 0   ;;  %s1930_s0 = inlined_call_operand.vmem [shape: bf16[32,2560], index: 0, kind: input, shape index: {}]   ;;  %s1931_s1 = inlined_call_operand.vmem [shape: bf16[2560,256], index: 1, kind: input, shape index: {}]   ;;  %s1932_s2 = inlined_call_operand.vmem [shape: f32[1,256], index: 2, kind: input, shape index: {}]   ;;  %s1933_s3 = inlined_call_operand.vmem [shape: f32[32,256], index: 3, kind: output, shape index: {}]  }
   0x1   :  { %s1568_s14 = smov 0   ;;  %s1570_s15 = smov 0  }
   0x2   :  { %s1572_s16 = smov 0  }
   0x3 LB: > { %s25_s17 = sadd.s32 1, %s1537_s15  ;;  %p48_p1 = scmp.ne.s32.totalorder %s1529_s13, %s1525_s12  ;;  %s1541_s16 = sphi %s1572_s16, %s13_s16   ;;  %s1537_s15 = sphi %s1570_s15, %s1937_s15   ;;  %s1533_s14 = sphi %s1568_s14, %s1936_s14   ;;  %s1529_s13 = sphi %s1566_s13, %s1935_s13   ;;  %s1525_s12 = sphi %s1564_s12, %s1934_s12  }
   0x4   : > { %p26_p0 = scmp.ge.s32.totalorder %s25_s17, 5  ;;  %p49_p2 = scmp.eq.s32.totalorder %s1541_s16, 0 }
   0x5   : > { %s41_s19 = sadd.s32 1, %s1529_s13  ;;  %p1085_p5 = scmp.ge.s32.totalorder %s1541_s16, 5 }
   0x6   : > { %s1939_s17 = smov (%p26_p0, %s25_s17), 0  ;;  %p50_p3 = por %p49_p2, %p48_p1 }
   0x7   : > { %s37_s18 = ssub.s32 %s1537_s15, %s1939_s17  ;;  %164 = sbr.rel (%p1085_p5) target bundleno = 24 (0x18), region = 20 }
   0x8   : > { %p39_p4 = scmp.eq.s32.totalorder %s37_s18, 0 }
   0xa   : > { %s1599_s20 = scalar_select %p39_p4, %s1529_s13, %s41_s19  }
   0xc   : > { %167 = sbr.rel (!%p50_p3) target bundleno = 24 (0x18), region = 24  ;;  %s169_s21 = sand.u32 (%p50_p3), 1, %s1529_s13  }
   0xd   : > { %s1388_s22 = sshll.u32 (%p50_p3), %s1537_s15, 4  ;;  %s1086_s23 = sshll.u32 (%p50_p3), %s169_s21, 6 }
   0xe   : > { %s177_s26 = scalar_lea.vmem (%p50_p3), %s1930_s0, %s1388_s22  ;;  %s171_s27 = scalar_lea.vmem (%p50_p3), [#allocation2], %s1086_s23 }
   0xf   : > { %v190_v0 = vld [vmem:[%s177_s26] sm:$0xff] (%p50_p3)  ;;  %v192_v1 = vld [vmem:[%s177_s26 + $0x8] sm:$0xff] (%p50_p3)  ;;  %v194_v2 = vld [vmem:[%s177_s26 + $0x50] sm:$0xff] (%p50_p3) }
  0x10   : > { %191 = vst [vmem:[%s171_s27] sm:$0xff] (%p50_p3), %v190_v0  ;;  %v196_v3 = vld [vmem:[%s177_s26 + $0x58] sm:$0xff] (%p50_p3)  ;;  %v198_v4 = vld [vmem:[%s177_s26 + $0xa0] sm:$0xff] (%p50_p3)  ;;  %v200_v5 = vld [vmem:[%s177_s26 + $0xa8] sm:$0xff] (%p50_p3) }
  0x11   : > { %193 = vst [vmem:[%s171_s27 + $0x8] sm:$0xff] %v192_v1  ;;  %v202_v6 = vld [vmem:[%s177_s26 + $0xf0] sm:$0xff]  ;;  %v204_v7 = vld [vmem:[%s177_s26 + $0xf8] sm:$0xff] }
  0x12   : > { %195 = vst [vmem:[%s171_s27 + $0x10] sm:$0xff] %v194_v2 }
  0x13   : > { %197 = vst [vmem:[%s171_s27 + $0x18] sm:$0xff] %v196_v3 }
  0x14   : > { %199 = vst [vmem:[%s171_s27 + $0x20] sm:$0xff] %v198_v4 }
  0x15   : > { %201 = vst [vmem:[%s171_s27 + $0x28] sm:$0xff] %v200_v5 }
  0x16   : > { %203 = vst [vmem:[%s171_s27 + $0x30] sm:$0xff] %v202_v6 }
  0x17   : > { %205 = vst [vmem:[%s171_s27 + $0x38] sm:$0xff] %v204_v7 }
  0x18 PF: > { %p1089_p6 = scmp.ge.s32.totalorder %s1541_s16, 1  ;;  %p225_p7 = scmp.lt.s32.totalorder %s1541_s16, 6 }
  0x1a   : > { %p226_p8 = pnand %p1089_p6, %p225_p7 }
  0x1b   : > { %s232_s28 = sand.u32 (!%p226_p8), 1, %s1525_s12   ;;  %s1091_s29 = sshll.u32 (!%p226_p8), %s1533_s14, 6 }
  0x1c   : > { %229 = sbr.rel (%p226_p8) target bundleno = 292 (0x124), region = 51  ;;  %s1090_s30 = sshll.u32 (!%p226_p8), %s232_s28, 6 }
  0x1d   : > { %p278_p9 = scmp.lt.s32.totalorder (!%p226_p8), %s1091_s29, 319  ;;  %s1616_s8 = scalar_lea.vmem (!%p226_p8), [#allocation2], %s1090_s30 }
  0x1e   : > { %p1094_p10 = scmp.ne.s32.totalorder (!%p226_p8), %s1533_s14, 0 }
  0x21   : > { %s1941_s29 = smov (!%p278_p9, %s1091_s29), 319  ;;  %308 = sbr.rel (%p1094_p10) target bundleno = 47 (0x2f), region = 59 }
  0x22   : > { %s1389_s4 = sshll.u32 %s1941_s29, 3 }
  0x23   : > { %s1614_s7 = scalar_lea.vmem %s1931_s1, %s1389_s4 }
  0x26   : > { %v1543_v8 = vmov 0.0  }
  0x27   : > { %309 = vst [vmem:[%s1933_s3] sm:$0xff] %v1543_v8 }
  0x28   : > { %310 = vst [vmem:[%s1933_s3 + $0x8] sm:$0xff] %v1543_v8 }
  0x29   : > { %311 = vst [vmem:[%s1933_s3 + $0x10] sm:$0xff] %v1543_v8 }
  0x2a   : > { %312 = vst [vmem:[%s1933_s3 + $0x18] sm:$0xff] %v1543_v8 }
  0x2b   : > { %313 = vst [vmem:[%s1933_s3 + $0x20] sm:$0xff] %v1543_v8 }
  0x2c   : > { %314 = vst [vmem:[%s1933_s3 + $0x28] sm:$0xff] %v1543_v8 }
  0x2d   : > { %315 = vst [vmem:[%s1933_s3 + $0x30] sm:$0xff] %v1543_v8 }
  0x2e   : > { %316 = vst [vmem:[%s1933_s3 + $0x38] sm:$0xff] %v1543_v8 }
  0x2f PF: > { %v1185_v9 = vld [vmem:[%s1614_s7 + $0x70] sm:$0xf]  ;;  %v1413_v10 = vld [vmem:[%s1614_s7 + $0x74] sm:$0xf0]  ;;  %v1177_v20 = vld [vmem:[%s1614_s7 + $0x60] sm:$0xf] }
  0x30   : > { %v1249_v11 = vld [vmem:[%s1614_s7 + $0xf0] sm:$0xf]  ;;  %v1186_v12 = vor.u32 %v1413_v10, %v1185_v9  ;;  %v1429_v13 = vld [vmem:[%s1614_s7 + $0xf4] sm:$0xf0]  ;;  %v1411_v22 = vld [vmem:[%s1614_s7 + $0x64] sm:$0xf0] }
  0x31   : > { %v1313_v14 = vld [vmem:[%s1614_s7 + $0x170] sm:$0xf]  ;;  %v1445_v15 = vld [vmem:[%s1614_s7 + $0x174] sm:$0xf0]  ;;  %v1250_v16 = vor.u32 %v1429_v13, %v1249_v11  ;;  %v1241_v23 = vld [vmem:[%s1614_s7 + $0xe0] sm:$0xf]  ;;  %v1178_v25 = vor.u32 %v1411_v22, %v1177_v20 }
  0x32   : > { %v1314_v17 = vor.u32 %v1445_v15, %v1313_v14  ;;  %v1377_v18 = vld [vmem:[%s1614_s7 + $0x1f0] sm:$0xf]  ;;  %v1461_v19 = vld [vmem:[%s1614_s7 + $0x1f4] sm:$0xf0]  ;;  %757 = vmatpush.bf16.msra.mxu0 %v1186_v12  ;;  %v1427_v24 = vld [vmem:[%s1614_s7 + $0xe4] sm:$0xf0] }
  0x33   : > { %v1378_v21 = vor.u32 %v1461_v19, %v1377_v18  ;;  %776 = vmatpush.bf16.msra.mxu1 %v1250_v16  ;;  %v1242_v26 = vor.u32 %v1427_v24, %v1241_v23  ;;  %v1305_v27 = vld [vmem:[%s1614_s7 + $0x160] sm:$0xf]  ;;  %v1443_v28 = vld [vmem:[%s1614_s7 + $0x164] sm:$0xf0]  ;;  %v1169_v32 = vld [vmem:[%s1614_s7 + $0x50] sm:$0xf] }
  0x34   : > { %795 = vmatpush.bf16.msra.mxu2 %v1314_v17  ;;  %v1369_v29 = vld [vmem:[%s1614_s7 + $0x1e0] sm:$0xf]  ;;  %v1306_v30 = vor.u32 %v1443_v28, %v1305_v27  ;;  %v1459_v31 = vld [vmem:[%s1614_s7 + $0x1e4] sm:$0xf0]  ;;  %v1409_v33 = vld [vmem:[%s1614_s7 + $0x54] sm:$0xf0] }
  0x35   : > { %814 = vmatpush.bf16.msra.mxu3 %v1378_v21  ;;  %v1370_v34 = vor.u32 %v1459_v31, %v1369_v29  ;;  %v1233_v35 = vld [vmem:[%s1614_s7 + $0xd0] sm:$0xf]  ;;  %v1425_v36 = vld [vmem:[%s1614_s7 + $0xd4] sm:$0xf0]  ;;  %v1170_v38 = vor.u32 %v1409_v33, %v1169_v32  ;;  %v1161_v44 = vld [vmem:[%s1614_s7 + $0x40] sm:$0xf] }
  0x36   : > { %v1297_v37 = vld [vmem:[%s1614_s7 + $0x150] sm:$0xf]  ;;  %758 = vmatpush.bf16.msra.mxu0 %v1178_v25  ;;  %v1441_v39 = vld [vmem:[%s1614_s7 + $0x154] sm:$0xf0]  ;;  %v1234_v42 = vor.u32 %v1425_v36, %v1233_v35  ;;  %v1407_v45 = vld [vmem:[%s1614_s7 + $0x44] sm:$0xf0] }
  0x37   : > { %v1361_v40 = vld [vmem:[%s1614_s7 + $0x1d0] sm:$0xf]  ;;  %v1457_v41 = vld [vmem:[%s1614_s7 + $0x1d4] sm:$0xf0]  ;;  %777 = vmatpush.bf16.msra.mxu1 %v1242_v26  ;;  %v1298_v43 = vor.u32 %v1441_v39, %v1297_v37  ;;  %v1225_v46 = vld [vmem:[%s1614_s7 + $0xc0] sm:$0xf]  ;;  %v1162_v53 = vor.u32 %v1407_v45, %v1161_v44 }
  0x38   : > { %796 = vmatpush.bf16.msra.mxu2 %v1306_v30  ;;  %v1362_v47 = vor.u32 %v1457_v41, %v1361_v40  ;;  %v1423_v48 = vld [vmem:[%s1614_s7 + $0xc4] sm:$0xf0]  ;;  %v1289_v49 = vld [vmem:[%s1614_s7 + $0x140] sm:$0xf]  ;;  %v1153_v56 = vld [vmem:[%s1614_s7 + $0x30] sm:$0xf] }
  0x39   : > { %815 = vmatpush.bf16.msra.mxu3 %v1370_v34  ;;  %v1439_v50 = vld [vmem:[%s1614_s7 + $0x144] sm:$0xf0]  ;;  %v1353_v51 = vld [vmem:[%s1614_s7 + $0x1c0] sm:$0xf]  ;;  %v1226_v54 = vor.u32 %v1423_v48, %v1225_v46  ;;  %v1405_v57 = vld [vmem:[%s1614_s7 + $0x34] sm:$0xf0] }
  0x3a   : > { %v1455_v52 = vld [vmem:[%s1614_s7 + $0x1c4] sm:$0xf0]  ;;  %759 = vmatpush.bf16.msra.mxu0 %v1170_v38  ;;  %v1290_v55 = vor.u32 %v1439_v50, %v1289_v49  ;;  %v1217_v58 = vld [vmem:[%s1614_s7 + $0xb0] sm:$0xf]  ;;  %v1421_v60 = vld [vmem:[%s1614_s7 + $0xb4] sm:$0xf0]  ;;  %v1154_v1 = vor.u32 %v1405_v57, %v1153_v56 }
  0x3b   : > { %778 = vmatpush.bf16.msra.mxu1 %v1234_v42  ;;  %v1354_v59 = vor.u32 %v1455_v52, %v1353_v51  ;;  %v1281_v61 = vld [vmem:[%s1614_s7 + $0x130] sm:$0xf]  ;;  %v1437_v62 = vld [vmem:[%s1614_s7 + $0x134] sm:$0xf0]  ;;  %v1218_v2 = vor.u32 %v1421_v60, %v1217_v58  ;;  %v1145_v4 = vld [vmem:[%s1614_s7 + $0x20] sm:$0xf] }
  0x3c   : > { %797 = vmatpush.bf16.msra.mxu2 %v1298_v43  ;;  %v1345_v63 = vld [vmem:[%s1614_s7 + $0x1b0] sm:$0xf]  ;;  %v1453_v0 = vld [vmem:[%s1614_s7 + $0x1b4] sm:$0xf0]  ;;  %v1282_v3 = vor.u32 %v1437_v62, %v1281_v61  ;;  %v1403_v5 = vld [vmem:[%s1614_s7 + $0x24] sm:$0xf0] }
  0x3d   : > { %816 = vmatpush.bf16.msra.mxu3 %v1362_v47  ;;  %v1209_v6 = vld [vmem:[%s1614_s7 + $0xa0] sm:$0xf]  ;;  %v1346_v7 = vor.u32 %v1453_v0, %v1345_v63  ;;  %v1419_v8 = vld [vmem:[%s1614_s7 + $0xa4] sm:$0xf0]  ;;  %v1146_v13 = vor.u32 %v1403_v5, %v1145_v4  ;;  %v1137_v16 = vld [vmem:[%s1614_s7 + $0x10] sm:$0xf] }
  0x3e   : > { %760 = vmatpush.bf16.msra.mxu0 %v1162_v53  ;;  %v1273_v9 = vld [vmem:[%s1614_s7 + $0x120] sm:$0xf]  ;;  %v1435_v10 = vld [vmem:[%s1614_s7 + $0x124] sm:$0xf0]  ;;  %v1210_v14 = vor.u32 %v1419_v8, %v1209_v6  ;;  %v1401_v17 = vld [vmem:[%s1614_s7 + $0x14] sm:$0xf0] }
  0x3f   : > { %779 = vmatpush.bf16.msra.mxu1 %v1226_v54  ;;  %v1337_v11 = vld [vmem:[%s1614_s7 + $0x1a0] sm:$0xf]  ;;  %v1451_v12 = vld [vmem:[%s1614_s7 + $0x1a4] sm:$0xf0]  ;;  %v1274_v15 = vor.u32 %v1435_v10, %v1273_v9  ;;  %v1201_v18 = vld [vmem:[%s1614_s7 + $0x90] sm:$0xf]  ;;  %v1138_v26 = vor.u32 %v1401_v17, %v1137_v16 }
  0x40   : > { %798 = vmatpush.bf16.msra.mxu2 %v1290_v55  ;;  %v1338_v19 = vor.u32 %v1451_v12, %v1337_v11  ;;  %v1417_v20 = vld [vmem:[%s1614_s7 + $0x94] sm:$0xf0]  ;;  %v1265_v21 = vld [vmem:[%s1614_s7 + $0x110] sm:$0xf]  ;;  %v1129_v25 = vld [vmem:[%s1614_s7] sm:$0xf] }
  0x41   : > { %817 = vmatpush.bf16.msra.mxu3 %v1354_v59  ;;  %v1433_v22 = vld [vmem:[%s1614_s7 + $0x114] sm:$0xf0]  ;;  %v1329_v23 = vld [vmem:[%s1614_s7 + $0x190] sm:$0xf]  ;;  %v1399_v27 = vld [vmem:[%s1614_s7 + $0x4] sm:$0xf0]  ;;  %v1202_v30 = vor.u32 %v1417_v20, %v1201_v18 }
  0x42   : > { %761 = vmatpush.bf16.msra.mxu0 %v1154_v1  ;;  %v1449_v24 = vld [vmem:[%s1614_s7 + $0x194] sm:$0xf0]  ;;  %v1193_v28 = vld [vmem:[%s1614_s7 + $0x80] sm:$0xf]  ;;  %v1415_v29 = vld [vmem:[%s1614_s7 + $0x84] sm:$0xf0]  ;;  %v1266_v31 = vor.u32 %v1433_v22, %v1265_v21  ;;  %v1130_v43 = vor.u32 %v1399_v27, %v1129_v25 }
  0x43   : > { %780 = vmatpush.bf16.msra.mxu1 %v1218_v2  ;;  %v1257_v32 = vld [vmem:[%s1614_s7 + $0x100] sm:$0xf]  ;;  %v1431_v33 = vld [vmem:[%s1614_s7 + $0x104] sm:$0xf0]  ;;  %v1330_v35 = vor.u32 %v1449_v24, %v1329_v23  ;;  %v1392_v38 = vld [vmem:[%s1616_s8 + $0xc] sm:$0xf0]  ;;  %v1194_v47 = vor.u32 %v1415_v29, %v1193_v28 }
  0x44   : > { %799 = vmatpush.bf16.msra.mxu2 %v1282_v3  ;;  %v1321_v34 = vld [vmem:[%s1614_s7 + $0x180] sm:$0xf]  ;;  %v1447_v36 = vld [vmem:[%s1614_s7 + $0x184] sm:$0xf0]  ;;  %v1390_v39 = vld [vmem:[%s1616_s8 + $0x4] sm:$0xf]  ;;  %v1258_v48 = vor.u32 %v1431_v33, %v1257_v32 }
  0x45   : > { %818 = vmatpush.bf16.msra.mxu3 %v1346_v7  ;;  %v1097_v37 = vld [vmem:[%s1616_s8] sm:$0xf]  ;;  %v1099_v40 = vld [vmem:[%s1616_s8 + $0x10] sm:$0xf0]  ;;  %v1315_v42 = vld [vmem:[%s1614_s7 + $0x178] sm:$0xf0]  ;;  %v1322_v52 = vor.u32 %v1447_v36, %v1321_v34 }
  0x46   : > { %762 = vmatpush.bf16.msra.mxu0 %v1146_v13  ;;  %v1444_v41 = vld [vmem:[%s1614_s7 + $0x174] sm:$0xf]  ;;  %v1105_v44 = vld [vmem:[%s1616_s8 + $0x8] sm:$0xf]  ;;  %v1251_v46 = vld [vmem:[%s1614_s7 + $0xf8] sm:$0xf0]  ;;  %v1722_v57 = vor.u32 %v1392_v38, %v1097_v37  ;;  %v1727_v62 = vor.u32 %v1390_v39, %v1099_v40 }
  0x47   : > { %781 = vmatpush.bf16.msra.mxu1 %v1210_v14  ;;  %v1428_v45 = vld [vmem:[%s1614_s7 + $0xf4] sm:$0xf]  ;;  %v1393_v49 = vld [vmem:[%s1616_s8 + $0x14] sm:$0xf0]  ;;  %v1391_v50 = vld [vmem:[%s1616_s8 + $0xc] sm:$0xf]  ;;  %v1318_v53 = vor.u32 %v1444_v41, %v1315_v42 }
  0x48   : > { %800 = vmatpush.bf16.msra.mxu2 %v1274_v15  ;;  %v1107_v51 = vld [vmem:[%s1616_s8 + $0x18] sm:$0xf0]  ;;  %v1412_v54 = vld [vmem:[%s1614_s7 + $0x74] sm:$0xf]  ;;  %v1254_v58 = vor.u32 %v1428_v45, %v1251_v46  ;;  %v1442_v60 = vld [vmem:[%s1614_s7 + $0x164] sm:$0xf]  ;;  %v1729_v63 = vor.u32 %v1393_v49, %v1105_v44 }
  0x49   : > { %819 = vmatpush.bf16.msra.mxu3 %v1338_v19  ;;  %v1187_v55 = vld [vmem:[%s1614_s7 + $0x78] sm:$0xf0]  ;;  %v1460_v56 = vld [vmem:[%s1614_s7 + $0x1f4] sm:$0xf]  ;;  %v1307_v61 = vld [vmem:[%s1614_s7 + $0x168] sm:$0xf0]  ;;  %v1733_v2 = vor.u32 %v1391_v50, %v1107_v51 }
  0x4a   : > { %763 = vmatpush.bf16.msra.mxu0 %v1138_v26  ;;  %v1379_v59 = vld [vmem:[%s1614_s7 + $0x1f8] sm:$0xf0]  ;;  %v1426_v0 = vld [vmem:[%s1614_s7 + $0xe4] sm:$0xf]  ;;  %v1243_v1 = vld [vmem:[%s1614_s7 + $0xe8] sm:$0xf0]  ;;  %v1190_v3 = vor.u32 %v1412_v54, %v1187_v55  ;;  %v1310_v5 = vor.u32 %v1442_v60, %v1307_v61 }
  0x4b   : > { %782 = vmatpush.bf16.msra.mxu1 %v1202_v30  ;;  %v1382_v4 = vor.u32 %v1460_v56, %v1379_v59  ;;  %v1410_v6 = vld [vmem:[%s1614_s7 + $0x64] sm:$0xf]  ;;  %v1179_v7 = vld [vmem:[%s1614_s7 + $0x68] sm:$0xf0]  ;;  %v1246_v9 = vor.u32 %v1426_v0, %v1243_v1  ;;  %v1440_v11 = vld [vmem:[%s1614_s7 + $0x154] sm:$0xf] }
  0x4c   : > { %801 = vmatpush.bf16.msra.mxu2 %v1266_v31  ;;  %v1458_v8 = vld [vmem:[%s1614_s7 + $0x1e4] sm:$0xf]  ;;  %v1371_v10 = vld [vmem:[%s1614_s7 + $0x1e8] sm:$0xf0]  ;;  %v1299_v12 = vld [vmem:[%s1614_s7 + $0x158] sm:$0xf0]  ;;  %v1182_v15 = vor.u32 %v1410_v6, %v1179_v7 }
  0x4d   : > { %820 = vmatpush.bf16.msra.mxu3 %v1330_v35  ;;  %v1424_v13 = vld [vmem:[%s1614_s7 + $0xd4] sm:$0xf]  ;;  %v1235_v14 = vld [vmem:[%s1614_s7 + $0xd8] sm:$0xf0]  ;;  %v1374_v16 = vor.u32 %v1458_v8, %v1371_v10  ;;  %v1302_v17 = vor.u32 %v1440_v11, %v1299_v12  ;;  %v1438_v23 = vld [vmem:[%s1614_s7 + $0x144] sm:$0xf] }
  0x4e   : > { %764 = vmatpush.bf16.msra.mxu0 %v1130_v43  ;;  %v1408_v18 = vld [vmem:[%s1614_s7 + $0x54] sm:$0xf]  ;;  %v1171_v19 = vld [vmem:[%s1614_s7 + $0x58] sm:$0xf0]  ;;  %v1238_v21 = vor.u32 %v1424_v13, %v1235_v14  ;;  %v1291_v24 = vld [vmem:[%s1614_s7 + $0x148] sm:$0xf0] }
  0x4f   : > { %783 = vmatpush.bf16.msra.mxu1 %v1194_v47  ;;  %v1456_v20 = vld [vmem:[%s1614_s7 + $0x1d4] sm:$0xf]  ;;  %v1363_v22 = vld [vmem:[%s1614_s7 + $0x1d8] sm:$0xf0]  ;;  %v1422_v25 = vld [vmem:[%s1614_s7 + $0xc4] sm:$0xf]  ;;  %v1174_v27 = vor.u32 %v1408_v18, %v1171_v19  ;;  %v1294_v32 = vor.u32 %v1438_v23, %v1291_v24 }
  0x50   : > { %802 = vmatpush.bf16.msra.mxu2 %v1258_v48  ;;  %v1227_v26 = vld [vmem:[%s1614_s7 + $0xc8] sm:$0xf0]  ;;  %v1406_v28 = vld [vmem:[%s1614_s7 + $0x44] sm:$0xf]  ;;  %v1366_v31 = vor.u32 %v1456_v20, %v1363_v22  ;;  %v1113_v34 = vld [vmem:[%s1616_s8 + $0x20] sm:$0xf] }
  0x51   : > { %821 = vmatpush.bf16.msra.mxu3 %v1322_v52  ;;  %765 = vmatmul.bf16.vlgmr.msra.gmra.mxu0 %v1722_v57  ;;  %v1163_v29 = vld [vmem:[%s1614_s7 + $0x48] sm:$0xf0]  ;;  %v1454_v30 = vld [vmem:[%s1614_s7 + $0x1c4] sm:$0xf]  ;;  %v1396_v35 = vld [vmem:[%s1616_s8 + $0x2c] sm:$0xf0]  ;;  %v1230_v36 = vor.u32 %v1422_v25, %v1227_v26 }
  0x52   : > { %784 = vmatmul.bf16.vlgmr.msra.gmra.mxu1 %v1727_v62  ;;  %833 = vmatpush.bf16.msrb.mxu0 %v1190_v3  ;;  %v1355_v33 = vld [vmem:[%s1614_s7 + $0x1c8] sm:$0xf0]  ;;  %v1394_v37 = vld [vmem:[%s1616_s8 + $0x24] sm:$0xf]  ;;  %v1115_v38 = vld [vmem:[%s1616_s8 + $0x30] sm:$0xf0]  ;;  %v1166_v44 = vor.u32 %v1406_v28, %v1163_v29 }
  0x53   : > { %852 = vmatpush.bf16.msrb.mxu1 %v1254_v58  ;;  %803 = vmatmul.bf16.vlgmr.msra.gmra.mxu2 %v1729_v63  ;;  %v1436_v39 = vld [vmem:[%s1614_s7 + $0x134] sm:$0xf]  ;;  %v1283_v40 = vld [vmem:[%s1614_s7 + $0x138] sm:$0xf0]  ;;  %v1121_v41 = vld [vmem:[%s1616_s8 + $0x28] sm:$0xf]  ;;  %v1358_v48 = vor.u32 %v1454_v30, %v1355_v33  ;;  %v1779_v59 = vor.u32 %v1394_v37, %v1115_v38 }
  0x54   : > { %871 = vmatpush.bf16.msrb.mxu2 %v1318_v53  ;;  %822 = vmatmul.bf16.vlgmr.msra.gmra.mxu3 %v1733_v2  ;;  %v1420_v42 = vld [vmem:[%s1614_s7 + $0xb4] sm:$0xf]  ;;  %v1219_v43 = vld [vmem:[%s1614_s7 + $0xb8] sm:$0xf0]  ;;  %v1397_v45 = vld [vmem:[%s1616_s8 + $0x34] sm:$0xf0]  ;;  %v1286_v49 = vor.u32 %v1436_v39, %v1283_v40  ;;  %v1774_v53 = vor.u32 %v1396_v35, %v1113_v34 }
  0x55   : > { %890 = vmatpush.bf16.msrb.mxu3 %v1382_v4  ;;  %v1395_v46 = vld [vmem:[%s1616_s8 + $0x2c] sm:$0xf]  ;;  %v1123_v47 = vld [vmem:[%s1616_s8 + $0x38] sm:$0xf0]  ;;  %v1404_v50 = vld [vmem:[%s1614_s7 + $0x34] sm:$0xf]  ;;  %v1222_v54 = vor.u32 %v1420_v42, %v1219_v43  ;;  %v1781_v60 = vor.u32 %v1397_v45, %v1121_v41 }
  0x56   : > { %834 = vmatpush.bf16.msrb.mxu0 %v1182_v15  ;;  %v1155_v51 = vld [vmem:[%s1614_s7 + $0x38] sm:$0xf0]  ;;  %v1452_v52 = vld [vmem:[%s1614_s7 + $0x1b4] sm:$0xf]  ;;  %v1434_v56 = vld [vmem:[%s1614_s7 + $0x124] sm:$0xf]  ;;  %v1126_v1 = vor.u32 %v1395_v46, %v1123_v47 }
  0x57   : > { %853 = vmatpush.bf16.msrb.mxu1 %v1246_v9  ;;  %v1347_v55 = vld [vmem:[%s1614_s7 + $0x1b8] sm:$0xf0]  ;;  %v1275_v58 = vld [vmem:[%s1614_s7 + $0x128] sm:$0xf0]  ;;  %v1418_v61 = vld [vmem:[%s1614_s7 + $0xa4] sm:$0xf]  ;;  %v1158_v3 = vor.u32 %v1404_v50, %v1155_v51 }
  0x58   : > { %872 = vmatpush.bf16.msrb.mxu2 %v1310_v5  ;;  %v1211_v0 = vld [vmem:[%s1614_s7 + $0xa8] sm:$0xf0]  ;;  %v1350_v4 = vor.u32 %v1452_v52, %v1347_v55  ;;  %v1278_v5 = vor.u32 %v1434_v56, %v1275_v58  ;;  %v1402_v6 = vld [vmem:[%s1614_s7 + $0x24] sm:$0xf]  ;;  %v1432_v11 = vld [vmem:[%s1614_s7 + $0x114] sm:$0xf] }
  0x59   : > { %891 = vmatpush.bf16.msrb.mxu3 %v1374_v16  ;;  %v1147_v7 = vld [vmem:[%s1614_s7 + $0x28] sm:$0xf0]  ;;  %v1450_v8 = vld [vmem:[%s1614_s7 + $0x1a4] sm:$0xf]  ;;  %v1214_v9 = vor.u32 %v1418_v61, %v1211_v0  ;;  %v1267_v12 = vld [vmem:[%s1614_s7 + $0x118] sm:$0xf0] }
  0x5a   : > { %835 = vmatpush.bf16.msrb.mxu0 %v1174_v27  ;;  %v1339_v10 = vld [vmem:[%s1614_s7 + $0x1a8] sm:$0xf0]  ;;  %v1416_v13 = vld [vmem:[%s1614_s7 + $0x94] sm:$0xf]  ;;  %v1203_v14 = vld [vmem:[%s1614_s7 + $0x98] sm:$0xf0]  ;;  %v1150_v15 = vor.u32 %v1402_v6, %v1147_v7 }
  0x5b   : > { %854 = vmatpush.bf16.msrb.mxu1 %v1238_v21  ;;  %v1342_v16 = vor.u32 %v1450_v8, %v1339_v10  ;;  %v1400_v18 = vld [vmem:[%s1614_s7 + $0x14] sm:$0xf]  ;;  %v1139_v19 = vld [vmem:[%s1614_s7 + $0x18] sm:$0xf0]  ;;  %v1206_v21 = vor.u32 %v1416_v13, %v1203_v14  ;;  %v1430_v23 = vld [vmem:[%s1614_s7 + $0x104] sm:$0xf] }
  0x5c   : > { %873 = vmatpush.bf16.msrb.mxu2 %v1302_v17  ;;  %v1270_v17 = vor.u32 %v1432_v11, %v1267_v12  ;;  %v1448_v20 = vld [vmem:[%s1614_s7 + $0x194] sm:$0xf]  ;;  %v1331_v22 = vld [vmem:[%s1614_s7 + $0x198] sm:$0xf0]  ;;  %v1259_v24 = vld [vmem:[%s1614_s7 + $0x108] sm:$0xf0]  ;;  %v1142_v27 = vor.u32 %v1400_v18, %v1139_v19 }
  0x5d   : > { %892 = vmatpush.bf16.msrb.mxu3 %v1366_v31  ;;  %v1414_v25 = vld [vmem:[%s1614_s7 + $0x84] sm:$0xf]  ;;  %v1195_v26 = vld [vmem:[%s1614_s7 + $0x88] sm:$0xf0]  ;;  %v1334_v28 = vor.u32 %v1448_v20, %v1331_v22  ;;  %v1262_v29 = vor.u32 %v1430_v23, %v1259_v24  ;;  %v323_v6 = vld [vmem:[%s1933_s3 + $0x30] sm:$0xff]  ;;  %p1383_p11 = scmp.ne.s32.totalorder %s1533_s14, 4 }
  0x5e   : > { %836 = vmatpush.bf16.msrb.mxu0 %v1166_v44  ;;  %v1398_v30 = vld [vmem:[%s1614_s7 + $0x4] sm:$0xf]  ;;  %v1131_v31 = vld [vmem:[%s1614_s7 + $0x8] sm:$0xf0]  ;;  %v320_v24 = vld [vmem:[%s1933_s3 + $0x18] sm:$0xff] }
  0x5f   : > { %855 = vmatpush.bf16.msrb.mxu1 %v1230_v36  ;;  %v1446_v33 = vld [vmem:[%s1614_s7 + $0x184] sm:$0xf]  ;;  %v1323_v34 = vld [vmem:[%s1614_s7 + $0x188] sm:$0xf0]  ;;  %v1134_v35 = vor.u32 %v1398_v30, %v1131_v31 }
  0x60   : > { %874 = vmatpush.bf16.msrb.mxu2 %v1294_v32  ;;  %v1198_v32 = vor.u32 %v1414_v25, %v1195_v26  ;;  %v1326_v36 = vor.u32 %v1446_v33, %v1323_v34  ;;  %v322_v33 = vld [vmem:[%s1933_s3 + $0x28] sm:$0xff] }
  0x61   : > { %893 = vmatpush.bf16.msrb.mxu3 %v1358_v48  ;;  %770 = vmatmul.bf16.gmra.mxu0 %v1774_v53 }
  0x62   : > { %789 = vmatmul.bf16.gmra.mxu1 %v1779_v59  ;;  %837 = vmatpush.bf16.msrb.mxu0 %v1158_v3 }
  0x63   : > { %856 = vmatpush.bf16.msrb.mxu1 %v1222_v54  ;;  %808 = vmatmul.bf16.gmra.mxu2 %v1781_v60 }
  0x64   : > { %875 = vmatpush.bf16.msrb.mxu2 %v1286_v49  ;;  %827 = vmatmul.bf16.gmra.mxu3 %v1126_v1  ;;  %v319_v49 = vld [vmem:[%s1933_s3 + $0x10] sm:$0xff] }
  0x65   : > { %894 = vmatpush.bf16.msrb.mxu3 %v1350_v4 }
  0x66   : > { %838 = vmatpush.bf16.msrb.mxu0 %v1150_v15 }
  0x67   : > { %857 = vmatpush.bf16.msrb.mxu1 %v1214_v9 }
  0x68   : > { %876 = vmatpush.bf16.msrb.mxu2 %v1278_v5 }
  0x69   : > { %895 = vmatpush.bf16.msrb.mxu3 %v1342_v16 }
  0x6a   : > { %839 = vmatpush.bf16.msrb.mxu0 %v1142_v27 }
  0x6b   : > { %858 = vmatpush.bf16.msrb.mxu1 %v1206_v21 }
  0x6c   : > { %877 = vmatpush.bf16.msrb.mxu2 %v1270_v17  ;;  %v318_v17 = vld [vmem:[%s1933_s3 + $0x8] sm:$0xff] }
  0x6d   : > { %896 = vmatpush.bf16.msrb.mxu3 %v1334_v28 }
  0x6e   : > { %840 = vmatpush.bf16.msrb.mxu0 %v1134_v35 }
  0x6f   : > { %859 = vmatpush.bf16.msrb.mxu1 %v1198_v32 }
  0x70   : > { %878 = vmatpush.bf16.msrb.mxu2 %v1262_v29 }
  0x71   : > { %897 = vmatpush.bf16.msrb.mxu3 %v1326_v36  ;;  %841 = vmatmul.bf16.vlgmr.msrb.gmra.mxu0 %v1722_v57 }
  0x72   : > { %860 = vmatmul.bf16.vlgmr.msrb.gmra.mxu1 %v1727_v62  ;;  %v317_v62 = vld [vmem:[%s1933_s3] sm:$0xff] }
  0x73   : > { %879 = vmatmul.bf16.vlgmr.msrb.gmra.mxu2 %v1729_v63 }
  0x74   : > { %898 = vmatmul.bf16.vlgmr.msrb.gmra.mxu3 %v1733_v2 }
  0x81   : > { %846 = vmatmul.bf16.gmra.mxu0 %v1774_v53 }
  0x82   : > { %865 = vmatmul.bf16.gmra.mxu1 %v1779_v59  ;;  %v321_v59 = vld [vmem:[%s1933_s3 + $0x20] sm:$0xff] }
  0x83   : > { %884 = vmatmul.bf16.gmra.mxu2 %v1781_v60 }
  0x84   : > { %903 = vmatmul.bf16.gmra.mxu3 %v1126_v1 }
  0xce   : > { %v766_v37 = vpop.f32.mrf.mxu0 }
  0xcf   : > { %v785_v38 = vpop.f32.mrf.mxu1 }
  0xd0   : > { %v786_v39 = vadd.f32 %v785_v38, %v766_v37 }
  0xd6   : > { %v804_v40 = vpop.f32.mrf.mxu2  ;;  %v768_v57 = vpop.f32.mrf.mxu0 }
  0xd7   : > { %v805_v41 = vadd.f32 %v804_v40, %v786_v39  ;;  %v823_v42 = vpop.f32.mrf.mxu3  ;;  %v787_v63 = vpop.f32.mrf.mxu1 }
  0xd8   : > { %v788_v44 = vadd.f32 %v787_v63, %v768_v57 }
  0xd9   : > { %v824_v2 = vadd.f32 %v823_v42, %v805_v41  ;;  %v324_v41 = vld [vmem:[%s1933_s3 + $0x38] sm:$0xff] }
  0xdb   : > { %v909_v43 = vadd.f32 %v824_v2, %v317_v62 }
  0xdd   : > { %917 = vst [vmem:[%s1933_s3] sm:$0xff] %v909_v43 }
  0xde   : > { %v806_v45 = vpop.f32.mrf.mxu2  ;;  %v771_v48 = vpop.f32.mrf.mxu0 }
  0xdf   : > { %v807_v46 = vadd.f32 %v806_v45, %v788_v44  ;;  %v825_v47 = vpop.f32.mrf.mxu3  ;;  %v790_v50 = vpop.f32.mrf.mxu1 }
  0xe0   : > { %v791_v53 = vadd.f32 %v790_v50, %v771_v48 }
  0xe1   : > { %v826_v51 = vadd.f32 %v825_v47, %v807_v46 }
  0xe3   : > { %v911_v52 = vadd.f32 %v826_v51, %v319_v49 }
  0xe5   : > { %919 = vst [vmem:[%s1933_s3 + $0x10] sm:$0xff] %v911_v52 }
  0xe6   : > { %v809_v54 = vpop.f32.mrf.mxu2  ;;  %v773_v58 = vpop.f32.mrf.mxu0 }
  0xe7   : > { %v810_v55 = vadd.f32 %v809_v54, %v791_v53  ;;  %v828_v56 = vpop.f32.mrf.mxu3  ;;  %v792_v60 = vpop.f32.mrf.mxu1 }
  0xe8   : > { %v793_v1 = vadd.f32 %v792_v60, %v773_v58 }
  0xe9   : > { %v829_v61 = vadd.f32 %v828_v56, %v810_v55 }
  0xeb   : > { %v913_v0 = vadd.f32 %v829_v61, %v321_v59 }
  0xed   : > { %921 = vst [vmem:[%s1933_s3 + $0x20] sm:$0xff] %v913_v0 }
  0xee   : > { %v811_v3 = vpop.f32.mrf.mxu2  ;;  %v842_v7 = vpop.f32.mrf.mxu0 }
  0xef   : > { %v812_v4 = vadd.f32 %v811_v3, %v793_v1  ;;  %v830_v5 = vpop.f32.mrf.mxu3  ;;  %v861_v8 = vpop.f32.mrf.mxu1 }
  0xf0   : > { %v862_v11 = vadd.f32 %v861_v8, %v842_v7 }
  0xf1   : > { %v831_v9 = vadd.f32 %v830_v5, %v812_v4 }
  0xf3   : > { %v915_v10 = vadd.f32 %v831_v9, %v323_v6 }
  0xf5   : > { %923 = vst [vmem:[%s1933_s3 + $0x30] sm:$0xff] %v915_v10 }
  0xf6   : > { %v880_v12 = vpop.f32.mrf.mxu2  ;;  %v844_v15 = vpop.f32.mrf.mxu0 }
  0xf7   : > { %v899_v13 = vpop.f32.mrf.mxu3  ;;  %v881_v14 = vadd.f32 %v880_v12, %v862_v11  ;;  %v863_v16 = vpop.f32.mrf.mxu1 }
  0xf8   : > { %v864_v20 = vadd.f32 %v863_v16, %v844_v15 }
  0xf9   : > { %v900_v18 = vadd.f32 %v899_v13, %v881_v14 }
  0xfb   : > { %v910_v19 = vadd.f32 %v900_v18, %v318_v17 }
  0xfd   : > { %918 = vst [vmem:[%s1933_s3 + $0x8] sm:$0xff] %v910_v19 }
  0xfe   : > { %v882_v21 = vpop.f32.mrf.mxu2  ;;  %v847_v25 = vpop.f32.mrf.mxu0 }
  0xff   : > { %v901_v22 = vpop.f32.mrf.mxu3  ;;  %v883_v23 = vadd.f32 %v882_v21, %v864_v20  ;;  %v866_v26 = vpop.f32.mrf.mxu1 }
 0x100   : > { %v867_v29 = vadd.f32 %v866_v26, %v847_v25 }
 0x101   : > { %v902_v27 = vadd.f32 %v901_v22, %v883_v23 }
 0x103   : > { %v912_v28 = vadd.f32 %v902_v27, %v320_v24 }
 0x105   : > { %920 = vst [vmem:[%s1933_s3 + $0x18] sm:$0xff] %v912_v28 }
 0x106   : > { %v885_v30 = vpop.f32.mrf.mxu2  ;;  %v849_v35 = vpop.f32.mrf.mxu0 }
 0x107   : > { %v904_v31 = vpop.f32.mrf.mxu3  ;;  %v886_v32 = vadd.f32 %v885_v30, %v867_v29  ;;  %v868_v36 = vpop.f32.mrf.mxu1 }
 0x108   : > { %v869_v38 = vadd.f32 %v868_v36, %v849_v35 }
 0x109   : > { %v905_v34 = vadd.f32 %v904_v31, %v886_v32 }
 0x10b   : > { %v914_v37 = vadd.f32 %v905_v34, %v322_v33 }
 0x10d   : > { %922 = vst [vmem:[%s1933_s3 + $0x28] sm:$0xff] %v914_v37 }
 0x10e   : > { %v887_v39 = vpop.f32.mrf.mxu2 }
 0x10f   : > { %v888_v40 = vadd.f32 %v887_v39, %v869_v38  ;;  %v906_v42 = vpop.f32.mrf.mxu3 }
 0x111   : > { %v907_v57 = vadd.f32 %v906_v42, %v888_v40  ;;  %928 = sbr.rel (%p1383_p11) target bundleno = 292 (0x124), region = 63 }
 0x113   : > { %v916_v62 = vadd.f32 %v907_v57, %v324_v41 }
 0x115   : > { %924 = vst [vmem:[%s1933_s3 + $0x38] sm:$0xff] %v916_v62 }
 0x116   : > { %v929_v63 = vld [vmem:[%s1933_s3] sm:$0xff]  ;;  %v930_v43 = vld [vmem:[%s1933_s3 + $0x8] sm:$0xff]  ;;  %v931_v46 = vld [vmem:[%s1933_s3 + $0x10] sm:$0xff] }
 0x117   : > { %v937_v2 = vld [vmem:[%s1932_s2] sm:$0x3]  ;;  %v932_v47 = vld [vmem:[%s1933_s3 + $0x18] sm:$0xff]  ;;  %v934_v52 = vld [vmem:[%s1933_s3 + $0x28] sm:$0xff] }
 0x118   : > { %v939_v44 = vperm.slane %v937_v2, 0  ;;  %v940_v45 = vperm.slane %v937_v2, 1  ;;  %v933_v48 = vld [vmem:[%s1933_s3 + $0x20] sm:$0xff]  ;;  %v935_v54 = vld [vmem:[%s1933_s3 + $0x30] sm:$0xff] }
 0x11a   : > { %v943_v49 = vadd.f32 %v939_v44, %v929_v63  ;;  %v944_v50 = vadd.f32 %v940_v45, %v930_v43  ;;  %v945_v51 = vadd.f32 %v939_v44, %v931_v46  ;;  %v946_v53 = vadd.f32 %v940_v45, %v932_v47 }
 0x11b   : > { %v947_v55 = vadd.f32 %v939_v44, %v933_v48  ;;  %v948_v58 = vadd.f32 %v940_v45, %v934_v52  ;;  %v949_v59 = vadd.f32 %v939_v44, %v935_v54 }
 0x11c   : > { %951 = vst [vmem:[%s1933_s3] sm:$0xff] %v943_v49  ;;  %v936_v56 = vld [vmem:[%s1933_s3 + $0x38] sm:$0xff] }
 0x11d   : > { %952 = vst [vmem:[%s1933_s3 + $0x8] sm:$0xff] %v944_v50  ;;  %v950_v60 = vadd.f32 %v940_v45, %v936_v56 }
 0x11e   : > { %953 = vst [vmem:[%s1933_s3 + $0x10] sm:$0xff] %v945_v51 }
 0x11f   : > { %954 = vst [vmem:[%s1933_s3 + $0x18] sm:$0xff] %v946_v53 }
 0x120   : > { %955 = vst [vmem:[%s1933_s3 + $0x20] sm:$0xff] %v947_v55 }
 0x121   : > { %956 = vst [vmem:[%s1933_s3 + $0x28] sm:$0xff] %v948_v58 }
 0x122   : > { %957 = vst [vmem:[%s1933_s3 + $0x30] sm:$0xff] %v949_v59 }
 0x123   : > { %958 = vst [vmem:[%s1933_s3 + $0x38] sm:$0xff] %v950_v60 }
 0x124 PF: > { %s13_s16 = sadd.s32 1, %s1541_s16   ;;  %s1934_s12 = smov %s1529_s13 }
 0x125   : > { %p10_p12 = scmp.ge.s32.totalorder %s13_s16, 7   ;;  %s1935_s13 = smov %s1599_s20 }
 0x126   : > { %s1936_s14 = smov %s1537_s15  ;;  %s1937_s15 = smov %s1939_s17 }
 0x127   :  { %12 = sbr.rel (!%p10_p12) target bundleno = 3 (0x3), region = 104 }

// kernel: alexnet_forward.13
= control target key start
LH: loop header
LB: loop body
LE: loop exit
PB: predicated region body
PF: predicated region fallthrough
CT: control target
= control target key end

     0   :  { %s396_s6 = smov 0   ;;  %s398_s7 = smov 0   ;;  %s463_s0 = inlined_call_operand.vmem [shape: f32[8,256], index: 0, kind: input, shape index: {}]   ;;  %s464_s1 = inlined_call_operand.vmem [shape: f32[8,256], index: 1, kind: output, shape index: {}]  }
   0x1   :  { %s400_s8 = smov 0  }
   0x2 LB: > { %s23_s9 = sadd.s32 1, %s379_s7  ;;  %p323_p0 = scmp.ge.s32.totalorder %s383_s8, 1  ;;  %s383_s8 = sphi %s400_s8, %s11_s8   ;;  %s379_s7 = sphi %s398_s7, %s468_s7   ;;  %s375_s6 = sphi %s396_s6, %s467_s6  }
   0x3   : > { %p25_p1 = scmp.ge.s32.totalorder %s23_s9, 2  ;;  %p101_p2 = scmp.lt.s32.totalorder %s383_s8, 3 }
   0x5   : > { %s470_s9 = smov (%p25_p1, %s23_s9), 0  ;;  %p102_p3 = pnand %p323_p0, %p101_p2 }
   0x6   : > { %p134_p4 = scmp.eq.s32.totalorder (!%p102_p3), %s375_s6, 0 }
   0x7   : > { %105 = sbr.rel (%p102_p3) target bundleno = 92 (0x5c), region = 24 }
   0xc   : > { %139 = sbr.rel (!%p134_p4) target bundleno = 17 (0x11), region = 28  ;;  %v140_v0 = vlaneseq (%p134_p4)  ;;  %v385_v1 = vmov (%p134_p4), 0.0  }
   0xe   : > { %vm142_vm0 = vcmp.lt.s32.totalorder (%p134_p4), %v140_v0, 256 }
   0xf   : > { %144 = vst.msk [vmem:[#allocation2] sm:$0x3] (%p134_p4), %vm142_vm0, %v385_v1 }
  0x10   : > { %145 = vst.msk [vmem:[#allocation3] sm:$0x3] (%p134_p4), %vm142_vm0, %v385_v1 }
  0x11 PF: > { %v146_v2 = vld [vmem:[%s463_s0] sm:$0xff]  ;;  %v147_v3 = vld [vmem:[%s463_s0 + $0x8] sm:$0xff]  ;;  %p325_p5 = scmp.ne.s32.totalorder %s375_s6, 0 }
  0x12   : > { %v423_v4 = vmax.f32 %v146_v2, 0.0  ;;  %v425_v5 = vmax.f32 %v147_v3, 0.0 }
  0x13   : > { %152 = sbr.rel (%p325_p5) target bundleno = 44 (0x2c), region = 32 }
  0x18   : > { %v154_v6 = vrot.slane %v423_v4, 4  ;;  %v160_v7 = vrot.slane %v425_v5, 4  ;;  %v179_v8 = vmul.f32 %v423_v4, %v423_v4  ;;  %v180_v9 = vmul.f32 %v425_v5, %v425_v5  ;;  %v153_v31 = vld [vmem:[#allocation2] sm:$0x3]  ;;  %v178_v37 = vld [vmem:[#allocation3] sm:$0x3] }
  0x19   : > { %v173_v28 = vlaneseq  ;;  %vm169_vm1 = vcmask 1040384  }
  0x1a   : > { %v155_v10 = vadd.f32 %v154_v6, %v423_v4  ;;  %v161_v11 = vadd.f32 %v160_v7, %v425_v5  ;;  %v181_v12 = vrot.slane %v179_v8, 4  ;;  %v187_v13 = vrot.slane %v180_v9, 4 }
  0x1b   : > { %vm175_vm2 = vcmp.lt.s32.totalorder %v173_v28, 256 }
  0x1c   : > { %v156_v14 = vrot.slane %v155_v10, 2  ;;  %v162_v15 = vrot.slane %v161_v11, 2  ;;  %v182_v16 = vadd.f32 %v181_v12, %v179_v8  ;;  %v188_v17 = vadd.f32 %v187_v13, %v180_v9 }
  0x1e   : > { %v157_v18 = vadd.f32 %v156_v14, %v155_v10  ;;  %v163_v19 = vadd.f32 %v162_v15, %v161_v11  ;;  %v183_v20 = vrot.slane %v182_v16, 2  ;;  %v189_v21 = vrot.slane %v188_v17, 2 }
  0x20   : > { %v158_v22 = vrot.slane %v157_v18, 1  ;;  %v164_v23 = vrot.slane %v163_v19, 1  ;;  %v184_v24 = vadd.f32 %v183_v20, %v182_v16  ;;  %v190_v25 = vadd.f32 %v189_v21, %v188_v17 }
  0x22   : > { %v159_v26 = vadd.f32 %v158_v22, %v157_v18  ;;  %v165_v27 = vadd.f32 %v164_v23, %v163_v19  ;;  %v185_v29 = vrot.slane %v184_v24, 1  ;;  %v191_v30 = vrot.slane %v190_v25, 1 }
  0x24   : > { %v168_v32 = vrot.slane %v165_v27, 7  ;;  %v186_v33 = vadd.f32 %v185_v29, %v184_v24  ;;  %v192_v34 = vadd.f32 %v191_v30, %v190_v25 }
  0x26   : > { %v170_v35 = vsel %vm169_vm1, %v159_v26, %v168_v32  ;;  %v195_v38 = vrot.slane %v192_v34, 7 }
  0x27   : > { %v172_v36 = vadd.f32 %v170_v35, %v153_v31 }
  0x28   : > { %v196_v39 = vsel %vm169_vm1, %v186_v33, %v195_v38 }
  0x29   : > { %177 = vst.msk [vmem:[#allocation2] sm:$0x3] %vm175_vm2, %v172_v36  ;;  %v198_v40 = vadd.f32 %v196_v39, %v178_v37 }
  0x2b   : > { %199 = vst.msk [vmem:[#allocation3] sm:$0x3] %vm175_vm2, %v198_v40 }
  0x2c PF: > { %p200_p6 = scmp.eq.s32.totalorder %s375_s6, 1 }
  0x2d   : > { %v211_v42 = vlaneseq (%p200_p6) }
  0x2e   : > { %204 = sbr.rel (!%p200_p6) target bundleno = 76 (0x4c), region = 36 }
  0x2f   : > { %vm437_vm3 = vcmp.lt.s32.totalorder (%p200_p6), %v211_v42, 256 }
  0x30   : > { %v205_v41 = vld [vmem:[#allocation2] sm:$0x3] (%p200_p6) }
  0x31   : > { %v206_v44 = vmul.f32 (%p200_p6), 0.5, %v205_v41 }
  0x32   : > { %v207_v43 = vld [vmem:[#allocation3] sm:$0x3] (%p200_p6) }
  0x33   : > { %v208_v45 = vmul.f32 0.5, %v207_v43  ;;  %v209_v47 = vmul.f32 %v206_v44, %v206_v44  ;;  %215 = vst.msk [vmem:[#allocation2] sm:$0x3] %vm437_vm3, %v206_v44 }
  0x35   : > { %v210_v48 = vsub.f32 %v208_v45, %v209_v47 }
  0x37   : > { %v216_v49 = vadd.f32 1e-05, %v210_v48 }
  0x39   : > { %359 = vrsqrt.f32 %v216_v49  ;;  %vm223_vm4 = vweird.f32 %v216_v49 }
  0x3f   : > { %v360_v50 = vpop.eup %359 }
  0x40   : > { %v218_v51 = vmul.f32 %v360_v50, %v216_v49  ;;  %vm224_vm5 = vweird.f32 %v360_v50 }
  0x41   : > { %vm225_vm6 = vmor %vm223_vm4, %vm224_vm5 }
  0x42   : > { %v219_v52 = vmul.f32 %v360_v50, %v218_v51 }
  0x44   : > { %v220_v53 = vmul.f32 0.5, %v219_v52 }
  0x46   : > { %v221_v54 = vsub.f32 1.5, %v220_v53 }
  0x48   : > { %v222_v55 = vmul.f32 %v360_v50, %v221_v54 }
  0x4a   : > { %v226_v56 = vsel %vm225_vm6, %v360_v50, %v222_v55 }
  0x4b   : > { %227 = vst.msk [vmem:[#allocation3] sm:$0x3] %vm437_vm3, %v226_v56 }
  0x4c PF: > { %p327_p7 = scmp.ne.s32.totalorder %s375_s6, 1 }
  0x4e   : > { %230 = sbr.rel (%p327_p7) target bundleno = 92 (0x5c), region = 40 }
  0x53   : > { %v231_v57 = vld [vmem:[#allocation2] sm:$0x3]  ;;  %v239_v58 = vld [vmem:[#allocation3] sm:$0x3] }
  0x54   : > { %v233_v59 = vperm.slane %v231_v57, 0  ;;  %v241_v60 = vperm.slane %v239_v58, 0  ;;  %v234_v61 = vperm.slane %v231_v57, 1  ;;  %v242_v62 = vperm.slane %v239_v58, 1 }
  0x56   : > { %v237_v63 = vsub.f32 %v423_v4, %v233_v59  ;;  %v238_v0 = vsub.f32 %v425_v5, %v234_v61 }
  0x58   : > { %v245_v1 = vmul.f32 %v241_v60, %v237_v63  ;;  %v246_v2 = vmul.f32 %v242_v62, %v238_v0 }
  0x5a   : > { %247 = vst [vmem:[%s464_s1] sm:$0xff] %v245_v1 }
  0x5b   : > { %248 = vst [vmem:[%s464_s1 + $0x8] sm:$0xff] %v246_v2 }
  0x5c PF: > { %s11_s8 = sadd.s32 1, %s383_s8   ;;  %s467_s6 = smov %s379_s7 }
  0x5d   : > { %p8_p8 = scmp.ge.s32.totalorder %s11_s8, 4   ;;  %s468_s7 = smov %s470_s9 }
  0x5f   :  { %10 = sbr.rel (!%p8_p8) target bundleno = 2 (0x2), region = 70 }

// kernel: alexnet_forward.14
= control target key start
LH: loop header
LB: loop body
LE: loop exit
PB: predicated region body
PF: predicated region fallthrough
CT: control target
= control target key end

     0   :  { %s2315_s0 = inlined_call_operand.vmem [shape: bf16[16,2560], index: 0, kind: input, shape index: {}]   ;;  %s2316_s1 = inlined_call_operand.vmem [shape: bf16[2560,512], index: 1, kind: input, shape index: {}]   ;;  %s2317_s2 = inlined_call_operand.vmem [shape: f32[1,512], index: 2, kind: input, shape index: {}]   ;;  %s2318_s3 = inlined_call_operand.vmem [shape: f32[16,512], index: 3, kind: output, shape index: {}]  }
   0x1   :  { %2320 = sst [smem:[#allocation6_spill]] %s2315_s0 }
   0x2   :  { %2321 = sst [smem:[#allocation7_spill]] %s2316_s1 }
   0x3   :  { %s1829_s12 = smov 0   ;;  %s1831_s13 = smov 0  }
   0x4   :  { %s1833_s14 = smov 0   ;;  %s1835_s15 = smov 0  }
   0x5   :  { %s1837_s16 = smov 0   ;;  %s1839_s17 = smov 0  }
   0x6   :  { %s1841_s18 = smov 0   ;;  %s1843_s19 = smov 0  }
   0x7   :  { %s1845_s20 = smov 0   ;;  %s1847_s21 = smov 0  }
   0x8   :  { %s1849_s22 = smov 0  }
   0x9 LB: > { %s1264_s23 = sadd.s32 4294967295, %s1806_s22   ;;  %s25_s24 = sadd.s32 1, %s1798_s20  ;;  %s1806_s22 = sphi %s1849_s22, %s13_s22   ;;  %s1802_s21 = sphi %s1847_s21, %s2338_s21   ;;  %s1798_s20 = sphi %s1845_s20, %s2337_s20   ;;  %s1794_s19 = sphi %s1843_s19, %s2336_s19   ;;  %s1790_s18 = sphi %s1841_s18, %s2335_s18   ;;  %s1786_s17 = sphi %s1839_s17, %s2334_s17   ;;  %s1782_s16 = sphi %s1837_s16, %s2333_s16   ;;  %s1778_s15 = sphi %s1835_s15, %s2332_s15   ;;  %s1774_s14 = sphi %s1833_s14, %s2331_s14   ;;  %s1770_s13 = sphi %s1831_s13, %s2330_s13   ;;  %s1766_s12 = sphi %s1829_s12, %s2329_s12  }
   0xa   : > { %p26_p0 = scmp.ge.s32.totalorder %s25_s24, 5  ;;  %s28_s25 = sadd.s32 1, %s1802_s21 }
   0xb   : > { %s41_s26 = sadd.s32 1, %s1786_s17  ;;  %p48_p1 = scmp.ne.s32.totalorder %s1786_s17, %s1782_s16 }
   0xc   : > { %s2340_s24 = smov (%p26_p0, %s25_s24), 0  ;;  %s2342_s25 = smov (!%p26_p0, %s28_s25), %s1802_s21 }
   0xd   : > { %s37_s27 = ssub.s32 %s1798_s20, %s2340_s24  ;;  %p49_p2 = scmp.eq.s32.totalorder %s1806_s22, 0 }
   0xe   : > { %p30_p3 = scmp.ge.s32.totalorder %s2342_s25, 2  ;;  %p39_p4 = scmp.eq.s32.totalorder %s37_s27, 0 }
   0xf   : > { %p1896_p5 = por %p49_p2, %p48_p1  ;;  %s69_s29 = sadd.s32 1, %s1778_s15 }
  0x10   : > { %s2344_s25 = smov (%p30_p3, %s2342_s25), 0  ;;  %p76_p6 = scmp.ne.s32.totalorder %s1778_s15, %s1774_s14 }
  0x11   : > { %2323 = sst [smem:[#allocation5_spill]] %s2344_s25  ;;  %s65_s4 = ssub.s32 %s1802_s21, %s2344_s25 }
  0x12   : > { %s1904_s30 = scalar_select %p39_p4, %s1786_s17, %s41_s26  }
  0x13   : > { %s66_s5 = sor.u32 %s65_s4, %s37_s27  ;;  %p121_p7 = scmp.eq.s32.totalorder %s65_s4, 0 }
  0x14   : > { %p67_p8 = scmp.eq.s32.totalorder %s66_s5, 0  ;;  %p1910_p9 = por %p76_p6, %p49_p2 }
  0x15   : > { %s123_s7 = sadd.s32 1, %s1770_s13  ;;  %p133_p10 = scmp.ne.s32.totalorder %s1770_s13, %s1766_s12 }
  0x16   : > { %s1918_s8 = scalar_select %p67_p8, %s1778_s15, %s69_s29  }
  0x17   : > { %s1921_s9 = scalar_select %p121_p7, %s1770_s13, %s123_s7  }
  0x18   : > { %p134_p11 = scmp.eq.s32.totalorder %s1264_s23, 9  ;;  %p1267_p13 = scmp.ge.s32.totalorder %s1806_s22, 10 }
  0x1a   : > { %p1923_p12 = por %p134_p11, %p133_p10  ;;  %156 = sbr.rel (%p1267_p13) target bundleno = 119 (0x77), region = 16 }
  0x1f   : > { %159 = sbr.rel (!%p1896_p5) target bundleno = 45 (0x2d), region = 20  ;;  %s161_s11 = sand.u32 (%p1896_p5), 1, %s1786_s17  }
  0x20   : > { %s1560_s26 = sshll.u32 (%p1896_p5), %s1798_s20, 4  ;;  %s1268_s27 = sshll.u32 (%p1896_p5), %s161_s11, 5 }
  0x21   : > { %s2326_s0 = sld [smem:[#allocation6_spill]] (%p1896_p5)  ;;  %s163_s23 = scalar_lea.vmem (%p1896_p5), [#allocation2], %s1268_s27 }
  0x27   : > { %s169_s5 = scalar_lea.vmem %s2326_s0, %s1560_s26 }
  0x28   : > { %v182_v0 = vld [vmem:[%s169_s5] sm:$0xff]  ;;  %v184_v1 = vld [vmem:[%s169_s5 + $0x8] sm:$0xff]  ;;  %v186_v2 = vld [vmem:[%s169_s5 + $0x50] sm:$0xff] }
  0x29   : > { %183 = vst [vmem:[%s163_s23] sm:$0xff] %v182_v0  ;;  %v188_v3 = vld [vmem:[%s169_s5 + $0x58] sm:$0xff] }
  0x2a   : > { %185 = vst [vmem:[%s163_s23 + $0x8] sm:$0xff] %v184_v1 }
  0x2b   : > { %187 = vst [vmem:[%s163_s23 + $0x10] sm:$0xff] %v186_v2 }
  0x2c   : > { %189 = vst [vmem:[%s163_s23 + $0x18] sm:$0xff] %v188_v3 }
  0x2d PF: > { %195 = sbr.rel (!%p1910_p9) target bundleno = 119 (0x77), region = 43  ;;  %s197_s28 = sand.u32 (%p1910_p9), 1, %s1778_s15  }
  0x2e   : > { %s1273_s7 = sshll.u32 (%p1910_p9), %s1802_s21, 1  ;;  %s1271_s11 = sshll.u32 (%p1910_p9), %s197_s28, 9 }
  0x2f   : > { %s1561_s26 = sshll.u32 (%p1910_p9), %s1798_s20, 8  ;;  %s2327_s1 = sld [smem:[#allocation7_spill]] (%p1910_p9) }
  0x30   : > { %s203_s29 = sadd.s32 (%p1910_p9), %s1561_s26, %s1273_s7  ;;  %s1948_s6 = scalar_lea.vmem (%p1910_p9), [#allocation3], %s1271_s11 }
  0x31   : > { %s1275_s4 = sshll.u32 (%p1910_p9), %s203_s29, 2 }
  0x35   : > { %s1943_s5 = scalar_lea.vmem %s2327_s1, %s1275_s4 }
  0x36   : > { %v360_v4 = vld [vmem:[%s1943_s5] sm:$0xff]  ;;  %v362_v5 = vld [vmem:[%s1943_s5 + $0x10] sm:$0xff] }
  0x37   : > { %v364_v6 = vld [vmem:[%s1943_s5 + $0x20] sm:$0xff]  ;;  %361 = vst [vmem:[%s1948_s6] sm:$0xff] %v360_v4  ;;  %v366_v7 = vld [vmem:[%s1943_s5 + $0x30] sm:$0xff] }
  0x38   : > { %363 = vst [vmem:[%s1948_s6 + $0x8] sm:$0xff] %v362_v5  ;;  %v368_v8 = vld [vmem:[%s1943_s5 + $0x40] sm:$0xff]  ;;  %v370_v9 = vld [vmem:[%s1943_s5 + $0x50] sm:$0xff] }
  0x39   : > { %365 = vst [vmem:[%s1948_s6 + $0x10] sm:$0xff] %v364_v6  ;;  %v372_v10 = vld [vmem:[%s1943_s5 + $0x60] sm:$0xff]  ;;  %v374_v11 = vld [vmem:[%s1943_s5 + $0x70] sm:$0xff] }
  0x3a   : > { %367 = vst [vmem:[%s1948_s6 + $0x18] sm:$0xff] %v366_v7  ;;  %v376_v12 = vld [vmem:[%s1943_s5 + $0x80] sm:$0xff]  ;;  %v378_v13 = vld [vmem:[%s1943_s5 + $0x90] sm:$0xff] }
  0x3b   : > { %369 = vst [vmem:[%s1948_s6 + $0x20] sm:$0xff] %v368_v8  ;;  %v380_v14 = vld [vmem:[%s1943_s5 + $0xa0] sm:$0xff]  ;;  %v382_v15 = vld [vmem:[%s1943_s5 + $0xb0] sm:$0xff] }
  0x3c   : > { %371 = vst [vmem:[%s1948_s6 + $0x28] sm:$0xff] %v370_v9  ;;  %v384_v16 = vld [vmem:[%s1943_s5 + $0xc0] sm:$0xff]  ;;  %v386_v17 = vld [vmem:[%s1943_s5 + $0xd0] sm:$0xff] }
  0x3d   : > { %373 = vst [vmem:[%s1948_s6 + $0x30] sm:$0xff] %v372_v10  ;;  %v388_v18 = vld [vmem:[%s1943_s5 + $0xe0] sm:$0xff]  ;;  %v390_v19 = vld [vmem:[%s1943_s5 + $0xf0] sm:$0xff] }
  0x3e   : > { %375 = vst [vmem:[%s1948_s6 + $0x38] sm:$0xff] %v374_v11  ;;  %v392_v20 = vld [vmem:[%s1943_s5 + $0x100] sm:$0xff]  ;;  %v394_v21 = vld [vmem:[%s1943_s5 + $0x110] sm:$0xff] }
  0x3f   : > { %377 = vst [vmem:[%s1948_s6 + $0x40] sm:$0xff] %v376_v12  ;;  %v396_v22 = vld [vmem:[%s1943_s5 + $0x120] sm:$0xff]  ;;  %v398_v23 = vld [vmem:[%s1943_s5 + $0x130] sm:$0xff] }
  0x40   : > { %379 = vst [vmem:[%s1948_s6 + $0x48] sm:$0xff] %v378_v13  ;;  %v400_v24 = vld [vmem:[%s1943_s5 + $0x140] sm:$0xff]  ;;  %v402_v25 = vld [vmem:[%s1943_s5 + $0x150] sm:$0xff] }
  0x41   : > { %381 = vst [vmem:[%s1948_s6 + $0x50] sm:$0xff] %v380_v14  ;;  %v404_v26 = vld [vmem:[%s1943_s5 + $0x160] sm:$0xff]  ;;  %v406_v27 = vld [vmem:[%s1943_s5 + $0x170] sm:$0xff] }
  0x42   : > { %383 = vst [vmem:[%s1948_s6 + $0x58] sm:$0xff] %v382_v15  ;;  %v408_v28 = vld [vmem:[%s1943_s5 + $0x180] sm:$0xff]  ;;  %v410_v29 = vld [vmem:[%s1943_s5 + $0x190] sm:$0xff] }
  0x43   : > { %385 = vst [vmem:[%s1948_s6 + $0x60] sm:$0xff] %v384_v16  ;;  %v412_v30 = vld [vmem:[%s1943_s5 + $0x1a0] sm:$0xff]  ;;  %v414_v31 = vld [vmem:[%s1943_s5 + $0x1b0] sm:$0xff] }
  0x44   : > { %387 = vst [vmem:[%s1948_s6 + $0x68] sm:$0xff] %v386_v17  ;;  %v416_v32 = vld [vmem:[%s1943_s5 + $0x1c0] sm:$0xff]  ;;  %v418_v33 = vld [vmem:[%s1943_s5 + $0x1d0] sm:$0xff] }
  0x45   : > { %389 = vst [vmem:[%s1948_s6 + $0x70] sm:$0xff] %v388_v18  ;;  %v420_v34 = vld [vmem:[%s1943_s5 + $0x1e0] sm:$0xff]  ;;  %v422_v35 = vld [vmem:[%s1943_s5 + $0x1f0] sm:$0xff] }
  0x46   : > { %391 = vst [vmem:[%s1948_s6 + $0x78] sm:$0xff] %v390_v19  ;;  %v424_v36 = vld [vmem:[%s1943_s5 + $0x200] sm:$0xff]  ;;  %v426_v37 = vld [vmem:[%s1943_s5 + $0x210] sm:$0xff] }
  0x47   : > { %393 = vst [vmem:[%s1948_s6 + $0x80] sm:$0xff] %v392_v20  ;;  %v428_v38 = vld [vmem:[%s1943_s5 + $0x220] sm:$0xff]  ;;  %v430_v39 = vld [vmem:[%s1943_s5 + $0x230] sm:$0xff] }
  0x48   : > { %395 = vst [vmem:[%s1948_s6 + $0x88] sm:$0xff] %v394_v21  ;;  %v432_v40 = vld [vmem:[%s1943_s5 + $0x240] sm:$0xff]  ;;  %v434_v41 = vld [vmem:[%s1943_s5 + $0x250] sm:$0xff] }
  0x49   : > { %397 = vst [vmem:[%s1948_s6 + $0x90] sm:$0xff] %v396_v22  ;;  %v436_v42 = vld [vmem:[%s1943_s5 + $0x260] sm:$0xff]  ;;  %v438_v43 = vld [vmem:[%s1943_s5 + $0x270] sm:$0xff] }
  0x4a   : > { %399 = vst [vmem:[%s1948_s6 + $0x98] sm:$0xff] %v398_v23  ;;  %v440_v44 = vld [vmem:[%s1943_s5 + $0x280] sm:$0xff]  ;;  %v442_v45 = vld [vmem:[%s1943_s5 + $0x290] sm:$0xff] }
  0x4b   : > { %401 = vst [vmem:[%s1948_s6 + $0xa0] sm:$0xff] %v400_v24  ;;  %v444_v46 = vld [vmem:[%s1943_s5 + $0x2a0] sm:$0xff]  ;;  %v446_v47 = vld [vmem:[%s1943_s5 + $0x2b0] sm:$0xff] }
  0x4c   : > { %403 = vst [vmem:[%s1948_s6 + $0xa8] sm:$0xff] %v402_v25  ;;  %v448_v48 = vld [vmem:[%s1943_s5 + $0x2c0] sm:$0xff]  ;;  %v450_v49 = vld [vmem:[%s1943_s5 + $0x2d0] sm:$0xff] }
  0x4d   : > { %405 = vst [vmem:[%s1948_s6 + $0xb0] sm:$0xff] %v404_v26  ;;  %v452_v50 = vld [vmem:[%s1943_s5 + $0x2e0] sm:$0xff]  ;;  %v454_v51 = vld [vmem:[%s1943_s5 + $0x2f0] sm:$0xff] }
  0x4e   : > { %407 = vst [vmem:[%s1948_s6 + $0xb8] sm:$0xff] %v406_v27  ;;  %v456_v52 = vld [vmem:[%s1943_s5 + $0x300] sm:$0xff]  ;;  %v458_v53 = vld [vmem:[%s1943_s5 + $0x310] sm:$0xff] }
  0x4f   : > { %409 = vst [vmem:[%s1948_s6 + $0xc0] sm:$0xff] %v408_v28  ;;  %v460_v54 = vld [vmem:[%s1943_s5 + $0x320] sm:$0xff]  ;;  %v462_v55 = vld [vmem:[%s1943_s5 + $0x330] sm:$0xff] }
  0x50   : > { %411 = vst [vmem:[%s1948_s6 + $0xc8] sm:$0xff] %v410_v29  ;;  %v464_v56 = vld [vmem:[%s1943_s5 + $0x340] sm:$0xff]  ;;  %v466_v57 = vld [vmem:[%s1943_s5 + $0x350] sm:$0xff] }
  0x51   : > { %413 = vst [vmem:[%s1948_s6 + $0xd0] sm:$0xff] %v412_v30  ;;  %v468_v58 = vld [vmem:[%s1943_s5 + $0x360] sm:$0xff]  ;;  %v470_v59 = vld [vmem:[%s1943_s5 + $0x370] sm:$0xff] }
  0x52   : > { %415 = vst [vmem:[%s1948_s6 + $0xd8] sm:$0xff] %v414_v31  ;;  %v472_v60 = vld [vmem:[%s1943_s5 + $0x380] sm:$0xff]  ;;  %v474_v61 = vld [vmem:[%s1943_s5 + $0x390] sm:$0xff] }
  0x53   : > { %417 = vst [vmem:[%s1948_s6 + $0xe0] sm:$0xff] %v416_v32  ;;  %v476_v62 = vld [vmem:[%s1943_s5 + $0x3a0] sm:$0xff]  ;;  %v478_v63 = vld [vmem:[%s1943_s5 + $0x3b0] sm:$0xff] }
  0x54   : > { %419 = vst [vmem:[%s1948_s6 + $0xe8] sm:$0xff] %v418_v33  ;;  %v480_v0 = vld [vmem:[%s1943_s5 + $0x3c0] sm:$0xff]  ;;  %v482_v1 = vld [vmem:[%s1943_s5 + $0x3d0] sm:$0xff] }
  0x55   : > { %421 = vst [vmem:[%s1948_s6 + $0xf0] sm:$0xff] %v420_v34  ;;  %v484_v2 = vld [vmem:[%s1943_s5 + $0x3e0] sm:$0xff]  ;;  %v486_v3 = vld [vmem:[%s1943_s5 + $0x3f0] sm:$0xff] }
  0x56   : > { %423 = vst [vmem:[%s1948_s6 + $0xf8] sm:$0xff] %v422_v35 }
  0x57   : > { %425 = vst [vmem:[%s1948_s6 + $0x100] sm:$0xff] %v424_v36 }
  0x58   : > { %427 = vst [vmem:[%s1948_s6 + $0x108] sm:$0xff] %v426_v37 }
  0x59   : > { %429 = vst [vmem:[%s1948_s6 + $0x110] sm:$0xff] %v428_v38 }
  0x5a   : > { %431 = vst [vmem:[%s1948_s6 + $0x118] sm:$0xff] %v430_v39 }
  0x5b   : > { %433 = vst [vmem:[%s1948_s6 + $0x120] sm:$0xff] %v432_v40 }
  0x5c   : > { %435 = vst [vmem:[%s1948_s6 + $0x128] sm:$0xff] %v434_v41 }
  0x5d   : > { %437 = vst [vmem:[%s1948_s6 + $0x130] sm:$0xff] %v436_v42 }
  0x5e   : > { %439 = vst [vmem:[%s1948_s6 + $0x138] sm:$0xff] %v438_v43 }
  0x5f   : > { %441 = vst [vmem:[%s1948_s6 + $0x140] sm:$0xff] %v440_v44 }
  0x60   : > { %443 = vst [vmem:[%s1948_s6 + $0x148] sm:$0xff] %v442_v45 }
  0x61   : > { %445 = vst [vmem:[%s1948_s6 + $0x150] sm:$0xff] %v444_v46 }
  0x62   : > { %447 = vst [vmem:[%s1948_s6 + $0x158] sm:$0xff] %v446_v47 }
  0x63   : > { %449 = vst [vmem:[%s1948_s6 + $0x160] sm:$0xff] %v448_v48 }
  0x64   : > { %451 = vst [vmem:[%s1948_s6 + $0x168] sm:$0xff] %v450_v49 }
  0x65   : > { %453 = vst [vmem:[%s1948_s6 + $0x170] sm:$0xff] %v452_v50 }
  0x66   : > { %455 = vst [vmem:[%s1948_s6 + $0x178] sm:$0xff] %v454_v51 }
  0x67   : > { %457 = vst [vmem:[%s1948_s6 + $0x180] sm:$0xff] %v456_v52 }
  0x68   : > { %459 = vst [vmem:[%s1948_s6 + $0x188] sm:$0xff] %v458_v53 }
  0x69   : > { %461 = vst [vmem:[%s1948_s6 + $0x190] sm:$0xff] %v460_v54 }
  0x6a   : > { %463 = vst [vmem:[%s1948_s6 + $0x198] sm:$0xff] %v462_v55 }
  0x6b   : > { %465 = vst [vmem:[%s1948_s6 + $0x1a0] sm:$0xff] %v464_v56 }
  0x6c   : > { %467 = vst [vmem:[%s1948_s6 + $0x1a8] sm:$0xff] %v466_v57 }
  0x6d   : > { %469 = vst [vmem:[%s1948_s6 + $0x1b0] sm:$0xff] %v468_v58 }
  0x6e   : > { %471 = vst [vmem:[%s1948_s6 + $0x1b8] sm:$0xff] %v470_v59 }
  0x6f   : > { %473 = vst [vmem:[%s1948_s6 + $0x1c0] sm:$0xff] %v472_v60 }
  0x70   : > { %475 = vst [vmem:[%s1948_s6 + $0x1c8] sm:$0xff] %v474_v61 }
  0x71   : > { %477 = vst [vmem:[%s1948_s6 + $0x1d0] sm:$0xff] %v476_v62 }
  0x72   : > { %479 = vst [vmem:[%s1948_s6 + $0x1d8] sm:$0xff] %v478_v63 }
  0x73   : > { %481 = vst [vmem:[%s1948_s6 + $0x1e0] sm:$0xff] %v480_v0 }
  0x74   : > { %483 = vst [vmem:[%s1948_s6 + $0x1e8] sm:$0xff] %v482_v1 }
  0x75   : > { %485 = vst [vmem:[%s1948_s6 + $0x1f0] sm:$0xff] %v484_v2 }
  0x76   : > { %487 = vst [vmem:[%s1948_s6 + $0x1f8] sm:$0xff] %v486_v3 }
  0x77 PF: > { %p1276_p0 = scmp.ge.s32.totalorder %s1806_s22, 1  ;;  %p500_p1 = scmp.lt.s32.totalorder %s1806_s22, 11 }
  0x79   : > { %p501_p2 = pnand %p1276_p0, %p500_p1 }
  0x7a   : > { %s507_s0 = sand.u32 (!%p501_p2), 1, %s1782_s16   ;;  %s514_s23 = sand.u32 (!%p501_p2), 1, %s1774_s14  }
  0x7b   : > { %504 = sbr.rel (%p501_p2) target bundleno = 375 (0x177), region = 85  ;;  %s1277_s28 = sshll.u32 (!%p501_p2), %s507_s0, 5 }
  0x7c   : > { %s1278_s7 = sshll.u32 (!%p501_p2), %s514_s23, 9  ;;  %s541_s11 = sand.u32 (!%p501_p2), 1, %s1766_s12  }
  0x7d   : > { %s1280_s26 = sshll.u32 (!%p501_p2), %s1794_s19, 1  ;;  %s1279_s29 = sshll.u32 (!%p501_p2), %s541_s11, 5 }
  0x7e   : > { %p549_p3 = scmp.lt.s32.totalorder (!%p501_p2), %s1280_s26, 3  ;;  %s2087_s6 = scalar_lea.vmem (!%p501_p2), [#allocation2], %s1277_s28 }
  0x7f   : > { %s2089_s1 = scalar_lea.vmem (!%p501_p2), [#allocation3], %s1278_s7  ;;  %s2091_s25 = scalar_lea.vmem (!%p501_p2), [#allocation4], %s1279_s29 }
  0x80   : > { %s2346_s26 = smov (!%p549_p3, %s1280_s26), 3  ;;  %p1281_p4 = scmp.ne.s32.totalorder %s1790_s18, 0 }
  0x81   : > { %s551_s5 = scalar_lea.vmem %s2317_s2, %s2346_s26 }
  0x82   : > { %558 = sbr.rel (%p1281_p4) target bundleno = 140 (0x8c), region = 97 }
  0x87   : > { %v1808_v4 = vmov 0.0  }
  0x88   : > { %559 = vst [vmem:[%s2091_s25] sm:$0xff] %v1808_v4 }
  0x89   : > { %560 = vst [vmem:[%s2091_s25 + $0x8] sm:$0xff] %v1808_v4 }
  0x8a   : > { %561 = vst [vmem:[%s2091_s25 + $0x10] sm:$0xff] %v1808_v4 }
  0x8b   : > { %562 = vst [vmem:[%s2091_s25 + $0x18] sm:$0xff] %v1808_v4 }
  0x8c PF: > { %v1356_v5 = vld [vmem:[%s2089_s1 + $0x70] sm:$0xf]  ;;  %v1581_v6 = vld [vmem:[%s2089_s1 + $0x74] sm:$0xf0]  ;;  %v1348_v16 = vld [vmem:[%s2089_s1 + $0x60] sm:$0xf] }
  0x8d   : > { %v1420_v7 = vld [vmem:[%s2089_s1 + $0xf0] sm:$0xf]  ;;  %v1357_v8 = vor.u32 %v1581_v6, %v1356_v5  ;;  %v1597_v9 = vld [vmem:[%s2089_s1 + $0xf4] sm:$0xf0]  ;;  %v1579_v18 = vld [vmem:[%s2089_s1 + $0x64] sm:$0xf0] }
  0x8e   : > { %v1484_v10 = vld [vmem:[%s2089_s1 + $0x170] sm:$0xf]  ;;  %v1613_v11 = vld [vmem:[%s2089_s1 + $0x174] sm:$0xf0]  ;;  %v1421_v12 = vor.u32 %v1597_v9, %v1420_v7  ;;  %v1412_v19 = vld [vmem:[%s2089_s1 + $0xe0] sm:$0xf]  ;;  %v1349_v21 = vor.u32 %v1579_v18, %v1348_v16 }
  0x8f   : > { %v1485_v13 = vor.u32 %v1613_v11, %v1484_v10  ;;  %v1548_v14 = vld [vmem:[%s2089_s1 + $0x1f0] sm:$0xf]  ;;  %v1629_v15 = vld [vmem:[%s2089_s1 + $0x1f4] sm:$0xf0]  ;;  %975 = vmatpush.bf16.msra.mxu0 %v1357_v8  ;;  %v1595_v20 = vld [vmem:[%s2089_s1 + $0xe4] sm:$0xf0] }
  0x90   : > { %v1549_v17 = vor.u32 %v1629_v15, %v1548_v14  ;;  %989 = vmatpush.bf16.msra.mxu1 %v1421_v12  ;;  %v1413_v22 = vor.u32 %v1595_v20, %v1412_v19  ;;  %v1476_v23 = vld [vmem:[%s2089_s1 + $0x160] sm:$0xf]  ;;  %v1611_v24 = vld [vmem:[%s2089_s1 + $0x164] sm:$0xf0]  ;;  %v1340_v28 = vld [vmem:[%s2089_s1 + $0x50] sm:$0xf] }
  0x91   : > { %1003 = vmatpush.bf16.msra.mxu2 %v1485_v13  ;;  %v1540_v25 = vld [vmem:[%s2089_s1 + $0x1e0] sm:$0xf]  ;;  %v1477_v26 = vor.u32 %v1611_v24, %v1476_v23  ;;  %v1627_v27 = vld [vmem:[%s2089_s1 + $0x1e4] sm:$0xf0]  ;;  %v1577_v29 = vld [vmem:[%s2089_s1 + $0x54] sm:$0xf0] }
  0x92   : > { %1017 = vmatpush.bf16.msra.mxu3 %v1549_v17  ;;  %v1541_v30 = vor.u32 %v1627_v27, %v1540_v25  ;;  %v1404_v31 = vld [vmem:[%s2089_s1 + $0xd0] sm:$0xf]  ;;  %v1593_v32 = vld [vmem:[%s2089_s1 + $0xd4] sm:$0xf0]  ;;  %v1341_v34 = vor.u32 %v1577_v29, %v1340_v28  ;;  %v1332_v40 = vld [vmem:[%s2089_s1 + $0x40] sm:$0xf] }
  0x93   : > { %v1468_v33 = vld [vmem:[%s2089_s1 + $0x150] sm:$0xf]  ;;  %976 = vmatpush.bf16.msra.mxu0 %v1349_v21  ;;  %v1609_v35 = vld [vmem:[%s2089_s1 + $0x154] sm:$0xf0]  ;;  %v1405_v38 = vor.u32 %v1593_v32, %v1404_v31  ;;  %v1575_v41 = vld [vmem:[%s2089_s1 + $0x44] sm:$0xf0] }
  0x94   : > { %v1532_v36 = vld [vmem:[%s2089_s1 + $0x1d0] sm:$0xf]  ;;  %v1625_v37 = vld [vmem:[%s2089_s1 + $0x1d4] sm:$0xf0]  ;;  %990 = vmatpush.bf16.msra.mxu1 %v1413_v22  ;;  %v1469_v39 = vor.u32 %v1609_v35, %v1468_v33  ;;  %v1396_v42 = vld [vmem:[%s2089_s1 + $0xc0] sm:$0xf]  ;;  %v1333_v49 = vor.u32 %v1575_v41, %v1332_v40 }
  0x95   : > { %1004 = vmatpush.bf16.msra.mxu2 %v1477_v26  ;;  %v1533_v43 = vor.u32 %v1625_v37, %v1532_v36  ;;  %v1591_v44 = vld [vmem:[%s2089_s1 + $0xc4] sm:$0xf0]  ;;  %v1460_v45 = vld [vmem:[%s2089_s1 + $0x140] sm:$0xf]  ;;  %v1324_v52 = vld [vmem:[%s2089_s1 + $0x30] sm:$0xf] }
  0x96   : > { %1018 = vmatpush.bf16.msra.mxu3 %v1541_v30  ;;  %v1607_v46 = vld [vmem:[%s2089_s1 + $0x144] sm:$0xf0]  ;;  %v1524_v47 = vld [vmem:[%s2089_s1 + $0x1c0] sm:$0xf]  ;;  %v1397_v50 = vor.u32 %v1591_v44, %v1396_v42  ;;  %v1573_v53 = vld [vmem:[%s2089_s1 + $0x34] sm:$0xf0] }
  0x97   : > { %v1623_v48 = vld [vmem:[%s2089_s1 + $0x1c4] sm:$0xf0]  ;;  %977 = vmatpush.bf16.msra.mxu0 %v1341_v34  ;;  %v1461_v51 = vor.u32 %v1607_v46, %v1460_v45  ;;  %v1388_v54 = vld [vmem:[%s2089_s1 + $0xb0] sm:$0xf]  ;;  %v1589_v56 = vld [vmem:[%s2089_s1 + $0xb4] sm:$0xf0]  ;;  %v1325_v61 = vor.u32 %v1573_v53, %v1324_v52 }
  0x98   : > { %991 = vmatpush.bf16.msra.mxu1 %v1405_v38  ;;  %v1525_v55 = vor.u32 %v1623_v48, %v1524_v47  ;;  %v1452_v57 = vld [vmem:[%s2089_s1 + $0x130] sm:$0xf]  ;;  %v1605_v58 = vld [vmem:[%s2089_s1 + $0x134] sm:$0xf0]  ;;  %v1389_v62 = vor.u32 %v1589_v56, %v1388_v54  ;;  %v1316_v0 = vld [vmem:[%s2089_s1 + $0x20] sm:$0xf] }
  0x99   : > { %1005 = vmatpush.bf16.msra.mxu2 %v1469_v39  ;;  %v1516_v59 = vld [vmem:[%s2089_s1 + $0x1b0] sm:$0xf]  ;;  %v1621_v60 = vld [vmem:[%s2089_s1 + $0x1b4] sm:$0xf0]  ;;  %v1453_v63 = vor.u32 %v1605_v58, %v1452_v57  ;;  %v1571_v1 = vld [vmem:[%s2089_s1 + $0x24] sm:$0xf0] }
  0x9a   : > { %1019 = vmatpush.bf16.msra.mxu3 %v1533_v43  ;;  %v1380_v2 = vld [vmem:[%s2089_s1 + $0xa0] sm:$0xf]  ;;  %v1517_v3 = vor.u32 %v1621_v60, %v1516_v59  ;;  %v1587_v4 = vld [vmem:[%s2089_s1 + $0xa4] sm:$0xf0]  ;;  %v1317_v9 = vor.u32 %v1571_v1, %v1316_v0  ;;  %v1308_v12 = vld [vmem:[%s2089_s1 + $0x10] sm:$0xf] }
  0x9b   : > { %978 = vmatpush.bf16.msra.mxu0 %v1333_v49  ;;  %v1444_v5 = vld [vmem:[%s2089_s1 + $0x120] sm:$0xf]  ;;  %v1603_v6 = vld [vmem:[%s2089_s1 + $0x124] sm:$0xf0]  ;;  %v1381_v10 = vor.u32 %v1587_v4, %v1380_v2  ;;  %v1569_v13 = vld [vmem:[%s2089_s1 + $0x14] sm:$0xf0] }
  0x9c   : > { %992 = vmatpush.bf16.msra.mxu1 %v1397_v50  ;;  %v1508_v7 = vld [vmem:[%s2089_s1 + $0x1a0] sm:$0xf]  ;;  %v1619_v8 = vld [vmem:[%s2089_s1 + $0x1a4] sm:$0xf0]  ;;  %v1445_v11 = vor.u32 %v1603_v6, %v1444_v5  ;;  %v1372_v14 = vld [vmem:[%s2089_s1 + $0x90] sm:$0xf]  ;;  %v1309_v22 = vor.u32 %v1569_v13, %v1308_v12 }
  0x9d   : > { %1006 = vmatpush.bf16.msra.mxu2 %v1461_v51  ;;  %v1509_v15 = vor.u32 %v1619_v8, %v1508_v7  ;;  %v1585_v16 = vld [vmem:[%s2089_s1 + $0x94] sm:$0xf0]  ;;  %v1436_v17 = vld [vmem:[%s2089_s1 + $0x110] sm:$0xf]  ;;  %v1300_v21 = vld [vmem:[%s2089_s1] sm:$0xf] }
  0x9e   : > { %1020 = vmatpush.bf16.msra.mxu3 %v1525_v55  ;;  %v1601_v18 = vld [vmem:[%s2089_s1 + $0x114] sm:$0xf0]  ;;  %v1500_v19 = vld [vmem:[%s2089_s1 + $0x190] sm:$0xf]  ;;  %v1567_v23 = vld [vmem:[%s2089_s1 + $0x4] sm:$0xf0]  ;;  %v1373_v26 = vor.u32 %v1585_v16, %v1372_v14 }
  0x9f   : > { %979 = vmatpush.bf16.msra.mxu0 %v1325_v61  ;;  %v1617_v20 = vld [vmem:[%s2089_s1 + $0x194] sm:$0xf0]  ;;  %v1364_v24 = vld [vmem:[%s2089_s1 + $0x80] sm:$0xf]  ;;  %v1583_v25 = vld [vmem:[%s2089_s1 + $0x84] sm:$0xf0]  ;;  %v1437_v27 = vor.u32 %v1601_v18, %v1436_v17  ;;  %v1301_v38 = vor.u32 %v1567_v23, %v1300_v21 }
  0xa0   : > { %993 = vmatpush.bf16.msra.mxu1 %v1389_v62  ;;  %v1428_v28 = vld [vmem:[%s2089_s1 + $0x100] sm:$0xf]  ;;  %v1599_v29 = vld [vmem:[%s2089_s1 + $0x104] sm:$0xf0]  ;;  %v1501_v31 = vor.u32 %v1617_v20, %v1500_v19  ;;  %v1580_v33 = vld [vmem:[%s2089_s1 + $0x74] sm:$0xf]  ;;  %v1365_v42 = vor.u32 %v1583_v25, %v1364_v24 }
  0xa1   : > { %1007 = vmatpush.bf16.msra.mxu2 %v1453_v63  ;;  %v1492_v30 = vld [vmem:[%s2089_s1 + $0x180] sm:$0xf]  ;;  %v1615_v32 = vld [vmem:[%s2089_s1 + $0x184] sm:$0xf0]  ;;  %v1358_v34 = vld [vmem:[%s2089_s1 + $0x78] sm:$0xf0]  ;;  %v1429_v43 = vor.u32 %v1599_v29, %v1428_v28 }
  0xa2   : > { %1021 = vmatpush.bf16.msra.mxu3 %v1517_v3  ;;  %v1596_v35 = vld [vmem:[%s2089_s1 + $0xf4] sm:$0xf]  ;;  %v1422_v36 = vld [vmem:[%s2089_s1 + $0xf8] sm:$0xf0]  ;;  %v1578_v44 = vld [vmem:[%s2089_s1 + $0x64] sm:$0xf]  ;;  %v1493_v48 = vor.u32 %v1615_v32, %v1492_v30  ;;  %v1361_v49 = vor.u32 %v1580_v33, %v1358_v34 }
  0xa3   : > { %980 = vmatpush.bf16.msra.mxu0 %v1317_v9  ;;  %v1612_v37 = vld [vmem:[%s2089_s1 + $0x174] sm:$0xf]  ;;  %v1486_v39 = vld [vmem:[%s2089_s1 + $0x178] sm:$0xf0]  ;;  %v1350_v45 = vld [vmem:[%s2089_s1 + $0x68] sm:$0xf0]  ;;  %v1425_v54 = vor.u32 %v1596_v35, %v1422_v36 }
  0xa4   : > { %994 = vmatpush.bf16.msra.mxu1 %v1381_v10  ;;  %v1628_v40 = vld [vmem:[%s2089_s1 + $0x1f4] sm:$0xf]  ;;  %v1550_v41 = vld [vmem:[%s2089_s1 + $0x1f8] sm:$0xf0]  ;;  %v1292_v46 = vld [vmem:[%s2087_s6 + $0x8] sm:$0xf]  ;;  %v1489_v55 = vor.u32 %v1612_v37, %v1486_v39  ;;  %v1353_v4 = vor.u32 %v1578_v44, %v1350_v45 }
  0xa5   : > { %1008 = vmatpush.bf16.msra.mxu2 %v1445_v11  ;;  %v1565_v47 = vld [vmem:[%s2087_s6 + $0x14] sm:$0xf0]  ;;  %v1594_v50 = vld [vmem:[%s2089_s1 + $0xe4] sm:$0xf]  ;;  %v1414_v51 = vld [vmem:[%s2089_s1 + $0xe8] sm:$0xf0]  ;;  %v1553_v59 = vor.u32 %v1628_v40, %v1550_v41 }
  0xa6   : > { %1022 = vmatpush.bf16.msra.mxu3 %v1509_v15  ;;  %v1610_v52 = vld [vmem:[%s2089_s1 + $0x164] sm:$0xf]  ;;  %v1478_v53 = vld [vmem:[%s2089_s1 + $0x168] sm:$0xf0]  ;;  %v1294_v57 = vld [vmem:[%s2087_s6 + $0x18] sm:$0xf0]  ;;  %v2181_v60 = vor.u32 %v1565_v47, %v1292_v46  ;;  %v1417_v6 = vor.u32 %v1594_v50, %v1414_v51 }
  0xa7   : > { %981 = vmatpush.bf16.msra.mxu0 %v1309_v22  ;;  %v1563_v56 = vld [vmem:[%s2087_s6 + $0xc] sm:$0xf]  ;;  %v1284_v58 = vld [vmem:[%s2087_s6] sm:$0xf]  ;;  %v1564_v61 = vld [vmem:[%s2087_s6 + $0xc] sm:$0xf0]  ;;  %v1481_v7 = vor.u32 %v1610_v52, %v1478_v53 }
  0xa8   : > { %995 = vmatpush.bf16.msra.mxu1 %v1373_v26  ;;  %v1562_v62 = vld [vmem:[%s2087_s6 + $0x4] sm:$0xf]  ;;  %v1286_v63 = vld [vmem:[%s2087_s6 + $0x10] sm:$0xf0]  ;;  %v1542_v1 = vld [vmem:[%s2089_s1 + $0x1e8] sm:$0xf0]  ;;  %v2188_v2 = vor.u32 %v1563_v56, %v1294_v57  ;;  %v2190_v3 = vor.u32 %v1564_v61, %v1284_v58 }
  0xa9   : > { %1009 = vmatpush.bf16.msra.mxu2 %v1437_v27  ;;  %v1626_v0 = vld [vmem:[%s2089_s1 + $0x1e4] sm:$0xf]  ;;  %v2192_v5 = vor.u32 %v1562_v62, %v1286_v63  ;;  %v1576_v8 = vld [vmem:[%s2089_s1 + $0x54] sm:$0xf]  ;;  %v1342_v9 = vld [vmem:[%s2089_s1 + $0x58] sm:$0xf0] }
  0xaa   : > { %1023 = vmatpush.bf16.msra.mxu3 %v1501_v31  ;;  %v1592_v10 = vld [vmem:[%s2089_s1 + $0xd4] sm:$0xf]  ;;  %v1545_v11 = vor.u32 %v1626_v0, %v1542_v1  ;;  %v1406_v12 = vld [vmem:[%s2089_s1 + $0xd8] sm:$0xf0]  ;;  %v1345_v17 = vor.u32 %v1576_v8, %v1342_v9  ;;  %v1574_v20 = vld [vmem:[%s2089_s1 + $0x44] sm:$0xf] }
  0xab   : > { %982 = vmatpush.bf16.msra.mxu0 %v1301_v38  ;;  %v1608_v13 = vld [vmem:[%s2089_s1 + $0x154] sm:$0xf]  ;;  %v1470_v14 = vld [vmem:[%s2089_s1 + $0x158] sm:$0xf0]  ;;  %v1409_v18 = vor.u32 %v1592_v10, %v1406_v12  ;;  %v1334_v21 = vld [vmem:[%s2089_s1 + $0x48] sm:$0xf0] }
  0xac   : > { %996 = vmatpush.bf16.msra.mxu1 %v1365_v42  ;;  %v1624_v15 = vld [vmem:[%s2089_s1 + $0x1d4] sm:$0xf]  ;;  %v1534_v16 = vld [vmem:[%s2089_s1 + $0x1d8] sm:$0xf0]  ;;  %v1473_v19 = vor.u32 %v1608_v13, %v1470_v14  ;;  %v1590_v22 = vld [vmem:[%s2089_s1 + $0xc4] sm:$0xf]  ;;  %v1337_v29 = vor.u32 %v1574_v20, %v1334_v21 }
  0xad   : > { %1010 = vmatpush.bf16.msra.mxu2 %v1429_v43  ;;  %v1537_v23 = vor.u32 %v1624_v15, %v1534_v16  ;;  %v1398_v24 = vld [vmem:[%s2089_s1 + $0xc8] sm:$0xf0]  ;;  %v1606_v25 = vld [vmem:[%s2089_s1 + $0x144] sm:$0xf]  ;;  %v1572_v32 = vld [vmem:[%s2089_s1 + $0x34] sm:$0xf] }
  0xae   : > { %1024 = vmatpush.bf16.msra.mxu3 %v1493_v48  ;;  %983 = vmatmul.bf16.vlgmr.msra.gmra.mxu0 %v2190_v3  ;;  %v1462_v26 = vld [vmem:[%s2089_s1 + $0x148] sm:$0xf0]  ;;  %v1622_v27 = vld [vmem:[%s2089_s1 + $0x1c4] sm:$0xf]  ;;  %v1401_v30 = vor.u32 %v1590_v22, %v1398_v24  ;;  %v1326_v33 = vld [vmem:[%s2089_s1 + $0x38] sm:$0xf0] }
  0xaf   : > { %1031 = vmatpush.bf16.msrb.mxu0 %v1361_v49  ;;  %997 = vmatmul.bf16.vlgmr.msra.gmra.mxu1 %v2192_v5  ;;  %v1526_v28 = vld [vmem:[%s2089_s1 + $0x1c8] sm:$0xf0]  ;;  %v1465_v31 = vor.u32 %v1606_v25, %v1462_v26  ;;  %v1588_v34 = vld [vmem:[%s2089_s1 + $0xb4] sm:$0xf]  ;;  %v1390_v36 = vld [vmem:[%s2089_s1 + $0xb8] sm:$0xf0]  ;;  %v1329_v41 = vor.u32 %v1572_v32, %v1326_v33 }
  0xb0   : > { %1045 = vmatpush.bf16.msrb.mxu1 %v1425_v54  ;;  %1011 = vmatmul.bf16.vlgmr.msra.gmra.mxu2 %v2181_v60  ;;  %v1529_v35 = vor.u32 %v1622_v27, %v1526_v28  ;;  %v1604_v37 = vld [vmem:[%s2089_s1 + $0x134] sm:$0xf]  ;;  %v1454_v38 = vld [vmem:[%s2089_s1 + $0x138] sm:$0xf0]  ;;  %v1393_v42 = vor.u32 %v1588_v34, %v1390_v36  ;;  %v1570_v44 = vld [vmem:[%s2089_s1 + $0x24] sm:$0xf] }
  0xb1   : > { %1059 = vmatpush.bf16.msrb.mxu2 %v1489_v55  ;;  %1025 = vmatmul.bf16.vlgmr.msra.gmra.mxu3 %v2188_v2  ;;  %v1620_v39 = vld [vmem:[%s2089_s1 + $0x1b4] sm:$0xf]  ;;  %v1518_v40 = vld [vmem:[%s2089_s1 + $0x1b8] sm:$0xf0]  ;;  %v1457_v43 = vor.u32 %v1604_v37, %v1454_v38  ;;  %v1318_v45 = vld [vmem:[%s2089_s1 + $0x28] sm:$0xf0] }
  0xb2   : > { %1073 = vmatpush.bf16.msrb.mxu3 %v1553_v59  ;;  %v1586_v46 = vld [vmem:[%s2089_s1 + $0xa4] sm:$0xf]  ;;  %v1521_v47 = vor.u32 %v1620_v39, %v1518_v40  ;;  %v1382_v48 = vld [vmem:[%s2089_s1 + $0xa8] sm:$0xf0]  ;;  %v1321_v53 = vor.u32 %v1570_v44, %v1318_v45  ;;  %v1568_v56 = vld [vmem:[%s2089_s1 + $0x14] sm:$0xf] }
  0xb3   : > { %1032 = vmatpush.bf16.msrb.mxu0 %v1353_v4  ;;  %v1602_v49 = vld [vmem:[%s2089_s1 + $0x124] sm:$0xf]  ;;  %v1446_v50 = vld [vmem:[%s2089_s1 + $0x128] sm:$0xf0]  ;;  %v1385_v54 = vor.u32 %v1586_v46, %v1382_v48  ;;  %v1310_v57 = vld [vmem:[%s2089_s1 + $0x18] sm:$0xf0] }
  0xb4   : > { %1046 = vmatpush.bf16.msrb.mxu1 %v1417_v6  ;;  %v1618_v51 = vld [vmem:[%s2089_s1 + $0x1a4] sm:$0xf]  ;;  %v1510_v52 = vld [vmem:[%s2089_s1 + $0x1a8] sm:$0xf0]  ;;  %v1449_v55 = vor.u32 %v1602_v49, %v1446_v50  ;;  %v1584_v58 = vld [vmem:[%s2089_s1 + $0x94] sm:$0xf]  ;;  %v1313_v4 = vor.u32 %v1568_v56, %v1310_v57 }
  0xb5   : > { %1060 = vmatpush.bf16.msrb.mxu2 %v1481_v7  ;;  %v1513_v59 = vor.u32 %v1618_v51, %v1510_v52  ;;  %v1374_v61 = vld [vmem:[%s2089_s1 + $0x98] sm:$0xf0]  ;;  %v1600_v62 = vld [vmem:[%s2089_s1 + $0x114] sm:$0xf]  ;;  %v1566_v8 = vld [vmem:[%s2089_s1 + $0x4] sm:$0xf] }
  0xb6   : > { %1074 = vmatpush.bf16.msrb.mxu3 %v1545_v11  ;;  %v1438_v63 = vld [vmem:[%s2089_s1 + $0x118] sm:$0xf0]  ;;  %v1616_v0 = vld [vmem:[%s2089_s1 + $0x194] sm:$0xf]  ;;  %v1377_v6 = vor.u32 %v1584_v58, %v1374_v61  ;;  %v1302_v9 = vld [vmem:[%s2089_s1 + $0x8] sm:$0xf0] }
  0xb7   : > { %1033 = vmatpush.bf16.msrb.mxu0 %v1345_v17  ;;  %v1502_v1 = vld [vmem:[%s2089_s1 + $0x198] sm:$0xf0]  ;;  %v1441_v7 = vor.u32 %v1600_v62, %v1438_v63  ;;  %v1582_v10 = vld [vmem:[%s2089_s1 + $0x84] sm:$0xf]  ;;  %v1366_v12 = vld [vmem:[%s2089_s1 + $0x88] sm:$0xf0]  ;;  %v1305_v17 = vor.u32 %v1566_v8, %v1302_v9 }
  0xb8   : > { %1047 = vmatpush.bf16.msrb.mxu1 %v1409_v18  ;;  %v1505_v11 = vor.u32 %v1616_v0, %v1502_v1  ;;  %v1598_v13 = vld [vmem:[%s2089_s1 + $0x104] sm:$0xf]  ;;  %v1430_v14 = vld [vmem:[%s2089_s1 + $0x108] sm:$0xf0]  ;;  %v1369_v18 = vor.u32 %v1582_v10, %v1366_v12  ;;  %v566_v49 = vld [vmem:[%s2091_s25 + $0x18] sm:$0xff]  ;;  %p1554_p5 = scmp.ne.s32.totalorder %s1790_s18, 4 }
  0xb9   : > { %1061 = vmatpush.bf16.msrb.mxu2 %v1473_v19  ;;  %v1614_v15 = vld [vmem:[%s2089_s1 + $0x184] sm:$0xf]  ;;  %v1494_v16 = vld [vmem:[%s2089_s1 + $0x188] sm:$0xf0]  ;;  %v1433_v19 = vor.u32 %v1598_v13, %v1430_v14 }
  0xba   : > { %1075 = vmatpush.bf16.msrb.mxu3 %v1537_v23  ;;  %v1497_v20 = vor.u32 %v1614_v15, %v1494_v16  ;;  %v563_v27 = vld [vmem:[%s2091_s25] sm:$0xff] }
  0xbb   : > { %1034 = vmatpush.bf16.msrb.mxu0 %v1337_v29 }
  0xbc   : > { %1048 = vmatpush.bf16.msrb.mxu1 %v1401_v30 }
  0xbd   : > { %1062 = vmatpush.bf16.msrb.mxu2 %v1465_v31 }
  0xbe   : > { %1076 = vmatpush.bf16.msrb.mxu3 %v1529_v35 }
  0xbf   : > { %1035 = vmatpush.bf16.msrb.mxu0 %v1329_v41  ;;  %v564_v41 = vld [vmem:[%s2091_s25 + $0x8] sm:$0xff] }
  0xc0   : > { %1049 = vmatpush.bf16.msrb.mxu1 %v1393_v42 }
  0xc1   : > { %1063 = vmatpush.bf16.msrb.mxu2 %v1457_v43 }
  0xc2   : > { %1077 = vmatpush.bf16.msrb.mxu3 %v1521_v47 }
  0xc3   : > { %1036 = vmatpush.bf16.msrb.mxu0 %v1321_v53 }
  0xc4   : > { %1050 = vmatpush.bf16.msrb.mxu1 %v1385_v54 }
  0xc5   : > { %1064 = vmatpush.bf16.msrb.mxu2 %v1449_v55 }
  0xc6   : > { %1078 = vmatpush.bf16.msrb.mxu3 %v1513_v59 }
  0xc7   : > { %1037 = vmatpush.bf16.msrb.mxu0 %v1313_v4 }
  0xc8   : > { %1051 = vmatpush.bf16.msrb.mxu1 %v1377_v6 }
  0xc9   : > { %1065 = vmatpush.bf16.msrb.mxu2 %v1441_v7 }
  0xca   : > { %1079 = vmatpush.bf16.msrb.mxu3 %v1505_v11 }
  0xcb   : > { %1038 = vmatpush.bf16.msrb.mxu0 %v1305_v17 }
  0xcc   : > { %1052 = vmatpush.bf16.msrb.mxu1 %v1369_v18 }
  0xcd   : > { %1066 = vmatpush.bf16.msrb.mxu2 %v1433_v19 }
  0xce   : > { %1080 = vmatpush.bf16.msrb.mxu3 %v1497_v20  ;;  %1039 = vmatmul.bf16.vlgmr.msrb.gmra.mxu0 %v2190_v3 }
  0xcf   : > { %1053 = vmatmul.bf16.vlgmr.msrb.gmra.mxu1 %v2192_v5 }
  0xd0   : > { %1067 = vmatmul.bf16.vlgmr.msrb.gmra.mxu2 %v2181_v60 }
  0xd1   : > { %1081 = vmatmul.bf16.vlgmr.msrb.gmra.mxu3 %v2188_v2  ;;  %v565_v2 = vld [vmem:[%s2091_s25 + $0x10] sm:$0xff] }
 0x12b   : > { %v984_v21 = vpop.f32.mrf.mxu0 }
 0x12c   : > { %v998_v22 = vpop.f32.mrf.mxu1 }
 0x12d   : > { %v999_v23 = vadd.f32 %v998_v22, %v984_v21 }
 0x133   : > { %v1012_v24 = vpop.f32.mrf.mxu2  ;;  %v986_v29 = vpop.f32.mrf.mxu0 }
 0x134   : > { %v1013_v25 = vadd.f32 %v1012_v24, %v999_v23  ;;  %v1026_v26 = vpop.f32.mrf.mxu3  ;;  %v1000_v30 = vpop.f32.mrf.mxu1 }
 0x135   : > { %v1001_v31 = vadd.f32 %v1000_v30, %v986_v29 }
 0x136   : > { %v1027_v28 = vadd.f32 %v1026_v26, %v1013_v25 }
 0x138   : > { %v1087_v3 = vadd.f32 %v1027_v28, %v563_v27 }
 0x13a   : > { %1091 = vst [vmem:[%s2091_s25] sm:$0xff] %v1087_v3 }
 0x13b   : > { %v1014_v5 = vpop.f32.mrf.mxu2 }
 0x13c   : > { %v1015_v60 = vadd.f32 %v1014_v5, %v1001_v31  ;;  %v1028_v32 = vpop.f32.mrf.mxu3 }
 0x13e   : > { %v1029_v33 = vadd.f32 %v1028_v32, %v1015_v60 }
 0x140   : > { %v1089_v34 = vadd.f32 %v1029_v33, %v565_v2 }
 0x142   : > { %1093 = vst [vmem:[%s2091_s25 + $0x10] sm:$0xff] %v1089_v34 }
 0x14b   : > { %v1040_v35 = vpop.f32.mrf.mxu0 }
 0x14c   : > { %v1054_v36 = vpop.f32.mrf.mxu1 }
 0x14d   : > { %v1055_v37 = vadd.f32 %v1054_v36, %v1040_v35 }
 0x153   : > { %v1068_v38 = vpop.f32.mrf.mxu2  ;;  %v1042_v43 = vpop.f32.mrf.mxu0 }
 0x154   : > { %v1069_v39 = vadd.f32 %v1068_v38, %v1055_v37  ;;  %v1082_v40 = vpop.f32.mrf.mxu3  ;;  %v1056_v44 = vpop.f32.mrf.mxu1 }
 0x155   : > { %v1057_v46 = vadd.f32 %v1056_v44, %v1042_v43 }
 0x156   : > { %v1083_v42 = vadd.f32 %v1082_v40, %v1069_v39 }
 0x158   : > { %v1088_v45 = vadd.f32 %v1083_v42, %v564_v41 }
 0x15a   : > { %1092 = vst [vmem:[%s2091_s25 + $0x8] sm:$0xff] %v1088_v45 }
 0x15b   : > { %v1070_v47 = vpop.f32.mrf.mxu2 }
 0x15c   : > { %v1071_v48 = vadd.f32 %v1070_v47, %v1057_v46  ;;  %v1084_v50 = vpop.f32.mrf.mxu3 }
 0x15e   : > { %v1085_v51 = vadd.f32 %v1084_v50, %v1071_v48  ;;  %1098 = sbr.rel (%p1554_p5) target bundleno = 367 (0x16f), region = 101 }
 0x160   : > { %v1090_v52 = vadd.f32 %v1085_v51, %v566_v49 }
 0x162   : > { %1094 = vst [vmem:[%s2091_s25 + $0x18] sm:$0xff] %v1090_v52 }
 0x163   : > { %v1099_v53 = vld [vmem:[%s2091_s25] sm:$0xff]  ;;  %v1100_v55 = vld [vmem:[%s2091_s25 + $0x8] sm:$0xff]  ;;  %v1101_v58 = vld [vmem:[%s2091_s25 + $0x10] sm:$0xff] }
 0x164   : > { %v1103_v54 = vld [vmem:[%s551_s5] sm:$0x3] }
 0x165   : > { %v1105_v56 = vperm.slane %v1103_v54, 0  ;;  %v1106_v57 = vperm.slane %v1103_v54, 1 }
 0x167   : > { %v1109_v61 = vadd.f32 %v1105_v56, %v1099_v53  ;;  %v1110_v62 = vadd.f32 %v1106_v57, %v1100_v55  ;;  %v1111_v63 = vadd.f32 %v1105_v56, %v1101_v58 }
 0x169   : > { %v1102_v59 = vld [vmem:[%s2091_s25 + $0x18] sm:$0xff]  ;;  %v1113_v1 = vmax.f32 %v1109_v61, 0.0  ;;  %v1114_v4 = vmax.f32 %v1110_v62, 0.0  ;;  %v1115_v6 = vmax.f32 %v1111_v63, 0.0 }
 0x16a   : > { %v1112_v0 = vadd.f32 %v1106_v57, %v1102_v59 }
 0x16b   : > { %1117 = vst [vmem:[%s2091_s25] sm:$0xff] %v1113_v1 }
 0x16c   : > { %v1116_v7 = vmax.f32 %v1112_v0, 0.0  ;;  %1118 = vst [vmem:[%s2091_s25 + $0x8] sm:$0xff] %v1114_v4 }
 0x16d   : > { %1119 = vst [vmem:[%s2091_s25 + $0x10] sm:$0xff] %v1115_v6 }
 0x16e   : > { %1120 = vst [vmem:[%s2091_s25 + $0x18] sm:$0xff] %v1116_v7 }
 0x16f PF: > { %1127 = sbr.rel (!%p1923_p12) target bundleno = 375 (0x177), region = 105  ;;  %s1630_s14 = sshll.u32 (%p1923_p12), %s1794_s19, 4 }
 0x170   : > { %s1133_s0 = scalar_lea.vmem (%p1923_p12), %s2318_s3, %s1630_s14 }
 0x172   : > { %v1146_v8 = vld [vmem:[%s2091_s25] sm:$0xff] (%p1923_p12) }
 0x173   : > { %v1148_v9 = vld [vmem:[%s2091_s25 + $0x8] sm:$0xff] (%p1923_p12)  ;;  %1147 = vst [vmem:[%s1133_s0] sm:$0xff] (%p1923_p12), %v1146_v8 }
 0x174   : > { %v1150_v10 = vld [vmem:[%s2091_s25 + $0x10] sm:$0xff]  ;;  %1149 = vst [vmem:[%s1133_s0 + $0x8] sm:$0xff] %v1148_v9 }
 0x175   : > { %v1152_v11 = vld [vmem:[%s2091_s25 + $0x18] sm:$0xff]  ;;  %1151 = vst [vmem:[%s1133_s0 + $0x20] sm:$0xff] %v1150_v10 }
 0x176   : > { %1153 = vst [vmem:[%s1133_s0 + $0x28] sm:$0xff] %v1152_v11 }
 0x177 PF: > { %s13_s22 = sadd.s32 1, %s1806_s22   ;;  %s2328_s10 = sld [smem:[#allocation5_spill]] }
 0x178   : > { %p10_p6 = scmp.ge.s32.totalorder %s13_s22, 12   ;;  %s2329_s12 = smov %s1770_s13 }
 0x179   : > { %s2330_s13 = smov %s1921_s9  ;;  %s2331_s14 = smov %s1778_s15 }
 0x17a   : > { %s2332_s15 = smov %s1918_s8  ;;  %s2333_s16 = smov %s1786_s17 }
 0x17b   : > { %s2334_s17 = smov %s1904_s30  ;;  %s2335_s18 = smov %s1798_s20 }
 0x17c   : > { %s2336_s19 = smov %s1802_s21  ;;  %s2337_s20 = smov %s2340_s24 }
 0x17d   : > { %s2338_s21 = smov %s2328_s10  ;;  %12 = sbr.rel (!%p10_p6) target bundleno = 9 (0x9), region = 170 }

// kernel: alexnet_forward.15
= control target key start
LH: loop header
LB: loop body
LE: loop exit
PB: predicated region body
PF: predicated region fallthrough
CT: control target
= control target key end

     0   :  { %s2315_s0 = inlined_call_operand.vmem [shape: bf16[16,3584], index: 0, kind: input, shape index: {}]   ;;  %s2316_s1 = inlined_call_operand.vmem [shape: bf16[3584,512], index: 1, kind: input, shape index: {}]   ;;  %s2317_s2 = inlined_call_operand.vmem [shape: f32[1,512], index: 2, kind: input, shape index: {}]   ;;  %s2318_s3 = inlined_call_operand.vmem [shape: f32[16,512], index: 3, kind: output, shape index: {}]  }
   0x1   :  { %2320 = sst [smem:[#allocation6_spill]] %s2315_s0 }
   0x2   :  { %2321 = sst [smem:[#allocation7_spill]] %s2316_s1 }
   0x3   :  { %s1829_s12 = smov 0   ;;  %s1831_s13 = smov 0  }
   0x4   :  { %s1833_s14 = smov 0   ;;  %s1835_s15 = smov 0  }
   0x5   :  { %s1837_s16 = smov 0   ;;  %s1839_s17 = smov 0  }
   0x6   :  { %s1841_s18 = smov 0   ;;  %s1843_s19 = smov 0  }
   0x7   :  { %s1845_s20 = smov 0   ;;  %s1847_s21 = smov 0  }
   0x8   :  { %s1849_s22 = smov 0  }
   0x9 LB: > { %s1264_s23 = sadd.s32 4294967295, %s1806_s22   ;;  %s25_s24 = sadd.s32 1, %s1798_s20  ;;  %s1806_s22 = sphi %s1849_s22, %s13_s22   ;;  %s1802_s21 = sphi %s1847_s21, %s2338_s21   ;;  %s1798_s20 = sphi %s1845_s20, %s2337_s20   ;;  %s1794_s19 = sphi %s1843_s19, %s2336_s19   ;;  %s1790_s18 = sphi %s1841_s18, %s2335_s18   ;;  %s1786_s17 = sphi %s1839_s17, %s2334_s17   ;;  %s1782_s16 = sphi %s1837_s16, %s2333_s16   ;;  %s1778_s15 = sphi %s1835_s15, %s2332_s15   ;;  %s1774_s14 = sphi %s1833_s14, %s2331_s14   ;;  %s1770_s13 = sphi %s1831_s13, %s2330_s13   ;;  %s1766_s12 = sphi %s1829_s12, %s2329_s12  }
   0xa   : > { %p26_p0 = scmp.ge.s32.totalorder %s25_s24, 7  ;;  %s28_s25 = sadd.s32 1, %s1802_s21 }
   0xb   : > { %s41_s26 = sadd.s32 1, %s1786_s17  ;;  %p48_p1 = scmp.ne.s32.totalorder %s1786_s17, %s1782_s16 }
   0xc   : > { %s2340_s24 = smov (%p26_p0, %s25_s24), 0  ;;  %s2342_s25 = smov (!%p26_p0, %s28_s25), %s1802_s21 }
   0xd   : > { %s37_s27 = ssub.s32 %s1798_s20, %s2340_s24  ;;  %p49_p2 = scmp.eq.s32.totalorder %s1806_s22, 0 }
   0xe   : > { %p30_p3 = scmp.ge.s32.totalorder %s2342_s25, 2  ;;  %p39_p4 = scmp.eq.s32.totalorder %s37_s27, 0 }
   0xf   : > { %p1896_p5 = por %p49_p2, %p48_p1  ;;  %s69_s29 = sadd.s32 1, %s1778_s15 }
  0x10   : > { %s2344_s25 = smov (%p30_p3, %s2342_s25), 0  ;;  %p76_p6 = scmp.ne.s32.totalorder %s1778_s15, %s1774_s14 }
  0x11   : > { %2323 = sst [smem:[#allocation5_spill]] %s2344_s25  ;;  %s65_s4 = ssub.s32 %s1802_s21, %s2344_s25 }
  0x12   : > { %s1904_s30 = scalar_select %p39_p4, %s1786_s17, %s41_s26  }
  0x13   : > { %s66_s5 = sor.u32 %s65_s4, %s37_s27  ;;  %p121_p7 = scmp.eq.s32.totalorder %s65_s4, 0 }
  0x14   : > { %p67_p8 = scmp.eq.s32.totalorder %s66_s5, 0  ;;  %p1910_p9 = por %p76_p6, %p49_p2 }
  0x15   : > { %s123_s7 = sadd.s32 1, %s1770_s13  ;;  %p133_p10 = scmp.ne.s32.totalorder %s1770_s13, %s1766_s12 }
  0x16   : > { %s1918_s8 = scalar_select %p67_p8, %s1778_s15, %s69_s29  }
  0x17   : > { %s1921_s9 = scalar_select %p121_p7, %s1770_s13, %s123_s7  }
  0x18   : > { %p134_p11 = scmp.eq.s32.totalorder %s1264_s23, 13  ;;  %p1267_p13 = scmp.ge.s32.totalorder %s1806_s22, 14 }
  0x1a   : > { %p1923_p12 = por %p134_p11, %p133_p10  ;;  %156 = sbr.rel (%p1267_p13) target bundleno = 119 (0x77), region = 16 }
  0x1f   : > { %159 = sbr.rel (!%p1896_p5) target bundleno = 45 (0x2d), region = 20  ;;  %s161_s11 = sand.u32 (%p1896_p5), 1, %s1786_s17  }
  0x20   : > { %s1560_s26 = sshll.u32 (%p1896_p5), %s1798_s20, 4  ;;  %s1268_s27 = sshll.u32 (%p1896_p5), %s161_s11, 5 }
  0x21   : > { %s2326_s0 = sld [smem:[#allocation6_spill]] (%p1896_p5)  ;;  %s163_s23 = scalar_lea.vmem (%p1896_p5), [#allocation2], %s1268_s27 }
  0x27   : > { %s169_s5 = scalar_lea.vmem %s2326_s0, %s1560_s26 }
  0x28   : > { %v182_v0 = vld [vmem:[%s169_s5] sm:$0xff]  ;;  %v184_v1 = vld [vmem:[%s169_s5 + $0x8] sm:$0xff]  ;;  %v186_v2 = vld [vmem:[%s169_s5 + $0x70] sm:$0xff] }
  0x29   : > { %183 = vst [vmem:[%s163_s23] sm:$0xff] %v182_v0  ;;  %v188_v3 = vld [vmem:[%s169_s5 + $0x78] sm:$0xff] }
  0x2a   : > { %185 = vst [vmem:[%s163_s23 + $0x8] sm:$0xff] %v184_v1 }
  0x2b   : > { %187 = vst [vmem:[%s163_s23 + $0x10] sm:$0xff] %v186_v2 }
  0x2c   : > { %189 = vst [vmem:[%s163_s23 + $0x18] sm:$0xff] %v188_v3 }
  0x2d PF: > { %195 = sbr.rel (!%p1910_p9) target bundleno = 119 (0x77), region = 43  ;;  %s197_s28 = sand.u32 (%p1910_p9), 1, %s1778_s15  }
  0x2e   : > { %s1273_s7 = sshll.u32 (%p1910_p9), %s1802_s21, 1  ;;  %s1271_s11 = sshll.u32 (%p1910_p9), %s197_s28, 9 }
  0x2f   : > { %s1561_s26 = sshll.u32 (%p1910_p9), %s1798_s20, 8  ;;  %s2327_s1 = sld [smem:[#allocation7_spill]] (%p1910_p9) }
  0x30   : > { %s203_s29 = sadd.s32 (%p1910_p9), %s1561_s26, %s1273_s7  ;;  %s1948_s6 = scalar_lea.vmem (%p1910_p9), [#allocation3], %s1271_s11 }
  0x31   : > { %s1275_s4 = sshll.u32 (%p1910_p9), %s203_s29, 2 }
  0x35   : > { %s1943_s5 = scalar_lea.vmem %s2327_s1, %s1275_s4 }
  0x36   : > { %v360_v4 = vld [vmem:[%s1943_s5] sm:$0xff]  ;;  %v362_v5 = vld [vmem:[%s1943_s5 + $0x10] sm:$0xff] }
  0x37   : > { %v364_v6 = vld [vmem:[%s1943_s5 + $0x20] sm:$0xff]  ;;  %361 = vst [vmem:[%s1948_s6] sm:$0xff] %v360_v4  ;;  %v366_v7 = vld [vmem:[%s1943_s5 + $0x30] sm:$0xff] }
  0x38   : > { %363 = vst [vmem:[%s1948_s6 + $0x8] sm:$0xff] %v362_v5  ;;  %v368_v8 = vld [vmem:[%s1943_s5 + $0x40] sm:$0xff]  ;;  %v370_v9 = vld [vmem:[%s1943_s5 + $0x50] sm:$0xff] }
  0x39   : > { %365 = vst [vmem:[%s1948_s6 + $0x10] sm:$0xff] %v364_v6  ;;  %v372_v10 = vld [vmem:[%s1943_s5 + $0x60] sm:$0xff]  ;;  %v374_v11 = vld [vmem:[%s1943_s5 + $0x70] sm:$0xff] }
  0x3a   : > { %367 = vst [vmem:[%s1948_s6 + $0x18] sm:$0xff] %v366_v7  ;;  %v376_v12 = vld [vmem:[%s1943_s5 + $0x80] sm:$0xff]  ;;  %v378_v13 = vld [vmem:[%s1943_s5 + $0x90] sm:$0xff] }
  0x3b   : > { %369 = vst [vmem:[%s1948_s6 + $0x20] sm:$0xff] %v368_v8  ;;  %v380_v14 = vld [vmem:[%s1943_s5 + $0xa0] sm:$0xff]  ;;  %v382_v15 = vld [vmem:[%s1943_s5 + $0xb0] sm:$0xff] }
  0x3c   : > { %371 = vst [vmem:[%s1948_s6 + $0x28] sm:$0xff] %v370_v9  ;;  %v384_v16 = vld [vmem:[%s1943_s5 + $0xc0] sm:$0xff]  ;;  %v386_v17 = vld [vmem:[%s1943_s5 + $0xd0] sm:$0xff] }
  0x3d   : > { %373 = vst [vmem:[%s1948_s6 + $0x30] sm:$0xff] %v372_v10  ;;  %v388_v18 = vld [vmem:[%s1943_s5 + $0xe0] sm:$0xff]  ;;  %v390_v19 = vld [vmem:[%s1943_s5 + $0xf0] sm:$0xff] }
  0x3e   : > { %375 = vst [vmem:[%s1948_s6 + $0x38] sm:$0xff] %v374_v11  ;;  %v392_v20 = vld [vmem:[%s1943_s5 + $0x100] sm:$0xff]  ;;  %v394_v21 = vld [vmem:[%s1943_s5 + $0x110] sm:$0xff] }
  0x3f   : > { %377 = vst [vmem:[%s1948_s6 + $0x40] sm:$0xff] %v376_v12  ;;  %v396_v22 = vld [vmem:[%s1943_s5 + $0x120] sm:$0xff]  ;;  %v398_v23 = vld [vmem:[%s1943_s5 + $0x130] sm:$0xff] }
  0x40   : > { %379 = vst [vmem:[%s1948_s6 + $0x48] sm:$0xff] %v378_v13  ;;  %v400_v24 = vld [vmem:[%s1943_s5 + $0x140] sm:$0xff]  ;;  %v402_v25 = vld [vmem:[%s1943_s5 + $0x150] sm:$0xff] }
  0x41   : > { %381 = vst [vmem:[%s1948_s6 + $0x50] sm:$0xff] %v380_v14  ;;  %v404_v26 = vld [vmem:[%s1943_s5 + $0x160] sm:$0xff]  ;;  %v406_v27 = vld [vmem:[%s1943_s5 + $0x170] sm:$0xff] }
  0x42   : > { %383 = vst [vmem:[%s1948_s6 + $0x58] sm:$0xff] %v382_v15  ;;  %v408_v28 = vld [vmem:[%s1943_s5 + $0x180] sm:$0xff]  ;;  %v410_v29 = vld [vmem:[%s1943_s5 + $0x190] sm:$0xff] }
  0x43   : > { %385 = vst [vmem:[%s1948_s6 + $0x60] sm:$0xff] %v384_v16  ;;  %v412_v30 = vld [vmem:[%s1943_s5 + $0x1a0] sm:$0xff]  ;;  %v414_v31 = vld [vmem:[%s1943_s5 + $0x1b0] sm:$0xff] }
  0x44   : > { %387 = vst [vmem:[%s1948_s6 + $0x68] sm:$0xff] %v386_v17  ;;  %v416_v32 = vld [vmem:[%s1943_s5 + $0x1c0] sm:$0xff]  ;;  %v418_v33 = vld [vmem:[%s1943_s5 + $0x1d0] sm:$0xff] }
  0x45   : > { %389 = vst [vmem:[%s1948_s6 + $0x70] sm:$0xff] %v388_v18  ;;  %v420_v34 = vld [vmem:[%s1943_s5 + $0x1e0] sm:$0xff]  ;;  %v422_v35 = vld [vmem:[%s1943_s5 + $0x1f0] sm:$0xff] }
  0x46   : > { %391 = vst [vmem:[%s1948_s6 + $0x78] sm:$0xff] %v390_v19  ;;  %v424_v36 = vld [vmem:[%s1943_s5 + $0x200] sm:$0xff]  ;;  %v426_v37 = vld [vmem:[%s1943_s5 + $0x210] sm:$0xff] }
  0x47   : > { %393 = vst [vmem:[%s1948_s6 + $0x80] sm:$0xff] %v392_v20  ;;  %v428_v38 = vld [vmem:[%s1943_s5 + $0x220] sm:$0xff]  ;;  %v430_v39 = vld [vmem:[%s1943_s5 + $0x230] sm:$0xff] }
  0x48   : > { %395 = vst [vmem:[%s1948_s6 + $0x88] sm:$0xff] %v394_v21  ;;  %v432_v40 = vld [vmem:[%s1943_s5 + $0x240] sm:$0xff]  ;;  %v434_v41 = vld [vmem:[%s1943_s5 + $0x250] sm:$0xff] }
  0x49   : > { %397 = vst [vmem:[%s1948_s6 + $0x90] sm:$0xff] %v396_v22  ;;  %v436_v42 = vld [vmem:[%s1943_s5 + $0x260] sm:$0xff]  ;;  %v438_v43 = vld [vmem:[%s1943_s5 + $0x270] sm:$0xff] }
  0x4a   : > { %399 = vst [vmem:[%s1948_s6 + $0x98] sm:$0xff] %v398_v23  ;;  %v440_v44 = vld [vmem:[%s1943_s5 + $0x280] sm:$0xff]  ;;  %v442_v45 = vld [vmem:[%s1943_s5 + $0x290] sm:$0xff] }
  0x4b   : > { %401 = vst [vmem:[%s1948_s6 + $0xa0] sm:$0xff] %v400_v24  ;;  %v444_v46 = vld [vmem:[%s1943_s5 + $0x2a0] sm:$0xff]  ;;  %v446_v47 = vld [vmem:[%s1943_s5 + $0x2b0] sm:$0xff] }
  0x4c   : > { %403 = vst [vmem:[%s1948_s6 + $0xa8] sm:$0xff] %v402_v25  ;;  %v448_v48 = vld [vmem:[%s1943_s5 + $0x2c0] sm:$0xff]  ;;  %v450_v49 = vld [vmem:[%s1943_s5 + $0x2d0] sm:$0xff] }
  0x4d   : > { %405 = vst [vmem:[%s1948_s6 + $0xb0] sm:$0xff] %v404_v26  ;;  %v452_v50 = vld [vmem:[%s1943_s5 + $0x2e0] sm:$0xff]  ;;  %v454_v51 = vld [vmem:[%s1943_s5 + $0x2f0] sm:$0xff] }
  0x4e   : > { %407 = vst [vmem:[%s1948_s6 + $0xb8] sm:$0xff] %v406_v27  ;;  %v456_v52 = vld [vmem:[%s1943_s5 + $0x300] sm:$0xff]  ;;  %v458_v53 = vld [vmem:[%s1943_s5 + $0x310] sm:$0xff] }
  0x4f   : > { %409 = vst [vmem:[%s1948_s6 + $0xc0] sm:$0xff] %v408_v28  ;;  %v460_v54 = vld [vmem:[%s1943_s5 + $0x320] sm:$0xff]  ;;  %v462_v55 = vld [vmem:[%s1943_s5 + $0x330] sm:$0xff] }
  0x50   : > { %411 = vst [vmem:[%s1948_s6 + $0xc8] sm:$0xff] %v410_v29  ;;  %v464_v56 = vld [vmem:[%s1943_s5 + $0x340] sm:$0xff]  ;;  %v466_v57 = vld [vmem:[%s1943_s5 + $0x350] sm:$0xff] }
  0x51   : > { %413 = vst [vmem:[%s1948_s6 + $0xd0] sm:$0xff] %v412_v30  ;;  %v468_v58 = vld [vmem:[%s1943_s5 + $0x360] sm:$0xff]  ;;  %v470_v59 = vld [vmem:[%s1943_s5 + $0x370] sm:$0xff] }
  0x52   : > { %415 = vst [vmem:[%s1948_s6 + $0xd8] sm:$0xff] %v414_v31  ;;  %v472_v60 = vld [vmem:[%s1943_s5 + $0x380] sm:$0xff]  ;;  %v474_v61 = vld [vmem:[%s1943_s5 + $0x390] sm:$0xff] }
  0x53   : > { %417 = vst [vmem:[%s1948_s6 + $0xe0] sm:$0xff] %v416_v32  ;;  %v476_v62 = vld [vmem:[%s1943_s5 + $0x3a0] sm:$0xff]  ;;  %v478_v63 = vld [vmem:[%s1943_s5 + $0x3b0] sm:$0xff] }
  0x54   : > { %419 = vst [vmem:[%s1948_s6 + $0xe8] sm:$0xff] %v418_v33  ;;  %v480_v0 = vld [vmem:[%s1943_s5 + $0x3c0] sm:$0xff]  ;;  %v482_v1 = vld [vmem:[%s1943_s5 + $0x3d0] sm:$0xff] }
  0x55   : > { %421 = vst [vmem:[%s1948_s6 + $0xf0] sm:$0xff] %v420_v34  ;;  %v484_v2 = vld [vmem:[%s1943_s5 + $0x3e0] sm:$0xff]  ;;  %v486_v3 = vld [vmem:[%s1943_s5 + $0x3f0] sm:$0xff] }
  0x56   : > { %423 = vst [vmem:[%s1948_s6 + $0xf8] sm:$0xff] %v422_v35 }
  0x57   : > { %425 = vst [vmem:[%s1948_s6 + $0x100] sm:$0xff] %v424_v36 }
  0x58   : > { %427 = vst [vmem:[%s1948_s6 + $0x108] sm:$0xff] %v426_v37 }
  0x59   : > { %429 = vst [vmem:[%s1948_s6 + $0x110] sm:$0xff] %v428_v38 }
  0x5a   : > { %431 = vst [vmem:[%s1948_s6 + $0x118] sm:$0xff] %v430_v39 }
  0x5b   : > { %433 = vst [vmem:[%s1948_s6 + $0x120] sm:$0xff] %v432_v40 }
  0x5c   : > { %435 = vst [vmem:[%s1948_s6 + $0x128] sm:$0xff] %v434_v41 }
  0x5d   : > { %437 = vst [vmem:[%s1948_s6 + $0x130] sm:$0xff] %v436_v42 }
  0x5e   : > { %439 = vst [vmem:[%s1948_s6 + $0x138] sm:$0xff] %v438_v43 }
  0x5f   : > { %441 = vst [vmem:[%s1948_s6 + $0x140] sm:$0xff] %v440_v44 }
  0x60   : > { %443 = vst [vmem:[%s1948_s6 + $0x148] sm:$0xff] %v442_v45 }
  0x61   : > { %445 = vst [vmem:[%s1948_s6 + $0x150] sm:$0xff] %v444_v46 }
  0x62   : > { %447 = vst [vmem:[%s1948_s6 + $0x158] sm:$0xff] %v446_v47 }
  0x63   : > { %449 = vst [vmem:[%s1948_s6 + $0x160] sm:$0xff] %v448_v48 }
  0x64   : > { %451 = vst [vmem:[%s1948_s6 + $0x168] sm:$0xff] %v450_v49 }
  0x65   : > { %453 = vst [vmem:[%s1948_s6 + $0x170] sm:$0xff] %v452_v50 }
  0x66   : > { %455 = vst [vmem:[%s1948_s6 + $0x178] sm:$0xff] %v454_v51 }
  0x67   : > { %457 = vst [vmem:[%s1948_s6 + $0x180] sm:$0xff] %v456_v52 }
  0x68   : > { %459 = vst [vmem:[%s1948_s6 + $0x188] sm:$0xff] %v458_v53 }
  0x69   : > { %461 = vst [vmem:[%s1948_s6 + $0x190] sm:$0xff] %v460_v54 }
  0x6a   : > { %463 = vst [vmem:[%s1948_s6 + $0x198] sm:$0xff] %v462_v55 }
  0x6b   : > { %465 = vst [vmem:[%s1948_s6 + $0x1a0] sm:$0xff] %v464_v56 }
  0x6c   : > { %467 = vst [vmem:[%s1948_s6 + $0x1a8] sm:$0xff] %v466_v57 }
  0x6d   : > { %469 = vst [vmem:[%s1948_s6 + $0x1b0] sm:$0xff] %v468_v58 }
  0x6e   : > { %471 = vst [vmem:[%s1948_s6 + $0x1b8] sm:$0xff] %v470_v59 }
  0x6f   : > { %473 = vst [vmem:[%s1948_s6 + $0x1c0] sm:$0xff] %v472_v60 }
  0x70   : > { %475 = vst [vmem:[%s1948_s6 + $0x1c8] sm:$0xff] %v474_v61 }
  0x71   : > { %477 = vst [vmem:[%s1948_s6 + $0x1d0] sm:$0xff] %v476_v62 }
  0x72   : > { %479 = vst [vmem:[%s1948_s6 + $0x1d8] sm:$0xff] %v478_v63 }
  0x73   : > { %481 = vst [vmem:[%s1948_s6 + $0x1e0] sm:$0xff] %v480_v0 }
  0x74   : > { %483 = vst [vmem:[%s1948_s6 + $0x1e8] sm:$0xff] %v482_v1 }
  0x75   : > { %485 = vst [vmem:[%s1948_s6 + $0x1f0] sm:$0xff] %v484_v2 }
  0x76   : > { %487 = vst [vmem:[%s1948_s6 + $0x1f8] sm:$0xff] %v486_v3 }
  0x77 PF: > { %p1276_p0 = scmp.ge.s32.totalorder %s1806_s22, 1  ;;  %p500_p1 = scmp.lt.s32.totalorder %s1806_s22, 15 }
  0x79   : > { %p501_p2 = pnand %p1276_p0, %p500_p1 }
  0x7a   : > { %s507_s0 = sand.u32 (!%p501_p2), 1, %s1782_s16   ;;  %s514_s23 = sand.u32 (!%p501_p2), 1, %s1774_s14  }
  0x7b   : > { %504 = sbr.rel (%p501_p2) target bundleno = 375 (0x177), region = 85  ;;  %s1277_s28 = sshll.u32 (!%p501_p2), %s507_s0, 5 }
  0x7c   : > { %s1278_s7 = sshll.u32 (!%p501_p2), %s514_s23, 9  ;;  %s541_s11 = sand.u32 (!%p501_p2), 1, %s1766_s12  }
  0x7d   : > { %s1280_s26 = sshll.u32 (!%p501_p2), %s1794_s19, 1  ;;  %s1279_s29 = sshll.u32 (!%p501_p2), %s541_s11, 5 }
  0x7e   : > { %p549_p3 = scmp.lt.s32.totalorder (!%p501_p2), %s1280_s26, 3  ;;  %s2087_s6 = scalar_lea.vmem (!%p501_p2), [#allocation2], %s1277_s28 }
  0x7f   : > { %s2089_s1 = scalar_lea.vmem (!%p501_p2), [#allocation3], %s1278_s7  ;;  %s2091_s25 = scalar_lea.vmem (!%p501_p2), [#allocation4], %s1279_s29 }
  0x80   : > { %s2346_s26 = smov (!%p549_p3, %s1280_s26), 3  ;;  %p1281_p4 = scmp.ne.s32.totalorder %s1790_s18, 0 }
  0x81   : > { %s551_s5 = scalar_lea.vmem %s2317_s2, %s2346_s26 }
  0x82   : > { %558 = sbr.rel (%p1281_p4) target bundleno = 140 (0x8c), region = 97 }
  0x87   : > { %v1808_v4 = vmov 0.0  }
  0x88   : > { %559 = vst [vmem:[%s2091_s25] sm:$0xff] %v1808_v4 }
  0x89   : > { %560 = vst [vmem:[%s2091_s25 + $0x8] sm:$0xff] %v1808_v4 }
  0x8a   : > { %561 = vst [vmem:[%s2091_s25 + $0x10] sm:$0xff] %v1808_v4 }
  0x8b   : > { %562 = vst [vmem:[%s2091_s25 + $0x18] sm:$0xff] %v1808_v4 }
  0x8c PF: > { %v1356_v5 = vld [vmem:[%s2089_s1 + $0x70] sm:$0xf]  ;;  %v1581_v6 = vld [vmem:[%s2089_s1 + $0x74] sm:$0xf0]  ;;  %v1348_v16 = vld [vmem:[%s2089_s1 + $0x60] sm:$0xf] }
  0x8d   : > { %v1420_v7 = vld [vmem:[%s2089_s1 + $0xf0] sm:$0xf]  ;;  %v1357_v8 = vor.u32 %v1581_v6, %v1356_v5  ;;  %v1597_v9 = vld [vmem:[%s2089_s1 + $0xf4] sm:$0xf0]  ;;  %v1579_v18 = vld [vmem:[%s2089_s1 + $0x64] sm:$0xf0] }
  0x8e   : > { %v1484_v10 = vld [vmem:[%s2089_s1 + $0x170] sm:$0xf]  ;;  %v1613_v11 = vld [vmem:[%s2089_s1 + $0x174] sm:$0xf0]  ;;  %v1421_v12 = vor.u32 %v1597_v9, %v1420_v7  ;;  %v1412_v19 = vld [vmem:[%s2089_s1 + $0xe0] sm:$0xf]  ;;  %v1349_v21 = vor.u32 %v1579_v18, %v1348_v16 }
  0x8f   : > { %v1485_v13 = vor.u32 %v1613_v11, %v1484_v10  ;;  %v1548_v14 = vld [vmem:[%s2089_s1 + $0x1f0] sm:$0xf]  ;;  %v1629_v15 = vld [vmem:[%s2089_s1 + $0x1f4] sm:$0xf0]  ;;  %975 = vmatpush.bf16.msra.mxu0 %v1357_v8  ;;  %v1595_v20 = vld [vmem:[%s2089_s1 + $0xe4] sm:$0xf0] }
  0x90   : > { %v1549_v17 = vor.u32 %v1629_v15, %v1548_v14  ;;  %989 = vmatpush.bf16.msra.mxu1 %v1421_v12  ;;  %v1413_v22 = vor.u32 %v1595_v20, %v1412_v19  ;;  %v1476_v23 = vld [vmem:[%s2089_s1 + $0x160] sm:$0xf]  ;;  %v1611_v24 = vld [vmem:[%s2089_s1 + $0x164] sm:$0xf0]  ;;  %v1340_v28 = vld [vmem:[%s2089_s1 + $0x50] sm:$0xf] }
  0x91   : > { %1003 = vmatpush.bf16.msra.mxu2 %v1485_v13  ;;  %v1540_v25 = vld [vmem:[%s2089_s1 + $0x1e0] sm:$0xf]  ;;  %v1477_v26 = vor.u32 %v1611_v24, %v1476_v23  ;;  %v1627_v27 = vld [vmem:[%s2089_s1 + $0x1e4] sm:$0xf0]  ;;  %v1577_v29 = vld [vmem:[%s2089_s1 + $0x54] sm:$0xf0] }
  0x92   : > { %1017 = vmatpush.bf16.msra.mxu3 %v1549_v17  ;;  %v1541_v30 = vor.u32 %v1627_v27, %v1540_v25  ;;  %v1404_v31 = vld [vmem:[%s2089_s1 + $0xd0] sm:$0xf]  ;;  %v1593_v32 = vld [vmem:[%s2089_s1 + $0xd4] sm:$0xf0]  ;;  %v1341_v34 = vor.u32 %v1577_v29, %v1340_v28  ;;  %v1332_v40 = vld [vmem:[%s2089_s1 + $0x40] sm:$0xf] }
  0x93   : > { %v1468_v33 = vld [vmem:[%s2089_s1 + $0x150] sm:$0xf]  ;;  %976 = vmatpush.bf16.msra.mxu0 %v1349_v21  ;;  %v1609_v35 = vld [vmem:[%s2089_s1 + $0x154] sm:$0xf0]  ;;  %v1405_v38 = vor.u32 %v1593_v32, %v1404_v31  ;;  %v1575_v41 = vld [vmem:[%s2089_s1 + $0x44] sm:$0xf0] }
  0x94   : > { %v1532_v36 = vld [vmem:[%s2089_s1 + $0x1d0] sm:$0xf]  ;;  %v1625_v37 = vld [vmem:[%s2089_s1 + $0x1d4] sm:$0xf0]  ;;  %990 = vmatpush.bf16.msra.mxu1 %v1413_v22  ;;  %v1469_v39 = vor.u32 %v1609_v35, %v1468_v33  ;;  %v1396_v42 = vld [vmem:[%s2089_s1 + $0xc0] sm:$0xf]  ;;  %v1333_v49 = vor.u32 %v1575_v41, %v1332_v40 }
  0x95   : > { %1004 = vmatpush.bf16.msra.mxu2 %v1477_v26  ;;  %v1533_v43 = vor.u32 %v1625_v37, %v1532_v36  ;;  %v1591_v44 = vld [vmem:[%s2089_s1 + $0xc4] sm:$0xf0]  ;;  %v1460_v45 = vld [vmem:[%s2089_s1 + $0x140] sm:$0xf]  ;;  %v1324_v52 = vld [vmem:[%s2089_s1 + $0x30] sm:$0xf] }
  0x96   : > { %1018 = vmatpush.bf16.msra.mxu3 %v1541_v30  ;;  %v1607_v46 = vld [vmem:[%s2089_s1 + $0x144] sm:$0xf0]  ;;  %v1524_v47 = vld [vmem:[%s2089_s1 + $0x1c0] sm:$0xf]  ;;  %v1397_v50 = vor.u32 %v1591_v44, %v1396_v42  ;;  %v1573_v53 = vld [vmem:[%s2089_s1 + $0x34] sm:$0xf0] }
  0x97   : > { %v1623_v48 = vld [vmem:[%s2089_s1 + $0x1c4] sm:$0xf0]  ;;  %977 = vmatpush.bf16.msra.mxu0 %v1341_v34  ;;  %v1461_v51 = vor.u32 %v1607_v46, %v1460_v45  ;;  %v1388_v54 = vld [vmem:[%s2089_s1 + $0xb0] sm:$0xf]  ;;  %v1589_v56 = vld [vmem:[%s2089_s1 + $0xb4] sm:$0xf0]  ;;  %v1325_v61 = vor.u32 %v1573_v53, %v1324_v52 }
  0x98   : > { %991 = vmatpush.bf16.msra.mxu1 %v1405_v38  ;;  %v1525_v55 = vor.u32 %v1623_v48, %v1524_v47  ;;  %v1452_v57 = vld [vmem:[%s2089_s1 + $0x130] sm:$0xf]  ;;  %v1605_v58 = vld [vmem:[%s2089_s1 + $0x134] sm:$0xf0]  ;;  %v1389_v62 = vor.u32 %v1589_v56, %v1388_v54  ;;  %v1316_v0 = vld [vmem:[%s2089_s1 + $0x20] sm:$0xf] }
  0x99   : > { %1005 = vmatpush.bf16.msra.mxu2 %v1469_v39  ;;  %v1516_v59 = vld [vmem:[%s2089_s1 + $0x1b0] sm:$0xf]  ;;  %v1621_v60 = vld [vmem:[%s2089_s1 + $0x1b4] sm:$0xf0]  ;;  %v1453_v63 = vor.u32 %v1605_v58, %v1452_v57  ;;  %v1571_v1 = vld [vmem:[%s2089_s1 + $0x24] sm:$0xf0] }
  0x9a   : > { %1019 = vmatpush.bf16.msra.mxu3 %v1533_v43  ;;  %v1380_v2 = vld [vmem:[%s2089_s1 + $0xa0] sm:$0xf]  ;;  %v1517_v3 = vor.u32 %v1621_v60, %v1516_v59  ;;  %v1587_v4 = vld [vmem:[%s2089_s1 + $0xa4] sm:$0xf0]  ;;  %v1317_v9 = vor.u32 %v1571_v1, %v1316_v0  ;;  %v1308_v12 = vld [vmem:[%s2089_s1 + $0x10] sm:$0xf] }
  0x9b   : > { %978 = vmatpush.bf16.msra.mxu0 %v1333_v49  ;;  %v1444_v5 = vld [vmem:[%s2089_s1 + $0x120] sm:$0xf]  ;;  %v1603_v6 = vld [vmem:[%s2089_s1 + $0x124] sm:$0xf0]  ;;  %v1381_v10 = vor.u32 %v1587_v4, %v1380_v2  ;;  %v1569_v13 = vld [vmem:[%s2089_s1 + $0x14] sm:$0xf0] }
  0x9c   : > { %992 = vmatpush.bf16.msra.mxu1 %v1397_v50  ;;  %v1508_v7 = vld [vmem:[%s2089_s1 + $0x1a0] sm:$0xf]  ;;  %v1619_v8 = vld [vmem:[%s2089_s1 + $0x1a4] sm:$0xf0]  ;;  %v1445_v11 = vor.u32 %v1603_v6, %v1444_v5  ;;  %v1372_v14 = vld [vmem:[%s2089_s1 + $0x90] sm:$0xf]  ;;  %v1309_v22 = vor.u32 %v1569_v13, %v1308_v12 }
  0x9d   : > { %1006 = vmatpush.bf16.msra.mxu2 %v1461_v51  ;;  %v1509_v15 = vor.u32 %v1619_v8, %v1508_v7  ;;  %v1585_v16 = vld [vmem:[%s2089_s1 + $0x94] sm:$0xf0]  ;;  %v1436_v17 = vld [vmem:[%s2089_s1 + $0x110] sm:$0xf]  ;;  %v1300_v21 = vld [vmem:[%s2089_s1] sm:$0xf] }
  0x9e   : > { %1020 = vmatpush.bf16.msra.mxu3 %v1525_v55  ;;  %v1601_v18 = vld [vmem:[%s2089_s1 + $0x114] sm:$0xf0]  ;;  %v1500_v19 = vld [vmem:[%s2089_s1 + $0x190] sm:$0xf]  ;;  %v1567_v23 = vld [vmem:[%s2089_s1 + $0x4] sm:$0xf0]  ;;  %v1373_v26 = vor.u32 %v1585_v16, %v1372_v14 }
  0x9f   : > { %979 = vmatpush.bf16.msra.mxu0 %v1325_v61  ;;  %v1617_v20 = vld [vmem:[%s2089_s1 + $0x194] sm:$0xf0]  ;;  %v1364_v24 = vld [vmem:[%s2089_s1 + $0x80] sm:$0xf]  ;;  %v1583_v25 = vld [vmem:[%s2089_s1 + $0x84] sm:$0xf0]  ;;  %v1437_v27 = vor.u32 %v1601_v18, %v1436_v17  ;;  %v1301_v38 = vor.u32 %v1567_v23, %v1300_v21 }
  0xa0   : > { %993 = vmatpush.bf16.msra.mxu1 %v1389_v62  ;;  %v1428_v28 = vld [vmem:[%s2089_s1 + $0x100] sm:$0xf]  ;;  %v1599_v29 = vld [vmem:[%s2089_s1 + $0x104] sm:$0xf0]  ;;  %v1501_v31 = vor.u32 %v1617_v20, %v1500_v19  ;;  %v1580_v33 = vld [vmem:[%s2089_s1 + $0x74] sm:$0xf]  ;;  %v1365_v42 = vor.u32 %v1583_v25, %v1364_v24 }
  0xa1   : > { %1007 = vmatpush.bf16.msra.mxu2 %v1453_v63  ;;  %v1492_v30 = vld [vmem:[%s2089_s1 + $0x180] sm:$0xf]  ;;  %v1615_v32 = vld [vmem:[%s2089_s1 + $0x184] sm:$0xf0]  ;;  %v1358_v34 = vld [vmem:[%s2089_s1 + $0x78] sm:$0xf0]  ;;  %v1429_v43 = vor.u32 %v1599_v29, %v1428_v28 }
  0xa2   : > { %1021 = vmatpush.bf16.msra.mxu3 %v1517_v3  ;;  %v1596_v35 = vld [vmem:[%s2089_s1 + $0xf4] sm:$0xf]  ;;  %v1422_v36 = vld [vmem:[%s2089_s1 + $0xf8] sm:$0xf0]  ;;  %v1578_v44 = vld [vmem:[%s2089_s1 + $0x64] sm:$0xf]  ;;  %v1493_v48 = vor.u32 %v1615_v32, %v1492_v30  ;;  %v1361_v49 = vor.u32 %v1580_v33, %v1358_v34 }
  0xa3   : > { %980 = vmatpush.bf16.msra.mxu0 %v1317_v9  ;;  %v1612_v37 = vld [vmem:[%s2089_s1 + $0x174] sm:$0xf]  ;;  %v1486_v39 = vld [vmem:[%s2089_s1 + $0x178] sm:$0xf0]  ;;  %v1350_v45 = vld [vmem:[%s2089_s1 + $0x68] sm:$0xf0]  ;;  %v1425_v54 = vor.u32 %v1596_v35, %v1422_v36 }
  0xa4   : > { %994 = vmatpush.bf16.msra.mxu1 %v1381_v10  ;;  %v1628_v40 = vld [vmem:[%s2089_s1 + $0x1f4] sm:$0xf]  ;;  %v1550_v41 = vld [vmem:[%s2089_s1 + $0x1f8] sm:$0xf0]  ;;  %v1292_v46 = vld [vmem:[%s2087_s6 + $0x8] sm:$0xf]  ;;  %v1489_v55 = vor.u32 %v1612_v37, %v1486_v39  ;;  %v1353_v4 = vor.u32 %v1578_v44, %v1350_v45 }
  0xa5   : > { %1008 = vmatpush.bf16.msra.mxu2 %v1445_v11  ;;  %v1565_v47 = vld [vmem:[%s2087_s6 + $0x14] sm:$0xf0]  ;;  %v1594_v50 = vld [vmem:[%s2089_s1 + $0xe4] sm:$0xf]  ;;  %v1414_v51 = vld [vmem:[%s2089_s1 + $0xe8] sm:$0xf0]  ;;  %v1553_v59 = vor.u32 %v1628_v40, %v1550_v41 }
  0xa6   : > { %1022 = vmatpush.bf16.msra.mxu3 %v1509_v15  ;;  %v1610_v52 = vld [vmem:[%s2089_s1 + $0x164] sm:$0xf]  ;;  %v1478_v53 = vld [vmem:[%s2089_s1 + $0x168] sm:$0xf0]  ;;  %v1294_v57 = vld [vmem:[%s2087_s6 + $0x18] sm:$0xf0]  ;;  %v2181_v60 = vor.u32 %v1565_v47, %v1292_v46  ;;  %v1417_v6 = vor.u32 %v1594_v50, %v1414_v51 }
  0xa7   : > { %981 = vmatpush.bf16.msra.mxu0 %v1309_v22  ;;  %v1563_v56 = vld [vmem:[%s2087_s6 + $0xc] sm:$0xf]  ;;  %v1284_v58 = vld [vmem:[%s2087_s6] sm:$0xf]  ;;  %v1564_v61 = vld [vmem:[%s2087_s6 + $0xc] sm:$0xf0]  ;;  %v1481_v7 = vor.u32 %v1610_v52, %v1478_v53 }
  0xa8   : > { %995 = vmatpush.bf16.msra.mxu1 %v1373_v26  ;;  %v1562_v62 = vld [vmem:[%s2087_s6 + $0x4] sm:$0xf]  ;;  %v1286_v63 = vld [vmem:[%s2087_s6 + $0x10] sm:$0xf0]  ;;  %v1542_v1 = vld [vmem:[%s2089_s1 + $0x1e8] sm:$0xf0]  ;;  %v2188_v2 = vor.u32 %v1563_v56, %v1294_v57  ;;  %v2190_v3 = vor.u32 %v1564_v61, %v1284_v58 }
  0xa9   : > { %1009 = vmatpush.bf16.msra.mxu2 %v1437_v27  ;;  %v1626_v0 = vld [vmem:[%s2089_s1 + $0x1e4] sm:$0xf]  ;;  %v2192_v5 = vor.u32 %v1562_v62, %v1286_v63  ;;  %v1576_v8 = vld [vmem:[%s2089_s1 + $0x54] sm:$0xf]  ;;  %v1342_v9 = vld [vmem:[%s2089_s1 + $0x58] sm:$0xf0] }
  0xaa   : > { %1023 = vmatpush.bf16.msra.mxu3 %v1501_v31  ;;  %v1592_v10 = vld [vmem:[%s2089_s1 + $0xd4] sm:$0xf]  ;;  %v1545_v11 = vor.u32 %v1626_v0, %v1542_v1  ;;  %v1406_v12 = vld [vmem:[%s2089_s1 + $0xd8] sm:$0xf0]  ;;  %v1345_v17 = vor.u32 %v1576_v8, %v1342_v9  ;;  %v1574_v20 = vld [vmem:[%s2089_s1 + $0x44] sm:$0xf] }
  0xab   : > { %982 = vmatpush.bf16.msra.mxu0 %v1301_v38  ;;  %v1608_v13 = vld [vmem:[%s2089_s1 + $0x154] sm:$0xf]  ;;  %v1470_v14 = vld [vmem:[%s2089_s1 + $0x158] sm:$0xf0]  ;;  %v1409_v18 = vor.u32 %v1592_v10, %v1406_v12  ;;  %v1334_v21 = vld [vmem:[%s2089_s1 + $0x48] sm:$0xf0] }
  0xac   : > { %996 = vmatpush.bf16.msra.mxu1 %v1365_v42  ;;  %v1624_v15 = vld [vmem:[%s2089_s1 + $0x1d4] sm:$0xf]  ;;  %v1534_v16 = vld [vmem:[%s2089_s1 + $0x1d8] sm:$0xf0]  ;;  %v1473_v19 = vor.u32 %v1608_v13, %v1470_v14  ;;  %v1590_v22 = vld [vmem:[%s2089_s1 + $0xc4] sm:$0xf]  ;;  %v1337_v29 = vor.u32 %v1574_v20, %v1334_v21 }
  0xad   : > { %1010 = vmatpush.bf16.msra.mxu2 %v1429_v43  ;;  %v1537_v23 = vor.u32 %v1624_v15, %v1534_v16  ;;  %v1398_v24 = vld [vmem:[%s2089_s1 + $0xc8] sm:$0xf0]  ;;  %v1606_v25 = vld [vmem:[%s2089_s1 + $0x144] sm:$0xf]  ;;  %v1572_v32 = vld [vmem:[%s2089_s1 + $0x34] sm:$0xf] }
  0xae   : > { %1024 = vmatpush.bf16.msra.mxu3 %v1493_v48  ;;  %983 = vmatmul.bf16.vlgmr.msra.gmra.mxu0 %v2190_v3  ;;  %v1462_v26 = vld [vmem:[%s2089_s1 + $0x148] sm:$0xf0]  ;;  %v1622_v27 = vld [vmem:[%s2089_s1 + $0x1c4] sm:$0xf]  ;;  %v1401_v30 = vor.u32 %v1590_v22, %v1398_v24  ;;  %v1326_v33 = vld [vmem:[%s2089_s1 + $0x38] sm:$0xf0] }
  0xaf   : > { %1031 = vmatpush.bf16.msrb.mxu0 %v1361_v49  ;;  %997 = vmatmul.bf16.vlgmr.msra.gmra.mxu1 %v2192_v5  ;;  %v1526_v28 = vld [vmem:[%s2089_s1 + $0x1c8] sm:$0xf0]  ;;  %v1465_v31 = vor.u32 %v1606_v25, %v1462_v26  ;;  %v1588_v34 = vld [vmem:[%s2089_s1 + $0xb4] sm:$0xf]  ;;  %v1390_v36 = vld [vmem:[%s2089_s1 + $0xb8] sm:$0xf0]  ;;  %v1329_v41 = vor.u32 %v1572_v32, %v1326_v33 }
  0xb0   : > { %1045 = vmatpush.bf16.msrb.mxu1 %v1425_v54  ;;  %1011 = vmatmul.bf16.vlgmr.msra.gmra.mxu2 %v2181_v60  ;;  %v1529_v35 = vor.u32 %v1622_v27, %v1526_v28  ;;  %v1604_v37 = vld [vmem:[%s2089_s1 + $0x134] sm:$0xf]  ;;  %v1454_v38 = vld [vmem:[%s2089_s1 + $0x138] sm:$0xf0]  ;;  %v1393_v42 = vor.u32 %v1588_v34, %v1390_v36  ;;  %v1570_v44 = vld [vmem:[%s2089_s1 + $0x24] sm:$0xf] }
  0xb1   : > { %1059 = vmatpush.bf16.msrb.mxu2 %v1489_v55  ;;  %1025 = vmatmul.bf16.vlgmr.msra.gmra.mxu3 %v2188_v2  ;;  %v1620_v39 = vld [vmem:[%s2089_s1 + $0x1b4] sm:$0xf]  ;;  %v1518_v40 = vld [vmem:[%s2089_s1 + $0x1b8] sm:$0xf0]  ;;  %v1457_v43 = vor.u32 %v1604_v37, %v1454_v38  ;;  %v1318_v45 = vld [vmem:[%s2089_s1 + $0x28] sm:$0xf0] }
  0xb2   : > { %1073 = vmatpush.bf16.msrb.mxu3 %v1553_v59  ;;  %v1586_v46 = vld [vmem:[%s2089_s1 + $0xa4] sm:$0xf]  ;;  %v1521_v47 = vor.u32 %v1620_v39, %v1518_v40  ;;  %v1382_v48 = vld [vmem:[%s2089_s1 + $0xa8] sm:$0xf0]  ;;  %v1321_v53 = vor.u32 %v1570_v44, %v1318_v45  ;;  %v1568_v56 = vld [vmem:[%s2089_s1 + $0x14] sm:$0xf] }
  0xb3   : > { %1032 = vmatpush.bf16.msrb.mxu0 %v1353_v4  ;;  %v1602_v49 = vld [vmem:[%s2089_s1 + $0x124] sm:$0xf]  ;;  %v1446_v50 = vld [vmem:[%s2089_s1 + $0x128] sm:$0xf0]  ;;  %v1385_v54 = vor.u32 %v1586_v46, %v1382_v48  ;;  %v1310_v57 = vld [vmem:[%s2089_s1 + $0x18] sm:$0xf0] }
  0xb4   : > { %1046 = vmatpush.bf16.msrb.mxu1 %v1417_v6  ;;  %v1618_v51 = vld [vmem:[%s2089_s1 + $0x1a4] sm:$0xf]  ;;  %v1510_v52 = vld [vmem:[%s2089_s1 + $0x1a8] sm:$0xf0]  ;;  %v1449_v55 = vor.u32 %v1602_v49, %v1446_v50  ;;  %v1584_v58 = vld [vmem:[%s2089_s1 + $0x94] sm:$0xf]  ;;  %v1313_v4 = vor.u32 %v1568_v56, %v1310_v57 }
  0xb5   : > { %1060 = vmatpush.bf16.msrb.mxu2 %v1481_v7  ;;  %v1513_v59 = vor.u32 %v1618_v51, %v1510_v52  ;;  %v1374_v61 = vld [vmem:[%s2089_s1 + $0x98] sm:$0xf0]  ;;  %v1600_v62 = vld [vmem:[%s2089_s1 + $0x114] sm:$0xf]  ;;  %v1566_v8 = vld [vmem:[%s2089_s1 + $0x4] sm:$0xf] }
  0xb6   : > { %1074 = vmatpush.bf16.msrb.mxu3 %v1545_v11  ;;  %v1438_v63 = vld [vmem:[%s2089_s1 + $0x118] sm:$0xf0]  ;;  %v1616_v0 = vld [vmem:[%s2089_s1 + $0x194] sm:$0xf]  ;;  %v1377_v6 = vor.u32 %v1584_v58, %v1374_v61  ;;  %v1302_v9 = vld [vmem:[%s2089_s1 + $0x8] sm:$0xf0] }
  0xb7   : > { %1033 = vmatpush.bf16.msrb.mxu0 %v1345_v17  ;;  %v1502_v1 = vld [vmem:[%s2089_s1 + $0x198] sm:$0xf0]  ;;  %v1441_v7 = vor.u32 %v1600_v62, %v1438_v63  ;;  %v1582_v10 = vld [vmem:[%s2089_s1 + $0x84] sm:$0xf]  ;;  %v1366_v12 = vld [vmem:[%s2089_s1 + $0x88] sm:$0xf0]  ;;  %v1305_v17 = vor.u32 %v1566_v8, %v1302_v9 }
  0xb8   : > { %1047 = vmatpush.bf16.msrb.mxu1 %v1409_v18  ;;  %v1505_v11 = vor.u32 %v1616_v0, %v1502_v1  ;;  %v1598_v13 = vld [vmem:[%s2089_s1 + $0x104] sm:$0xf]  ;;  %v1430_v14 = vld [vmem:[%s2089_s1 + $0x108] sm:$0xf0]  ;;  %v1369_v18 = vor.u32 %v1582_v10, %v1366_v12  ;;  %v566_v49 = vld [vmem:[%s2091_s25 + $0x18] sm:$0xff]  ;;  %p1554_p5 = scmp.ne.s32.totalorder %s1790_s18, 6 }
  0xb9   : > { %1061 = vmatpush.bf16.msrb.mxu2 %v1473_v19  ;;  %v1614_v15 = vld [vmem:[%s2089_s1 + $0x184] sm:$0xf]  ;;  %v1494_v16 = vld [vmem:[%s2089_s1 + $0x188] sm:$0xf0]  ;;  %v1433_v19 = vor.u32 %v1598_v13, %v1430_v14 }
  0xba   : > { %1075 = vmatpush.bf16.msrb.mxu3 %v1537_v23  ;;  %v1497_v20 = vor.u32 %v1614_v15, %v1494_v16  ;;  %v563_v27 = vld [vmem:[%s2091_s25] sm:$0xff] }
  0xbb   : > { %1034 = vmatpush.bf16.msrb.mxu0 %v1337_v29 }
  0xbc   : > { %1048 = vmatpush.bf16.msrb.mxu1 %v1401_v30 }
  0xbd   : > { %1062 = vmatpush.bf16.msrb.mxu2 %v1465_v31 }
  0xbe   : > { %1076 = vmatpush.bf16.msrb.mxu3 %v1529_v35 }
  0xbf   : > { %1035 = vmatpush.bf16.msrb.mxu0 %v1329_v41  ;;  %v564_v41 = vld [vmem:[%s2091_s25 + $0x8] sm:$0xff] }
  0xc0   : > { %1049 = vmatpush.bf16.msrb.mxu1 %v1393_v42 }
  0xc1   : > { %1063 = vmatpush.bf16.msrb.mxu2 %v1457_v43 }
  0xc2   : > { %1077 = vmatpush.bf16.msrb.mxu3 %v1521_v47 }
  0xc3   : > { %1036 = vmatpush.bf16.msrb.mxu0 %v1321_v53 }
  0xc4   : > { %1050 = vmatpush.bf16.msrb.mxu1 %v1385_v54 }
  0xc5   : > { %1064 = vmatpush.bf16.msrb.mxu2 %v1449_v55 }
  0xc6   : > { %1078 = vmatpush.bf16.msrb.mxu3 %v1513_v59 }
  0xc7   : > { %1037 = vmatpush.bf16.msrb.mxu0 %v1313_v4 }
  0xc8   : > { %1051 = vmatpush.bf16.msrb.mxu1 %v1377_v6 }
  0xc9   : > { %1065 = vmatpush.bf16.msrb.mxu2 %v1441_v7 }
  0xca   : > { %1079 = vmatpush.bf16.msrb.mxu3 %v1505_v11 }
  0xcb   : > { %1038 = vmatpush.bf16.msrb.mxu0 %v1305_v17 }
  0xcc   : > { %1052 = vmatpush.bf16.msrb.mxu1 %v1369_v18 }
  0xcd   : > { %1066 = vmatpush.bf16.msrb.mxu2 %v1433_v19 }
  0xce   : > { %1080 = vmatpush.bf16.msrb.mxu3 %v1497_v20  ;;  %1039 = vmatmul.bf16.vlgmr.msrb.gmra.mxu0 %v2190_v3 }
  0xcf   : > { %1053 = vmatmul.bf16.vlgmr.msrb.gmra.mxu1 %v2192_v5 }
  0xd0   : > { %1067 = vmatmul.bf16.vlgmr.msrb.gmra.mxu2 %v2181_v60 }
  0xd1   : > { %1081 = vmatmul.bf16.vlgmr.msrb.gmra.mxu3 %v2188_v2  ;;  %v565_v2 = vld [vmem:[%s2091_s25 + $0x10] sm:$0xff] }
 0x12b   : > { %v984_v21 = vpop.f32.mrf.mxu0 }
 0x12c   : > { %v998_v22 = vpop.f32.mrf.mxu1 }
 0x12d   : > { %v999_v23 = vadd.f32 %v998_v22, %v984_v21 }
 0x133   : > { %v1012_v24 = vpop.f32.mrf.mxu2  ;;  %v986_v29 = vpop.f32.mrf.mxu0 }
 0x134   : > { %v1013_v25 = vadd.f32 %v1012_v24, %v999_v23  ;;  %v1026_v26 = vpop.f32.mrf.mxu3  ;;  %v1000_v30 = vpop.f32.mrf.mxu1 }
 0x135   : > { %v1001_v31 = vadd.f32 %v1000_v30, %v986_v29 }
 0x136   : > { %v1027_v28 = vadd.f32 %v1026_v26, %v1013_v25 }
 0x138   : > { %v1087_v3 = vadd.f32 %v1027_v28, %v563_v27 }
 0x13a   : > { %1091 = vst [vmem:[%s2091_s25] sm:$0xff] %v1087_v3 }
 0x13b   : > { %v1014_v5 = vpop.f32.mrf.mxu2 }
 0x13c   : > { %v1015_v60 = vadd.f32 %v1014_v5, %v1001_v31  ;;  %v1028_v32 = vpop.f32.mrf.mxu3 }
 0x13e   : > { %v1029_v33 = vadd.f32 %v1028_v32, %v1015_v60 }
 0x140   : > { %v1089_v34 = vadd.f32 %v1029_v33, %v565_v2 }
 0x142   : > { %1093 = vst [vmem:[%s2091_s25 + $0x10] sm:$0xff] %v1089_v34 }
 0x14b   : > { %v1040_v35 = vpop.f32.mrf.mxu0 }
 0x14c   : > { %v1054_v36 = vpop.f32.mrf.mxu1 }
 0x14d   : > { %v1055_v37 = vadd.f32 %v1054_v36, %v1040_v35 }
 0x153   : > { %v1068_v38 = vpop.f32.mrf.mxu2  ;;  %v1042_v43 = vpop.f32.mrf.mxu0 }
 0x154   : > { %v1069_v39 = vadd.f32 %v1068_v38, %v1055_v37  ;;  %v1082_v40 = vpop.f32.mrf.mxu3  ;;  %v1056_v44 = vpop.f32.mrf.mxu1 }
 0x155   : > { %v1057_v46 = vadd.f32 %v1056_v44, %v1042_v43 }
 0x156   : > { %v1083_v42 = vadd.f32 %v1082_v40, %v1069_v39 }
 0x158   : > { %v1088_v45 = vadd.f32 %v1083_v42, %v564_v41 }
 0x15a   : > { %1092 = vst [vmem:[%s2091_s25 + $0x8] sm:$0xff] %v1088_v45 }
 0x15b   : > { %v1070_v47 = vpop.f32.mrf.mxu2 }
 0x15c   : > { %v1071_v48 = vadd.f32 %v1070_v47, %v1057_v46  ;;  %v1084_v50 = vpop.f32.mrf.mxu3 }
 0x15e   : > { %v1085_v51 = vadd.f32 %v1084_v50, %v1071_v48  ;;  %1098 = sbr.rel (%p1554_p5) target bundleno = 367 (0x16f), region = 101 }
 0x160   : > { %v1090_v52 = vadd.f32 %v1085_v51, %v566_v49 }
 0x162   : > { %1094 = vst [vmem:[%s2091_s25 + $0x18] sm:$0xff] %v1090_v52 }
 0x163   : > { %v1099_v53 = vld [vmem:[%s2091_s25] sm:$0xff]  ;;  %v1100_v55 = vld [vmem:[%s2091_s25 + $0x8] sm:$0xff]  ;;  %v1101_v58 = vld [vmem:[%s2091_s25 + $0x10] sm:$0xff] }
 0x164   : > { %v1103_v54 = vld [vmem:[%s551_s5] sm:$0x3] }
 0x165   : > { %v1105_v56 = vperm.slane %v1103_v54, 0  ;;  %v1106_v57 = vperm.slane %v1103_v54, 1 }
 0x167   : > { %v1109_v61 = vadd.f32 %v1105_v56, %v1099_v53  ;;  %v1110_v62 = vadd.f32 %v1106_v57, %v1100_v55  ;;  %v1111_v63 = vadd.f32 %v1105_v56, %v1101_v58 }
 0x169   : > { %v1102_v59 = vld [vmem:[%s2091_s25 + $0x18] sm:$0xff]  ;;  %v1113_v1 = vmax.f32 %v1109_v61, 0.0  ;;  %v1114_v4 = vmax.f32 %v1110_v62, 0.0  ;;  %v1115_v6 = vmax.f32 %v1111_v63, 0.0 }
 0x16a   : > { %v1112_v0 = vadd.f32 %v1106_v57, %v1102_v59 }
 0x16b   : > { %1117 = vst [vmem:[%s2091_s25] sm:$0xff] %v1113_v1 }
 0x16c   : > { %v1116_v7 = vmax.f32 %v1112_v0, 0.0  ;;  %1118 = vst [vmem:[%s2091_s25 + $0x8] sm:$0xff] %v1114_v4 }
 0x16d   : > { %1119 = vst [vmem:[%s2091_s25 + $0x10] sm:$0xff] %v1115_v6 }
 0x16e   : > { %1120 = vst [vmem:[%s2091_s25 + $0x18] sm:$0xff] %v1116_v7 }
 0x16f PF: > { %1127 = sbr.rel (!%p1923_p12) target bundleno = 375 (0x177), region = 105  ;;  %s1630_s14 = sshll.u32 (%p1923_p12), %s1794_s19, 4 }
 0x170   : > { %s1133_s0 = scalar_lea.vmem (%p1923_p12), %s2318_s3, %s1630_s14 }
 0x172   : > { %v1146_v8 = vld [vmem:[%s2091_s25] sm:$0xff] (%p1923_p12) }
 0x173   : > { %v1148_v9 = vld [vmem:[%s2091_s25 + $0x8] sm:$0xff] (%p1923_p12)  ;;  %1147 = vst [vmem:[%s1133_s0] sm:$0xff] (%p1923_p12), %v1146_v8 }
 0x174   : > { %v1150_v10 = vld [vmem:[%s2091_s25 + $0x10] sm:$0xff]  ;;  %1149 = vst [vmem:[%s1133_s0 + $0x8] sm:$0xff] %v1148_v9 }
 0x175   : > { %v1152_v11 = vld [vmem:[%s2091_s25 + $0x18] sm:$0xff]  ;;  %1151 = vst [vmem:[%s1133_s0 + $0x20] sm:$0xff] %v1150_v10 }
 0x176   : > { %1153 = vst [vmem:[%s1133_s0 + $0x28] sm:$0xff] %v1152_v11 }
 0x177 PF: > { %s13_s22 = sadd.s32 1, %s1806_s22   ;;  %s2328_s10 = sld [smem:[#allocation5_spill]] }
 0x178   : > { %p10_p6 = scmp.ge.s32.totalorder %s13_s22, 16   ;;  %s2329_s12 = smov %s1770_s13 }
 0x179   : > { %s2330_s13 = smov %s1921_s9  ;;  %s2331_s14 = smov %s1778_s15 }
 0x17a   : > { %s2332_s15 = smov %s1918_s8  ;;  %s2333_s16 = smov %s1786_s17 }
 0x17b   : > { %s2334_s17 = smov %s1904_s30  ;;  %s2335_s18 = smov %s1798_s20 }
 0x17c   : > { %s2336_s19 = smov %s1802_s21  ;;  %s2337_s20 = smov %s2340_s24 }
 0x17d   : > { %s2338_s21 = smov %s2328_s10  ;;  %12 = sbr.rel (!%p10_p6) target bundleno = 9 (0x9), region = 170 }

// kernel: alexnet_forward.16
= control target key start
LH: loop header
LB: loop body
LE: loop exit
PB: predicated region body
PF: predicated region fallthrough
CT: control target
= control target key end

     0   :  { %s1448_s12 = smov 0   ;;  %s1450_s13 = smov 0   ;;  %s1734_s0 = inlined_call_operand.vmem [shape: bf16[16,3584], index: 0, kind: input, shape index: {}]   ;;  %s1735_s1 = inlined_call_operand.vmem [shape: bf16[3584,256], index: 1, kind: input, shape index: {}]   ;;  %s1736_s2 = inlined_call_operand.vmem [shape: f32[1,256], index: 2, kind: input, shape index: {}]   ;;  %s1737_s3 = inlined_call_operand.vmem [shape: f32[16,256], index: 3, kind: output, shape index: {}]  }
   0x1   :  { %s1452_s14 = smov 0   ;;  %s1454_s15 = smov 0  }
   0x2   :  { %s1456_s16 = smov 0  }
   0x3 LB: > { %s25_s17 = sadd.s32 1, %s1421_s15  ;;  %p48_p1 = scmp.ne.s32.totalorder %s1413_s13, %s1409_s12  ;;  %s1425_s16 = sphi %s1456_s16, %s13_s16   ;;  %s1421_s15 = sphi %s1454_s15, %s1741_s15   ;;  %s1417_s14 = sphi %s1452_s14, %s1740_s14   ;;  %s1413_s13 = sphi %s1450_s13, %s1739_s13   ;;  %s1409_s12 = sphi %s1448_s12, %s1738_s12  }
   0x4   : > { %p26_p0 = scmp.ge.s32.totalorder %s25_s17, 7  ;;  %p49_p2 = scmp.eq.s32.totalorder %s1425_s16, 0 }
   0x5   : > { %s41_s19 = sadd.s32 1, %s1413_s13  ;;  %p989_p5 = scmp.ge.s32.totalorder %s1425_s16, 7 }
   0x6   : > { %s1743_s17 = smov (%p26_p0, %s25_s17), 0  ;;  %p50_p3 = por %p49_p2, %p48_p1 }
   0x7   : > { %s37_s18 = ssub.s32 %s1421_s15, %s1743_s17  ;;  %164 = sbr.rel (%p989_p5) target bundleno = 20 (0x14), region = 20 }
   0x8   : > { %p39_p4 = scmp.eq.s32.totalorder %s37_s18, 0 }
   0xa   : > { %s1483_s20 = scalar_select %p39_p4, %s1413_s13, %s41_s19  }
   0xc   : > { %167 = sbr.rel (!%p50_p3) target bundleno = 20 (0x14), region = 24  ;;  %s169_s21 = sand.u32 (%p50_p3), 1, %s1413_s13  }
   0xd   : > { %s1276_s22 = sshll.u32 (%p50_p3), %s1421_s15, 4  ;;  %s990_s23 = sshll.u32 (%p50_p3), %s169_s21, 5 }
   0xe   : > { %s177_s26 = scalar_lea.vmem (%p50_p3), %s1734_s0, %s1276_s22  ;;  %s171_s27 = scalar_lea.vmem (%p50_p3), [#allocation2], %s990_s23 }
   0xf   : > { %v190_v0 = vld [vmem:[%s177_s26] sm:$0xff] (%p50_p3)  ;;  %v192_v1 = vld [vmem:[%s177_s26 + $0x8] sm:$0xff] (%p50_p3)  ;;  %v194_v2 = vld [vmem:[%s177_s26 + $0x70] sm:$0xff] (%p50_p3) }
  0x10   : > { %191 = vst [vmem:[%s171_s27] sm:$0xff] (%p50_p3), %v190_v0  ;;  %v196_v3 = vld [vmem:[%s177_s26 + $0x78] sm:$0xff] (%p50_p3) }
  0x11   : > { %193 = vst [vmem:[%s171_s27 + $0x8] sm:$0xff] %v192_v1 }
  0x12   : > { %195 = vst [vmem:[%s171_s27 + $0x10] sm:$0xff] %v194_v2 }
  0x13   : > { %197 = vst [vmem:[%s171_s27 + $0x18] sm:$0xff] %v196_v3 }
  0x14 PF: > { %p993_p6 = scmp.ge.s32.totalorder %s1425_s16, 1  ;;  %p217_p7 = scmp.lt.s32.totalorder %s1425_s16, 8 }
  0x16   : > { %p218_p8 = pnand %p993_p6, %p217_p7 }
  0x17   : > { %s224_s28 = sand.u32 (!%p218_p8), 1, %s1409_s12   ;;  %s995_s29 = sshll.u32 (!%p218_p8), %s1417_s14, 6 }
  0x18   : > { %221 = sbr.rel (%p218_p8) target bundleno = 266 (0x10a), region = 51  ;;  %s994_s30 = sshll.u32 (!%p218_p8), %s224_s28, 5 }
  0x19   : > { %p270_p9 = scmp.lt.s32.totalorder (!%p218_p8), %s995_s29, 447  ;;  %s1500_s8 = scalar_lea.vmem (!%p218_p8), [#allocation2], %s994_s30 }
  0x1a   : > { %p998_p10 = scmp.ne.s32.totalorder (!%p218_p8), %s1417_s14, 0 }
  0x1d   : > { %s1745_s29 = smov (!%p270_p9, %s995_s29), 447  ;;  %300 = sbr.rel (%p998_p10) target bundleno = 39 (0x27), region = 59 }
  0x1e   : > { %s1277_s4 = sshll.u32 %s1745_s29, 3 }
  0x1f   : > { %s1498_s7 = scalar_lea.vmem %s1735_s1, %s1277_s4 }
  0x22   : > { %v1427_v4 = vmov 0.0  }
  0x23   : > { %301 = vst [vmem:[%s1737_s3] sm:$0xff] %v1427_v4 }
  0x24   : > { %302 = vst [vmem:[%s1737_s3 + $0x8] sm:$0xff] %v1427_v4 }
  0x25   : > { %303 = vst [vmem:[%s1737_s3 + $0x10] sm:$0xff] %v1427_v4 }
  0x26   : > { %304 = vst [vmem:[%s1737_s3 + $0x18] sm:$0xff] %v1427_v4 }
  0x27 PF: > { %v1073_v5 = vld [vmem:[%s1498_s7 + $0x70] sm:$0xf]  ;;  %v1297_v6 = vld [vmem:[%s1498_s7 + $0x74] sm:$0xf0]  ;;  %v1065_v16 = vld [vmem:[%s1498_s7 + $0x60] sm:$0xf] }
  0x28   : > { %v1137_v7 = vld [vmem:[%s1498_s7 + $0xf0] sm:$0xf]  ;;  %v1074_v8 = vor.u32 %v1297_v6, %v1073_v5  ;;  %v1313_v9 = vld [vmem:[%s1498_s7 + $0xf4] sm:$0xf0]  ;;  %v1295_v18 = vld [vmem:[%s1498_s7 + $0x64] sm:$0xf0] }
  0x29   : > { %v1201_v10 = vld [vmem:[%s1498_s7 + $0x170] sm:$0xf]  ;;  %v1329_v11 = vld [vmem:[%s1498_s7 + $0x174] sm:$0xf0]  ;;  %v1138_v12 = vor.u32 %v1313_v9, %v1137_v7  ;;  %v1129_v19 = vld [vmem:[%s1498_s7 + $0xe0] sm:$0xf]  ;;  %v1066_v21 = vor.u32 %v1295_v18, %v1065_v16 }
  0x2a   : > { %v1202_v13 = vor.u32 %v1329_v11, %v1201_v10  ;;  %v1265_v14 = vld [vmem:[%s1498_s7 + $0x1f0] sm:$0xf]  ;;  %v1345_v15 = vld [vmem:[%s1498_s7 + $0x1f4] sm:$0xf0]  ;;  %717 = vmatpush.bf16.msra.mxu0 %v1074_v8  ;;  %v1311_v20 = vld [vmem:[%s1498_s7 + $0xe4] sm:$0xf0] }
  0x2b   : > { %v1266_v17 = vor.u32 %v1345_v15, %v1265_v14  ;;  %731 = vmatpush.bf16.msra.mxu1 %v1138_v12  ;;  %v1130_v22 = vor.u32 %v1311_v20, %v1129_v19  ;;  %v1193_v23 = vld [vmem:[%s1498_s7 + $0x160] sm:$0xf]  ;;  %v1327_v24 = vld [vmem:[%s1498_s7 + $0x164] sm:$0xf0]  ;;  %v1057_v28 = vld [vmem:[%s1498_s7 + $0x50] sm:$0xf] }
  0x2c   : > { %745 = vmatpush.bf16.msra.mxu2 %v1202_v13  ;;  %v1257_v25 = vld [vmem:[%s1498_s7 + $0x1e0] sm:$0xf]  ;;  %v1194_v26 = vor.u32 %v1327_v24, %v1193_v23  ;;  %v1343_v27 = vld [vmem:[%s1498_s7 + $0x1e4] sm:$0xf0]  ;;  %v1293_v29 = vld [vmem:[%s1498_s7 + $0x54] sm:$0xf0] }
  0x2d   : > { %759 = vmatpush.bf16.msra.mxu3 %v1266_v17  ;;  %v1258_v30 = vor.u32 %v1343_v27, %v1257_v25  ;;  %v1121_v31 = vld [vmem:[%s1498_s7 + $0xd0] sm:$0xf]  ;;  %v1309_v32 = vld [vmem:[%s1498_s7 + $0xd4] sm:$0xf0]  ;;  %v1058_v34 = vor.u32 %v1293_v29, %v1057_v28  ;;  %v1049_v40 = vld [vmem:[%s1498_s7 + $0x40] sm:$0xf] }
  0x2e   : > { %v1185_v33 = vld [vmem:[%s1498_s7 + $0x150] sm:$0xf]  ;;  %718 = vmatpush.bf16.msra.mxu0 %v1066_v21  ;;  %v1325_v35 = vld [vmem:[%s1498_s7 + $0x154] sm:$0xf0]  ;;  %v1122_v38 = vor.u32 %v1309_v32, %v1121_v31  ;;  %v1291_v41 = vld [vmem:[%s1498_s7 + $0x44] sm:$0xf0] }
  0x2f   : > { %v1249_v36 = vld [vmem:[%s1498_s7 + $0x1d0] sm:$0xf]  ;;  %v1341_v37 = vld [vmem:[%s1498_s7 + $0x1d4] sm:$0xf0]  ;;  %732 = vmatpush.bf16.msra.mxu1 %v1130_v22  ;;  %v1186_v39 = vor.u32 %v1325_v35, %v1185_v33  ;;  %v1113_v42 = vld [vmem:[%s1498_s7 + $0xc0] sm:$0xf]  ;;  %v1050_v49 = vor.u32 %v1291_v41, %v1049_v40 }
  0x30   : > { %746 = vmatpush.bf16.msra.mxu2 %v1194_v26  ;;  %v1250_v43 = vor.u32 %v1341_v37, %v1249_v36  ;;  %v1307_v44 = vld [vmem:[%s1498_s7 + $0xc4] sm:$0xf0]  ;;  %v1177_v45 = vld [vmem:[%s1498_s7 + $0x140] sm:$0xf]  ;;  %v1041_v52 = vld [vmem:[%s1498_s7 + $0x30] sm:$0xf] }
  0x31   : > { %760 = vmatpush.bf16.msra.mxu3 %v1258_v30  ;;  %v1323_v46 = vld [vmem:[%s1498_s7 + $0x144] sm:$0xf0]  ;;  %v1241_v47 = vld [vmem:[%s1498_s7 + $0x1c0] sm:$0xf]  ;;  %v1114_v50 = vor.u32 %v1307_v44, %v1113_v42  ;;  %v1289_v53 = vld [vmem:[%s1498_s7 + $0x34] sm:$0xf0] }
  0x32   : > { %v1339_v48 = vld [vmem:[%s1498_s7 + $0x1c4] sm:$0xf0]  ;;  %719 = vmatpush.bf16.msra.mxu0 %v1058_v34  ;;  %v1178_v51 = vor.u32 %v1323_v46, %v1177_v45  ;;  %v1105_v54 = vld [vmem:[%s1498_s7 + $0xb0] sm:$0xf]  ;;  %v1305_v56 = vld [vmem:[%s1498_s7 + $0xb4] sm:$0xf0]  ;;  %v1042_v61 = vor.u32 %v1289_v53, %v1041_v52 }
  0x33   : > { %733 = vmatpush.bf16.msra.mxu1 %v1122_v38  ;;  %v1242_v55 = vor.u32 %v1339_v48, %v1241_v47  ;;  %v1169_v57 = vld [vmem:[%s1498_s7 + $0x130] sm:$0xf]  ;;  %v1321_v58 = vld [vmem:[%s1498_s7 + $0x134] sm:$0xf0]  ;;  %v1106_v62 = vor.u32 %v1305_v56, %v1105_v54  ;;  %v1033_v0 = vld [vmem:[%s1498_s7 + $0x20] sm:$0xf] }
  0x34   : > { %747 = vmatpush.bf16.msra.mxu2 %v1186_v39  ;;  %v1233_v59 = vld [vmem:[%s1498_s7 + $0x1b0] sm:$0xf]  ;;  %v1337_v60 = vld [vmem:[%s1498_s7 + $0x1b4] sm:$0xf0]  ;;  %v1170_v63 = vor.u32 %v1321_v58, %v1169_v57  ;;  %v1287_v1 = vld [vmem:[%s1498_s7 + $0x24] sm:$0xf0] }
  0x35   : > { %761 = vmatpush.bf16.msra.mxu3 %v1250_v43  ;;  %v1097_v2 = vld [vmem:[%s1498_s7 + $0xa0] sm:$0xf]  ;;  %v1234_v3 = vor.u32 %v1337_v60, %v1233_v59  ;;  %v1303_v4 = vld [vmem:[%s1498_s7 + $0xa4] sm:$0xf0]  ;;  %v1034_v9 = vor.u32 %v1287_v1, %v1033_v0  ;;  %v1025_v12 = vld [vmem:[%s1498_s7 + $0x10] sm:$0xf] }
  0x36   : > { %720 = vmatpush.bf16.msra.mxu0 %v1050_v49  ;;  %v1161_v5 = vld [vmem:[%s1498_s7 + $0x120] sm:$0xf]  ;;  %v1319_v6 = vld [vmem:[%s1498_s7 + $0x124] sm:$0xf0]  ;;  %v1098_v10 = vor.u32 %v1303_v4, %v1097_v2  ;;  %v1285_v13 = vld [vmem:[%s1498_s7 + $0x14] sm:$0xf0] }
  0x37   : > { %734 = vmatpush.bf16.msra.mxu1 %v1114_v50  ;;  %v1225_v7 = vld [vmem:[%s1498_s7 + $0x1a0] sm:$0xf]  ;;  %v1335_v8 = vld [vmem:[%s1498_s7 + $0x1a4] sm:$0xf0]  ;;  %v1162_v11 = vor.u32 %v1319_v6, %v1161_v5  ;;  %v1089_v14 = vld [vmem:[%s1498_s7 + $0x90] sm:$0xf]  ;;  %v1026_v22 = vor.u32 %v1285_v13, %v1025_v12 }
  0x38   : > { %748 = vmatpush.bf16.msra.mxu2 %v1178_v51  ;;  %v1226_v15 = vor.u32 %v1335_v8, %v1225_v7  ;;  %v1301_v16 = vld [vmem:[%s1498_s7 + $0x94] sm:$0xf0]  ;;  %v1153_v17 = vld [vmem:[%s1498_s7 + $0x110] sm:$0xf]  ;;  %v1017_v21 = vld [vmem:[%s1498_s7] sm:$0xf] }
  0x39   : > { %762 = vmatpush.bf16.msra.mxu3 %v1242_v55  ;;  %v1317_v18 = vld [vmem:[%s1498_s7 + $0x114] sm:$0xf0]  ;;  %v1217_v19 = vld [vmem:[%s1498_s7 + $0x190] sm:$0xf]  ;;  %v1283_v23 = vld [vmem:[%s1498_s7 + $0x4] sm:$0xf0]  ;;  %v1090_v26 = vor.u32 %v1301_v16, %v1089_v14 }
  0x3a   : > { %721 = vmatpush.bf16.msra.mxu0 %v1042_v61  ;;  %v1333_v20 = vld [vmem:[%s1498_s7 + $0x194] sm:$0xf0]  ;;  %v1081_v24 = vld [vmem:[%s1498_s7 + $0x80] sm:$0xf]  ;;  %v1299_v25 = vld [vmem:[%s1498_s7 + $0x84] sm:$0xf0]  ;;  %v1154_v27 = vor.u32 %v1317_v18, %v1153_v17  ;;  %v1018_v38 = vor.u32 %v1283_v23, %v1017_v21 }
  0x3b   : > { %735 = vmatpush.bf16.msra.mxu1 %v1106_v62  ;;  %v1145_v28 = vld [vmem:[%s1498_s7 + $0x100] sm:$0xf]  ;;  %v1315_v29 = vld [vmem:[%s1498_s7 + $0x104] sm:$0xf0]  ;;  %v1218_v31 = vor.u32 %v1333_v20, %v1217_v19  ;;  %v1296_v33 = vld [vmem:[%s1498_s7 + $0x74] sm:$0xf]  ;;  %v1082_v42 = vor.u32 %v1299_v25, %v1081_v24 }
  0x3c   : > { %749 = vmatpush.bf16.msra.mxu2 %v1170_v63  ;;  %v1209_v30 = vld [vmem:[%s1498_s7 + $0x180] sm:$0xf]  ;;  %v1331_v32 = vld [vmem:[%s1498_s7 + $0x184] sm:$0xf0]  ;;  %v1075_v34 = vld [vmem:[%s1498_s7 + $0x78] sm:$0xf0]  ;;  %v1146_v43 = vor.u32 %v1315_v29, %v1145_v28 }
  0x3d   : > { %763 = vmatpush.bf16.msra.mxu3 %v1234_v3  ;;  %v1312_v35 = vld [vmem:[%s1498_s7 + $0xf4] sm:$0xf]  ;;  %v1139_v36 = vld [vmem:[%s1498_s7 + $0xf8] sm:$0xf0]  ;;  %v1294_v44 = vld [vmem:[%s1498_s7 + $0x64] sm:$0xf]  ;;  %v1210_v48 = vor.u32 %v1331_v32, %v1209_v30  ;;  %v1078_v49 = vor.u32 %v1296_v33, %v1075_v34 }
  0x3e   : > { %722 = vmatpush.bf16.msra.mxu0 %v1034_v9  ;;  %v1328_v37 = vld [vmem:[%s1498_s7 + $0x174] sm:$0xf]  ;;  %v1203_v39 = vld [vmem:[%s1498_s7 + $0x178] sm:$0xf0]  ;;  %v1067_v45 = vld [vmem:[%s1498_s7 + $0x68] sm:$0xf0]  ;;  %v1142_v54 = vor.u32 %v1312_v35, %v1139_v36 }
  0x3f   : > { %736 = vmatpush.bf16.msra.mxu1 %v1098_v10  ;;  %v1344_v40 = vld [vmem:[%s1498_s7 + $0x1f4] sm:$0xf]  ;;  %v1267_v41 = vld [vmem:[%s1498_s7 + $0x1f8] sm:$0xf0]  ;;  %v1009_v46 = vld [vmem:[%s1500_s8 + $0x8] sm:$0xf]  ;;  %v1206_v55 = vor.u32 %v1328_v37, %v1203_v39  ;;  %v1070_v4 = vor.u32 %v1294_v44, %v1067_v45 }
  0x40   : > { %750 = vmatpush.bf16.msra.mxu2 %v1162_v11  ;;  %v1281_v47 = vld [vmem:[%s1500_s8 + $0x14] sm:$0xf0]  ;;  %v1310_v50 = vld [vmem:[%s1498_s7 + $0xe4] sm:$0xf]  ;;  %v1131_v51 = vld [vmem:[%s1498_s7 + $0xe8] sm:$0xf0]  ;;  %v1270_v59 = vor.u32 %v1344_v40, %v1267_v41 }
  0x41   : > { %764 = vmatpush.bf16.msra.mxu3 %v1226_v15  ;;  %v1326_v52 = vld [vmem:[%s1498_s7 + $0x164] sm:$0xf]  ;;  %v1195_v53 = vld [vmem:[%s1498_s7 + $0x168] sm:$0xf0]  ;;  %v1011_v57 = vld [vmem:[%s1500_s8 + $0x18] sm:$0xf0]  ;;  %v1598_v60 = vor.u32 %v1281_v47, %v1009_v46  ;;  %v1134_v6 = vor.u32 %v1310_v50, %v1131_v51 }
  0x42   : > { %723 = vmatpush.bf16.msra.mxu0 %v1026_v22  ;;  %v1279_v56 = vld [vmem:[%s1500_s8 + $0xc] sm:$0xf]  ;;  %v1001_v58 = vld [vmem:[%s1500_s8] sm:$0xf]  ;;  %v1280_v61 = vld [vmem:[%s1500_s8 + $0xc] sm:$0xf0]  ;;  %v1198_v7 = vor.u32 %v1326_v52, %v1195_v53 }
  0x43   : > { %737 = vmatpush.bf16.msra.mxu1 %v1090_v26  ;;  %v1278_v62 = vld [vmem:[%s1500_s8 + $0x4] sm:$0xf]  ;;  %v1003_v63 = vld [vmem:[%s1500_s8 + $0x10] sm:$0xf0]  ;;  %v1259_v1 = vld [vmem:[%s1498_s7 + $0x1e8] sm:$0xf0]  ;;  %v1605_v2 = vor.u32 %v1279_v56, %v1011_v57  ;;  %v1607_v3 = vor.u32 %v1280_v61, %v1001_v58 }
  0x44   : > { %751 = vmatpush.bf16.msra.mxu2 %v1154_v27  ;;  %v1342_v0 = vld [vmem:[%s1498_s7 + $0x1e4] sm:$0xf]  ;;  %v1609_v5 = vor.u32 %v1278_v62, %v1003_v63  ;;  %v1292_v8 = vld [vmem:[%s1498_s7 + $0x54] sm:$0xf]  ;;  %v1059_v9 = vld [vmem:[%s1498_s7 + $0x58] sm:$0xf0] }
  0x45   : > { %765 = vmatpush.bf16.msra.mxu3 %v1218_v31  ;;  %v1308_v10 = vld [vmem:[%s1498_s7 + $0xd4] sm:$0xf]  ;;  %v1262_v11 = vor.u32 %v1342_v0, %v1259_v1  ;;  %v1123_v12 = vld [vmem:[%s1498_s7 + $0xd8] sm:$0xf0]  ;;  %v1062_v17 = vor.u32 %v1292_v8, %v1059_v9  ;;  %v1290_v20 = vld [vmem:[%s1498_s7 + $0x44] sm:$0xf] }
  0x46   : > { %724 = vmatpush.bf16.msra.mxu0 %v1018_v38  ;;  %v1324_v13 = vld [vmem:[%s1498_s7 + $0x154] sm:$0xf]  ;;  %v1187_v14 = vld [vmem:[%s1498_s7 + $0x158] sm:$0xf0]  ;;  %v1126_v18 = vor.u32 %v1308_v10, %v1123_v12  ;;  %v1051_v21 = vld [vmem:[%s1498_s7 + $0x48] sm:$0xf0] }
  0x47   : > { %738 = vmatpush.bf16.msra.mxu1 %v1082_v42  ;;  %v1340_v15 = vld [vmem:[%s1498_s7 + $0x1d4] sm:$0xf]  ;;  %v1251_v16 = vld [vmem:[%s1498_s7 + $0x1d8] sm:$0xf0]  ;;  %v1190_v19 = vor.u32 %v1324_v13, %v1187_v14  ;;  %v1306_v22 = vld [vmem:[%s1498_s7 + $0xc4] sm:$0xf]  ;;  %v1054_v29 = vor.u32 %v1290_v20, %v1051_v21 }
  0x48   : > { %752 = vmatpush.bf16.msra.mxu2 %v1146_v43  ;;  %v1254_v23 = vor.u32 %v1340_v15, %v1251_v16  ;;  %v1115_v24 = vld [vmem:[%s1498_s7 + $0xc8] sm:$0xf0]  ;;  %v1322_v25 = vld [vmem:[%s1498_s7 + $0x144] sm:$0xf]  ;;  %v1288_v32 = vld [vmem:[%s1498_s7 + $0x34] sm:$0xf] }
  0x49   : > { %766 = vmatpush.bf16.msra.mxu3 %v1210_v48  ;;  %725 = vmatmul.bf16.vlgmr.msra.gmra.mxu0 %v1607_v3  ;;  %v1179_v26 = vld [vmem:[%s1498_s7 + $0x148] sm:$0xf0]  ;;  %v1338_v27 = vld [vmem:[%s1498_s7 + $0x1c4] sm:$0xf]  ;;  %v1118_v30 = vor.u32 %v1306_v22, %v1115_v24  ;;  %v1043_v33 = vld [vmem:[%s1498_s7 + $0x38] sm:$0xf0] }
  0x4a   : > { %773 = vmatpush.bf16.msrb.mxu0 %v1078_v49  ;;  %739 = vmatmul.bf16.vlgmr.msra.gmra.mxu1 %v1609_v5  ;;  %v1243_v28 = vld [vmem:[%s1498_s7 + $0x1c8] sm:$0xf0]  ;;  %v1182_v31 = vor.u32 %v1322_v25, %v1179_v26  ;;  %v1304_v34 = vld [vmem:[%s1498_s7 + $0xb4] sm:$0xf]  ;;  %v1107_v36 = vld [vmem:[%s1498_s7 + $0xb8] sm:$0xf0]  ;;  %v1046_v41 = vor.u32 %v1288_v32, %v1043_v33 }
  0x4b   : > { %787 = vmatpush.bf16.msrb.mxu1 %v1142_v54  ;;  %753 = vmatmul.bf16.vlgmr.msra.gmra.mxu2 %v1598_v60  ;;  %v1246_v35 = vor.u32 %v1338_v27, %v1243_v28  ;;  %v1320_v37 = vld [vmem:[%s1498_s7 + $0x134] sm:$0xf]  ;;  %v1171_v38 = vld [vmem:[%s1498_s7 + $0x138] sm:$0xf0]  ;;  %v1110_v42 = vor.u32 %v1304_v34, %v1107_v36  ;;  %v1286_v44 = vld [vmem:[%s1498_s7 + $0x24] sm:$0xf] }
  0x4c   : > { %801 = vmatpush.bf16.msrb.mxu2 %v1206_v55  ;;  %767 = vmatmul.bf16.vlgmr.msra.gmra.mxu3 %v1605_v2  ;;  %v1336_v39 = vld [vmem:[%s1498_s7 + $0x1b4] sm:$0xf]  ;;  %v1235_v40 = vld [vmem:[%s1498_s7 + $0x1b8] sm:$0xf0]  ;;  %v1174_v43 = vor.u32 %v1320_v37, %v1171_v38  ;;  %v1035_v45 = vld [vmem:[%s1498_s7 + $0x28] sm:$0xf0] }
  0x4d   : > { %815 = vmatpush.bf16.msrb.mxu3 %v1270_v59  ;;  %v1302_v46 = vld [vmem:[%s1498_s7 + $0xa4] sm:$0xf]  ;;  %v1238_v47 = vor.u32 %v1336_v39, %v1235_v40  ;;  %v1099_v48 = vld [vmem:[%s1498_s7 + $0xa8] sm:$0xf0]  ;;  %v1038_v53 = vor.u32 %v1286_v44, %v1035_v45  ;;  %v1284_v56 = vld [vmem:[%s1498_s7 + $0x14] sm:$0xf] }
  0x4e   : > { %774 = vmatpush.bf16.msrb.mxu0 %v1070_v4  ;;  %v1318_v49 = vld [vmem:[%s1498_s7 + $0x124] sm:$0xf]  ;;  %v1163_v50 = vld [vmem:[%s1498_s7 + $0x128] sm:$0xf0]  ;;  %v1102_v54 = vor.u32 %v1302_v46, %v1099_v48  ;;  %v1027_v57 = vld [vmem:[%s1498_s7 + $0x18] sm:$0xf0] }
  0x4f   : > { %788 = vmatpush.bf16.msrb.mxu1 %v1134_v6  ;;  %v1334_v51 = vld [vmem:[%s1498_s7 + $0x1a4] sm:$0xf]  ;;  %v1227_v52 = vld [vmem:[%s1498_s7 + $0x1a8] sm:$0xf0]  ;;  %v1166_v55 = vor.u32 %v1318_v49, %v1163_v50  ;;  %v1300_v58 = vld [vmem:[%s1498_s7 + $0x94] sm:$0xf]  ;;  %v1030_v4 = vor.u32 %v1284_v56, %v1027_v57 }
  0x50   : > { %802 = vmatpush.bf16.msrb.mxu2 %v1198_v7  ;;  %v1230_v59 = vor.u32 %v1334_v51, %v1227_v52  ;;  %v1091_v61 = vld [vmem:[%s1498_s7 + $0x98] sm:$0xf0]  ;;  %v1316_v62 = vld [vmem:[%s1498_s7 + $0x114] sm:$0xf]  ;;  %v1282_v8 = vld [vmem:[%s1498_s7 + $0x4] sm:$0xf] }
  0x51   : > { %816 = vmatpush.bf16.msrb.mxu3 %v1262_v11  ;;  %v1155_v63 = vld [vmem:[%s1498_s7 + $0x118] sm:$0xf0]  ;;  %v1332_v0 = vld [vmem:[%s1498_s7 + $0x194] sm:$0xf]  ;;  %v1094_v6 = vor.u32 %v1300_v58, %v1091_v61  ;;  %v1019_v9 = vld [vmem:[%s1498_s7 + $0x8] sm:$0xf0] }
  0x52   : > { %775 = vmatpush.bf16.msrb.mxu0 %v1062_v17  ;;  %v1219_v1 = vld [vmem:[%s1498_s7 + $0x198] sm:$0xf0]  ;;  %v1158_v7 = vor.u32 %v1316_v62, %v1155_v63  ;;  %v1298_v10 = vld [vmem:[%s1498_s7 + $0x84] sm:$0xf]  ;;  %v1083_v12 = vld [vmem:[%s1498_s7 + $0x88] sm:$0xf0]  ;;  %v1022_v17 = vor.u32 %v1282_v8, %v1019_v9 }
  0x53   : > { %789 = vmatpush.bf16.msrb.mxu1 %v1126_v18  ;;  %v1222_v11 = vor.u32 %v1332_v0, %v1219_v1  ;;  %v1314_v13 = vld [vmem:[%s1498_s7 + $0x104] sm:$0xf]  ;;  %v1147_v14 = vld [vmem:[%s1498_s7 + $0x108] sm:$0xf0]  ;;  %v1086_v18 = vor.u32 %v1298_v10, %v1083_v12  ;;  %v307_v32 = vld [vmem:[%s1737_s3 + $0x10] sm:$0xff]  ;;  %p1271_p11 = scmp.ne.s32.totalorder %s1417_s14, 6 }
  0x54   : > { %803 = vmatpush.bf16.msrb.mxu2 %v1190_v19  ;;  %v1330_v15 = vld [vmem:[%s1498_s7 + $0x184] sm:$0xf]  ;;  %v1211_v16 = vld [vmem:[%s1498_s7 + $0x188] sm:$0xf0]  ;;  %v1150_v19 = vor.u32 %v1314_v13, %v1147_v14  ;;  %v308_v49 = vld [vmem:[%s1737_s3 + $0x18] sm:$0xff] }
  0x55   : > { %817 = vmatpush.bf16.msrb.mxu3 %v1254_v23  ;;  %v1214_v20 = vor.u32 %v1330_v15, %v1211_v16  ;;  %v305_v27 = vld [vmem:[%s1737_s3] sm:$0xff] }
  0x56   : > { %776 = vmatpush.bf16.msrb.mxu0 %v1054_v29 }
  0x57   : > { %790 = vmatpush.bf16.msrb.mxu1 %v1118_v30 }
  0x58   : > { %804 = vmatpush.bf16.msrb.mxu2 %v1182_v31 }
  0x59   : > { %818 = vmatpush.bf16.msrb.mxu3 %v1246_v35 }
  0x5a   : > { %777 = vmatpush.bf16.msrb.mxu0 %v1046_v41  ;;  %v306_v41 = vld [vmem:[%s1737_s3 + $0x8] sm:$0xff] }
  0x5b   : > { %791 = vmatpush.bf16.msrb.mxu1 %v1110_v42 }
  0x5c   : > { %805 = vmatpush.bf16.msrb.mxu2 %v1174_v43 }
  0x5d   : > { %819 = vmatpush.bf16.msrb.mxu3 %v1238_v47 }
  0x5e   : > { %778 = vmatpush.bf16.msrb.mxu0 %v1038_v53 }
  0x5f   : > { %792 = vmatpush.bf16.msrb.mxu1 %v1102_v54 }
  0x60   : > { %806 = vmatpush.bf16.msrb.mxu2 %v1166_v55 }
  0x61   : > { %820 = vmatpush.bf16.msrb.mxu3 %v1230_v59 }
  0x62   : > { %779 = vmatpush.bf16.msrb.mxu0 %v1030_v4 }
  0x63   : > { %793 = vmatpush.bf16.msrb.mxu1 %v1094_v6 }
  0x64   : > { %807 = vmatpush.bf16.msrb.mxu2 %v1158_v7 }
  0x65   : > { %821 = vmatpush.bf16.msrb.mxu3 %v1222_v11 }
  0x66   : > { %780 = vmatpush.bf16.msrb.mxu0 %v1022_v17 }
  0x67   : > { %794 = vmatpush.bf16.msrb.mxu1 %v1086_v18 }
  0x68   : > { %808 = vmatpush.bf16.msrb.mxu2 %v1150_v19 }
  0x69   : > { %822 = vmatpush.bf16.msrb.mxu3 %v1214_v20  ;;  %781 = vmatmul.bf16.vlgmr.msrb.gmra.mxu0 %v1607_v3 }
  0x6a   : > { %795 = vmatmul.bf16.vlgmr.msrb.gmra.mxu1 %v1609_v5 }
  0x6b   : > { %809 = vmatmul.bf16.vlgmr.msrb.gmra.mxu2 %v1598_v60 }
  0x6c   : > { %823 = vmatmul.bf16.vlgmr.msrb.gmra.mxu3 %v1605_v2 }
  0xc6   : > { %v726_v21 = vpop.f32.mrf.mxu0 }
  0xc7   : > { %v740_v22 = vpop.f32.mrf.mxu1 }
  0xc8   : > { %v741_v23 = vadd.f32 %v740_v22, %v726_v21 }
  0xce   : > { %v754_v24 = vpop.f32.mrf.mxu2  ;;  %v728_v29 = vpop.f32.mrf.mxu0 }
  0xcf   : > { %v755_v25 = vadd.f32 %v754_v24, %v741_v23  ;;  %v768_v26 = vpop.f32.mrf.mxu3  ;;  %v742_v30 = vpop.f32.mrf.mxu1 }
  0xd0   : > { %v743_v31 = vadd.f32 %v742_v30, %v728_v29 }
  0xd1   : > { %v769_v28 = vadd.f32 %v768_v26, %v755_v25 }
  0xd3   : > { %v829_v3 = vadd.f32 %v769_v28, %v305_v27 }
  0xd5   : > { %833 = vst [vmem:[%s1737_s3] sm:$0xff] %v829_v3 }
  0xd6   : > { %v756_v60 = vpop.f32.mrf.mxu2 }
  0xd7   : > { %v757_v2 = vadd.f32 %v756_v60, %v743_v31  ;;  %v770_v5 = vpop.f32.mrf.mxu3 }
  0xd9   : > { %v771_v33 = vadd.f32 %v770_v5, %v757_v2 }
  0xdb   : > { %v831_v34 = vadd.f32 %v771_v33, %v307_v32 }
  0xdd   : > { %835 = vst [vmem:[%s1737_s3 + $0x10] sm:$0xff] %v831_v34 }
  0xe6   : > { %v782_v35 = vpop.f32.mrf.mxu0 }
  0xe7   : > { %v796_v36 = vpop.f32.mrf.mxu1 }
  0xe8   : > { %v797_v37 = vadd.f32 %v796_v36, %v782_v35 }
  0xee   : > { %v810_v38 = vpop.f32.mrf.mxu2  ;;  %v784_v43 = vpop.f32.mrf.mxu0 }
  0xef   : > { %v811_v39 = vadd.f32 %v810_v38, %v797_v37  ;;  %v824_v40 = vpop.f32.mrf.mxu3  ;;  %v798_v44 = vpop.f32.mrf.mxu1 }
  0xf0   : > { %v799_v46 = vadd.f32 %v798_v44, %v784_v43 }
  0xf1   : > { %v825_v42 = vadd.f32 %v824_v40, %v811_v39 }
  0xf3   : > { %v830_v45 = vadd.f32 %v825_v42, %v306_v41 }
  0xf5   : > { %834 = vst [vmem:[%s1737_s3 + $0x8] sm:$0xff] %v830_v45 }
  0xf6   : > { %v812_v47 = vpop.f32.mrf.mxu2 }
  0xf7   : > { %v813_v48 = vadd.f32 %v812_v47, %v799_v46  ;;  %v826_v50 = vpop.f32.mrf.mxu3 }
  0xf9   : > { %v827_v51 = vadd.f32 %v826_v50, %v813_v48  ;;  %840 = sbr.rel (%p1271_p11) target bundleno = 266 (0x10a), region = 63 }
  0xfb   : > { %v832_v52 = vadd.f32 %v827_v51, %v308_v49 }
  0xfd   : > { %836 = vst [vmem:[%s1737_s3 + $0x18] sm:$0xff] %v832_v52 }
  0xfe   : > { %v841_v53 = vld [vmem:[%s1737_s3] sm:$0xff]  ;;  %v842_v55 = vld [vmem:[%s1737_s3 + $0x8] sm:$0xff]  ;;  %v843_v58 = vld [vmem:[%s1737_s3 + $0x10] sm:$0xff] }
  0xff   : > { %v845_v54 = vld [vmem:[%s1736_s2] sm:$0x3] }
 0x100   : > { %v847_v56 = vperm.slane %v845_v54, 0  ;;  %v848_v57 = vperm.slane %v845_v54, 1 }
 0x102   : > { %v851_v61 = vadd.f32 %v847_v56, %v841_v53  ;;  %v852_v62 = vadd.f32 %v848_v57, %v842_v55  ;;  %v853_v63 = vadd.f32 %v847_v56, %v843_v58 }
 0x104   : > { %v844_v59 = vld [vmem:[%s1737_s3 + $0x18] sm:$0xff]  ;;  %v855_v1 = vmax.f32 %v851_v61, 0.0  ;;  %v856_v4 = vmax.f32 %v852_v62, 0.0  ;;  %v857_v6 = vmax.f32 %v853_v63, 0.0 }
 0x105   : > { %v854_v0 = vadd.f32 %v848_v57, %v844_v59 }
 0x106   : > { %859 = vst [vmem:[%s1737_s3] sm:$0xff] %v855_v1 }
 0x107   : > { %v858_v7 = vmax.f32 %v854_v0, 0.0  ;;  %860 = vst [vmem:[%s1737_s3 + $0x8] sm:$0xff] %v856_v4 }
 0x108   : > { %861 = vst [vmem:[%s1737_s3 + $0x10] sm:$0xff] %v857_v6 }
 0x109   : > { %862 = vst [vmem:[%s1737_s3 + $0x18] sm:$0xff] %v858_v7 }
 0x10a PF: > { %s13_s16 = sadd.s32 1, %s1425_s16   ;;  %s1738_s12 = smov %s1413_s13 }
 0x10b   : > { %p10_p12 = scmp.ge.s32.totalorder %s13_s16, 9   ;;  %s1739_s13 = smov %s1483_s20 }
 0x10c   : > { %s1740_s14 = smov %s1421_s15  ;;  %s1741_s15 = smov %s1743_s17 }
 0x10d   :  { %12 = sbr.rel (!%p10_p12) target bundleno = 3 (0x3), region = 104 }

// kernel: alexnet_forward.17
= control target key start
LH: loop header
LB: loop body
LE: loop exit
PB: predicated region body
PF: predicated region fallthrough
CT: control target
= control target key end

     0   :  { %s733_s1 = inlined_call_operand.vmem [shape: bf16[256,256], index: 1, kind: input, shape index: {}]   ;;  %s734_s0 = inlined_call_operand.vmem [shape: bf16[16,256], index: 0, kind: input, shape index: {}]   ;;  %s735_s2 = inlined_call_operand.vmem [shape: f32[1,256], index: 2, kind: input, shape index: {}]   ;;  %s736_s3 = inlined_call_operand.vmem [shape: f32[16,256], index: 3, kind: output, shape index: {}]  }
   0x1   :  { %v389_v0 = vld [vmem:[%s733_s1 + $0x70] sm:$0xf]  ;;  %v476_v1 = vld [vmem:[%s733_s1 + $0x74] sm:$0xf0]  ;;  %v475_v5 = vld [vmem:[%s733_s1 + $0x74] sm:$0xf] }
   0x2   :  { %v453_v2 = vld [vmem:[%s733_s1 + $0xf0] sm:$0xf]  ;;  %v390_v3 = vor.u32 %v476_v1, %v389_v0  ;;  %v492_v4 = vld [vmem:[%s733_s1 + $0xf4] sm:$0xf0]  ;;  %v391_v6 = vld [vmem:[%s733_s1 + $0x78] sm:$0xf0] }
   0x3   :  { %v454_v7 = vor.u32 %v492_v4, %v453_v2  ;;  %v394_v8 = vor.u32 %v475_v5, %v391_v6  ;;  %v491_v9 = vld [vmem:[%s733_s1 + $0xf4] sm:$0xf]  ;;  %v455_v10 = vld [vmem:[%s733_s1 + $0xf8] sm:$0xf0]  ;;  %v381_v11 = vld [vmem:[%s733_s1 + $0x60] sm:$0xf] }
   0x4   :  { %230 = vmatpush.bf16.msra.mxu0 %v390_v3  ;;  %v458_v12 = vor.u32 %v491_v9, %v455_v10  ;;  %v474_v13 = vld [vmem:[%s733_s1 + $0x64] sm:$0xf0]  ;;  %v445_v14 = vld [vmem:[%s733_s1 + $0xe0] sm:$0xf]  ;;  %v473_v18 = vld [vmem:[%s733_s1 + $0x64] sm:$0xf] }
   0x5   :  { %v490_v15 = vld [vmem:[%s733_s1 + $0xe4] sm:$0xf0]  ;;  %244 = vmatpush.bf16.msra.mxu1 %v454_v7  ;;  %258 = vmatpush.bf16.msra.mxu2 %v394_v8  ;;  %v382_v16 = vor.u32 %v474_v13, %v381_v11  ;;  %v383_v19 = vld [vmem:[%s733_s1 + $0x68] sm:$0xf0]  ;;  %v489_v20 = vld [vmem:[%s733_s1 + $0xe4] sm:$0xf] }
   0x6   :  { %v446_v17 = vor.u32 %v490_v15, %v445_v14  ;;  %272 = vmatpush.bf16.msra.mxu3 %v458_v12  ;;  %v386_v21 = vor.u32 %v473_v18, %v383_v19  ;;  %v447_v22 = vld [vmem:[%s733_s1 + $0xe8] sm:$0xf0]  ;;  %v373_v23 = vld [vmem:[%s733_s1 + $0x50] sm:$0xf]  ;;  %v472_v24 = vld [vmem:[%s733_s1 + $0x54] sm:$0xf0] }
   0x7   :  { %v450_v25 = vor.u32 %v489_v20, %v447_v22  ;;  %v437_v26 = vld [vmem:[%s733_s1 + $0xd0] sm:$0xf]  ;;  %v488_v27 = vld [vmem:[%s733_s1 + $0xd4] sm:$0xf0]  ;;  %v471_v28 = vld [vmem:[%s733_s1 + $0x54] sm:$0xf]  ;;  %v374_v29 = vor.u32 %v472_v24, %v373_v23 }
   0x8   :  { %231 = vmatpush.bf16.msra.mxu0 %v382_v16  ;;  %v375_v30 = vld [vmem:[%s733_s1 + $0x58] sm:$0xf0]  ;;  %v487_v31 = vld [vmem:[%s733_s1 + $0xd4] sm:$0xf]  ;;  %v438_v33 = vor.u32 %v488_v27, %v437_v26  ;;  %v365_v35 = vld [vmem:[%s733_s1 + $0x40] sm:$0xf] }
   0x9   :  { %v439_v32 = vld [vmem:[%s733_s1 + $0xd8] sm:$0xf0]  ;;  %245 = vmatpush.bf16.msra.mxu1 %v446_v17  ;;  %259 = vmatpush.bf16.msra.mxu2 %v386_v21  ;;  %v378_v34 = vor.u32 %v471_v28, %v375_v30  ;;  %v470_v36 = vld [vmem:[%s733_s1 + $0x44] sm:$0xf0]  ;;  %v429_v37 = vld [vmem:[%s733_s1 + $0xc0] sm:$0xf] }
   0xa   :  { %273 = vmatpush.bf16.msra.mxu3 %v450_v25  ;;  %v442_v38 = vor.u32 %v487_v31, %v439_v32  ;;  %v486_v39 = vld [vmem:[%s733_s1 + $0xc4] sm:$0xf0]  ;;  %v469_v40 = vld [vmem:[%s733_s1 + $0x44] sm:$0xf]  ;;  %v367_v41 = vld [vmem:[%s733_s1 + $0x48] sm:$0xf0]  ;;  %v366_v44 = vor.u32 %v470_v36, %v365_v35 }
   0xb   :  { %v485_v42 = vld [vmem:[%s733_s1 + $0xc4] sm:$0xf]  ;;  %v431_v43 = vld [vmem:[%s733_s1 + $0xc8] sm:$0xf0]  ;;  %v430_v45 = vor.u32 %v486_v39, %v429_v37  ;;  %v370_v46 = vor.u32 %v469_v40, %v367_v41  ;;  %v357_v47 = vld [vmem:[%s733_s1 + $0x30] sm:$0xf] }
   0xc   :  { %232 = vmatpush.bf16.msra.mxu0 %v374_v29  ;;  %v468_v48 = vld [vmem:[%s733_s1 + $0x34] sm:$0xf0]  ;;  %v421_v49 = vld [vmem:[%s733_s1 + $0xb0] sm:$0xf]  ;;  %v434_v50 = vor.u32 %v485_v42, %v431_v43  ;;  %v467_v52 = vld [vmem:[%s733_s1 + $0x34] sm:$0xf] }
   0xd   :  { %246 = vmatpush.bf16.msra.mxu1 %v438_v33  ;;  %260 = vmatpush.bf16.msra.mxu2 %v378_v34  ;;  %v484_v51 = vld [vmem:[%s733_s1 + $0xb4] sm:$0xf0]  ;;  %v359_v53 = vld [vmem:[%s733_s1 + $0x38] sm:$0xf0]  ;;  %v483_v54 = vld [vmem:[%s733_s1 + $0xb4] sm:$0xf]  ;;  %v358_v56 = vor.u32 %v468_v48, %v357_v47 }
   0xe   :  { %274 = vmatpush.bf16.msra.mxu3 %v442_v38  ;;  %v423_v55 = vld [vmem:[%s733_s1 + $0xb8] sm:$0xf0]  ;;  %v422_v57 = vor.u32 %v484_v51, %v421_v49  ;;  %v362_v58 = vor.u32 %v467_v52, %v359_v53  ;;  %v349_v59 = vld [vmem:[%s733_s1 + $0x20] sm:$0xf]  ;;  %v466_v60 = vld [vmem:[%s733_s1 + $0x24] sm:$0xf0] }
   0xf   :  { %v413_v61 = vld [vmem:[%s733_s1 + $0xa0] sm:$0xf]  ;;  %v426_v62 = vor.u32 %v483_v54, %v423_v55  ;;  %v482_v63 = vld [vmem:[%s733_s1 + $0xa4] sm:$0xf0]  ;;  %v465_v0 = vld [vmem:[%s733_s1 + $0x24] sm:$0xf]  ;;  %v350_v4 = vor.u32 %v466_v60, %v349_v59 }
  0x10   :  { %233 = vmatpush.bf16.msra.mxu0 %v366_v44  ;;  %v351_v1 = vld [vmem:[%s733_s1 + $0x28] sm:$0xf0]  ;;  %v481_v2 = vld [vmem:[%s733_s1 + $0xa4] sm:$0xf]  ;;  %v414_v5 = vor.u32 %v482_v63, %v413_v61  ;;  %v341_v7 = vld [vmem:[%s733_s1 + $0x10] sm:$0xf] }
  0x11   :  { %247 = vmatpush.bf16.msra.mxu1 %v430_v45  ;;  %261 = vmatpush.bf16.msra.mxu2 %v370_v46  ;;  %v415_v3 = vld [vmem:[%s733_s1 + $0xa8] sm:$0xf0]  ;;  %v354_v6 = vor.u32 %v465_v0, %v351_v1  ;;  %v464_v8 = vld [vmem:[%s733_s1 + $0x14] sm:$0xf0]  ;;  %v405_v9 = vld [vmem:[%s733_s1 + $0x90] sm:$0xf] }
  0x12   :  { %275 = vmatpush.bf16.msra.mxu3 %v434_v50  ;;  %v418_v10 = vor.u32 %v481_v2, %v415_v3  ;;  %v480_v11 = vld [vmem:[%s733_s1 + $0x94] sm:$0xf0]  ;;  %v463_v12 = vld [vmem:[%s733_s1 + $0x14] sm:$0xf]  ;;  %v343_v13 = vld [vmem:[%s733_s1 + $0x18] sm:$0xf0]  ;;  %v342_v16 = vor.u32 %v464_v8, %v341_v7 }
  0x13   :  { %v479_v14 = vld [vmem:[%s733_s1 + $0x94] sm:$0xf]  ;;  %v407_v15 = vld [vmem:[%s733_s1 + $0x98] sm:$0xf0]  ;;  %v406_v17 = vor.u32 %v480_v11, %v405_v9  ;;  %v346_v18 = vor.u32 %v463_v12, %v343_v13  ;;  %v333_v19 = vld [vmem:[%s733_s1] sm:$0xf] }
  0x14   :  { %234 = vmatpush.bf16.msra.mxu0 %v358_v56  ;;  %v462_v20 = vld [vmem:[%s733_s1 + $0x4] sm:$0xf0]  ;;  %v397_v21 = vld [vmem:[%s733_s1 + $0x80] sm:$0xf]  ;;  %v410_v22 = vor.u32 %v479_v14, %v407_v15  ;;  %v461_v24 = vld [vmem:[%s733_s1 + $0x4] sm:$0xf] }
  0x15   :  { %248 = vmatpush.bf16.msra.mxu1 %v422_v57  ;;  %262 = vmatpush.bf16.msra.mxu2 %v362_v58  ;;  %v478_v23 = vld [vmem:[%s733_s1 + $0x84] sm:$0xf0]  ;;  %v335_v25 = vld [vmem:[%s733_s1 + $0x8] sm:$0xf0]  ;;  %v477_v26 = vld [vmem:[%s733_s1 + $0x84] sm:$0xf]  ;;  %v334_v28 = vor.u32 %v462_v20, %v333_v19 }
  0x16   :  { %276 = vmatpush.bf16.msra.mxu3 %v426_v62  ;;  %v399_v27 = vld [vmem:[%s733_s1 + $0x88] sm:$0xf0]  ;;  %v325_v29 = vld [vmem:[%s734_s0] sm:$0xf]  ;;  %v460_v30 = vld [vmem:[%s734_s0 + $0x4] sm:$0xf0]  ;;  %v398_v31 = vor.u32 %v478_v23, %v397_v21  ;;  %v338_v32 = vor.u32 %v461_v24, %v335_v25 }
  0x17   :  { %v459_v33 = vld [vmem:[%s734_s0 + $0x4] sm:$0xf]  ;;  %v327_v34 = vld [vmem:[%s734_s0 + $0x8] sm:$0xf0]  ;;  %v402_v35 = vor.u32 %v477_v26, %v399_v27  ;;  %v326_v36 = vor.u32 %v460_v30, %v325_v29  ;;  %v301_v38 = vld [vmem:[%s735_s2] sm:$0x3] }
  0x18   :  { %235 = vmatpush.bf16.msra.mxu0 %v350_v4  ;;  %v330_v37 = vor.u32 %v459_v33, %v327_v34  ;;  %v303_v42 = vperm.slane %v301_v38, 0  ;;  %v304_v49 = vperm.slane %v301_v38, 1 }
  0x19   :  { %249 = vmatpush.bf16.msra.mxu1 %v414_v5  ;;  %263 = vmatpush.bf16.msra.mxu2 %v354_v6 }
  0x1a   :  { %277 = vmatpush.bf16.msra.mxu3 %v418_v10 }
  0x1c   :  { %236 = vmatpush.bf16.msra.mxu0 %v342_v16 }
  0x1d   :  { %250 = vmatpush.bf16.msra.mxu1 %v406_v17  ;;  %264 = vmatpush.bf16.msra.mxu2 %v346_v18 }
  0x1e   :  { %278 = vmatpush.bf16.msra.mxu3 %v410_v22 }
  0x20   :  { %237 = vmatpush.bf16.msra.mxu0 %v334_v28 }
  0x21   :  { %251 = vmatpush.bf16.msra.mxu1 %v398_v31  ;;  %265 = vmatpush.bf16.msra.mxu2 %v338_v32 }
  0x22   :  { %279 = vmatpush.bf16.msra.mxu3 %v402_v35 }
  0x23   :  { %238 = vmatmul.bf16.vlgmr.msra.gmra.mxu0 %v326_v36 }
  0x24   :  { %252 = vmatmul.bf16.vlgmr.msra.gmra.mxu1 %v330_v37  ;;  %266 = vmatmul.bf16.vlgmr.msra.gmra.mxu2 %v326_v36 }
  0x25   :  { %280 = vmatmul.bf16.vlgmr.msra.gmra.mxu3 %v330_v37 }
  0xa0   :  { %v239_v39 = vpop.f32.mrf.mxu0 }
  0xa1   :  { %v253_v40 = vpop.f32.mrf.mxu1 }
  0xa2   :  { %v254_v41 = vadd.f32 %v253_v40, %v239_v39 }
  0xa4   :  { %v307_v43 = vadd.f32 %v303_v42, %v254_v41 }
  0xa6   :  { %v311_v45 = vmax.f32 %v307_v43, 0.0 }
  0xa7   :  { %v267_v44 = vpop.f32.mrf.mxu2 }
  0xa8   :  { %v281_v46 = vpop.f32.mrf.mxu3  ;;  %v241_v47 = vpop.f32.mrf.mxu0  ;;  %315 = vst [vmem:[%s736_s3] sm:$0xff] %v311_v45 }
  0xa9   :  { %v282_v48 = vadd.f32 %v281_v46, %v267_v44  ;;  %v255_v50 = vpop.f32.mrf.mxu1 }
  0xaa   :  { %v256_v51 = vadd.f32 %v255_v50, %v241_v47 }
  0xab   :  { %v308_v52 = vadd.f32 %v304_v49, %v282_v48 }
  0xac   :  { %v309_v53 = vadd.f32 %v303_v42, %v256_v51 }
  0xad   :  { %v312_v54 = vmax.f32 %v308_v52, 0.0 }
  0xae   :  { %v313_v56 = vmax.f32 %v309_v53, 0.0 }
  0xaf   :  { %v269_v55 = vpop.f32.mrf.mxu2  ;;  %316 = vst [vmem:[%s736_s3 + $0x8] sm:$0xff] %v312_v54 }
  0xb0   :  { %v283_v57 = vpop.f32.mrf.mxu3  ;;  %317 = vst [vmem:[%s736_s3 + $0x10] sm:$0xff] %v313_v56 }
  0xb1   :  { %v284_v58 = vadd.f32 %v283_v57, %v269_v55 }
  0xb3   :  { %v310_v59 = vadd.f32 %v304_v49, %v284_v58 }
  0xb5   :  { %v314_v60 = vmax.f32 %v310_v59, 0.0 }
  0xb7   :  { %318 = vst [vmem:[%s736_s3 + $0x18] sm:$0xff] %v314_v60 }

// kernel: alexnet_forward.19
= control target key start
LH: loop header
LB: loop body
LE: loop exit
PB: predicated region body
PF: predicated region fallthrough
CT: control target
= control target key end

     0   :  { %s394_s1 = inlined_call_operand.vmem [shape: bf16[256,128], index: 1, kind: input, shape index: {}]   ;;  %s395_s0 = inlined_call_operand.vmem [shape: bf16[16,256], index: 0, kind: input, shape index: {}]   ;;  %s396_s2 = inlined_call_operand.vmem [shape: f32[1,128], index: 2, kind: input, shape index: {}]   ;;  %s397_s3 = inlined_call_operand.vmem [shape: f32[16,128], index: 3, kind: output, shape index: {}]  }
   0x1   :  { %v294_v0 = vld [vmem:[%s394_s1 + $0x38] sm:$0xff]  ;;  %v293_v2 = vld [vmem:[%s394_s1 + $0x30] sm:$0xff]  ;;  %v292_v4 = vld [vmem:[%s394_s1 + $0x28] sm:$0xff] }
   0x2   :  { %v302_v1 = vld [vmem:[%s394_s1 + $0x78] sm:$0xff]  ;;  %162 = vmatpush.bf16.msra.mxu0 %v294_v0  ;;  %v301_v3 = vld [vmem:[%s394_s1 + $0x70] sm:$0xff]  ;;  %v300_v5 = vld [vmem:[%s394_s1 + $0x68] sm:$0xff] }
   0x3   :  { %176 = vmatpush.bf16.msra.mxu1 %v302_v1  ;;  %v291_v6 = vld [vmem:[%s394_s1 + $0x20] sm:$0xff]  ;;  %v290_v8 = vld [vmem:[%s394_s1 + $0x18] sm:$0xff]  ;;  %v289_v10 = vld [vmem:[%s394_s1 + $0x10] sm:$0xff] }
   0x4   :  { %v299_v7 = vld [vmem:[%s394_s1 + $0x60] sm:$0xff]  ;;  %v298_v9 = vld [vmem:[%s394_s1 + $0x58] sm:$0xff]  ;;  %v297_v11 = vld [vmem:[%s394_s1 + $0x50] sm:$0xff] }
   0x5   :  { %v288_v12 = vld [vmem:[%s394_s1 + $0x8] sm:$0xff]  ;;  %v287_v14 = vld [vmem:[%s394_s1] sm:$0xff] }
   0x6   :  { %163 = vmatpush.bf16.msra.mxu0 %v293_v2  ;;  %v296_v13 = vld [vmem:[%s394_s1 + $0x48] sm:$0xff]  ;;  %v295_v15 = vld [vmem:[%s394_s1 + $0x40] sm:$0xff] }
   0x7   :  { %177 = vmatpush.bf16.msra.mxu1 %v301_v3  ;;  %v215_v16 = vld [vmem:[%s395_s0] sm:$0xf]  ;;  %v286_v17 = vld [vmem:[%s395_s0 + $0x4] sm:$0xf0]  ;;  %v285_v18 = vld [vmem:[%s395_s0 + $0x4] sm:$0xf] }
   0x8   :  { %v217_v19 = vld [vmem:[%s395_s0 + $0x8] sm:$0xf0]  ;;  %v216_v20 = vor.u32 %v286_v17, %v215_v16  ;;  %v304_v25 = vld [vmem:[%s396_s2] ss:$0 sm:$0xff] }
   0x9   :  { %v220_v21 = vor.u32 %v285_v18, %v217_v19 }
   0xa   :  { %164 = vmatpush.bf16.msra.mxu0 %v292_v4 }
   0xb   :  { %178 = vmatpush.bf16.msra.mxu1 %v300_v5 }
   0xe   :  { %165 = vmatpush.bf16.msra.mxu0 %v291_v6 }
   0xf   :  { %179 = vmatpush.bf16.msra.mxu1 %v299_v7 }
  0x12   :  { %166 = vmatpush.bf16.msra.mxu0 %v290_v8 }
  0x13   :  { %180 = vmatpush.bf16.msra.mxu1 %v298_v9 }
  0x16   :  { %167 = vmatpush.bf16.msra.mxu0 %v289_v10 }
  0x17   :  { %181 = vmatpush.bf16.msra.mxu1 %v297_v11 }
  0x1a   :  { %168 = vmatpush.bf16.msra.mxu0 %v288_v12 }
  0x1b   :  { %182 = vmatpush.bf16.msra.mxu1 %v296_v13 }
  0x1e   :  { %169 = vmatpush.bf16.msra.mxu0 %v287_v14 }
  0x1f   :  { %183 = vmatpush.bf16.msra.mxu1 %v295_v15 }
  0x21   :  { %170 = vmatmul.bf16.vlgmr.msra.gmra.mxu0 %v216_v20 }
  0x22   :  { %184 = vmatmul.bf16.vlgmr.msra.gmra.mxu1 %v220_v21 }
  0x9e   :  { %v171_v22 = vpop.f32.mrf.mxu0 }
  0x9f   :  { %v185_v23 = vpop.f32.mrf.mxu1 }
  0xa0   :  { %v186_v24 = vadd.f32 %v185_v23, %v171_v22 }
  0xa2   :  { %v203_v26 = vadd.f32 %v304_v25, %v186_v24 }
  0xa4   :  { %v205_v27 = vmax.f32 %v203_v26, 0.0 }
  0xa6   :  { %v173_v28 = vpop.f32.mrf.mxu0  ;;  %207 = vst [vmem:[%s397_s3] sm:$0xff] %v205_v27 }
  0xa7   :  { %v187_v29 = vpop.f32.mrf.mxu1 }
  0xa8   :  { %v188_v30 = vadd.f32 %v187_v29, %v173_v28 }
  0xaa   :  { %v204_v31 = vadd.f32 %v304_v25, %v188_v30 }
  0xac   :  { %v206_v32 = vmax.f32 %v204_v31, 0.0 }
  0xae   :  { %208 = vst [vmem:[%s397_s3 + $0x8] sm:$0xff] %v206_v32 }

</bundles_post_ra>
